<compile_context>
chip_gen: v7x
topology: tpu7x:2x2x1
jax: 0.10.0
libtpu: 0.0.40
codegen_flags: <defaults>
</compile_context>

<pallas_src>
import functools
import math

import jax
import jax.numpy as jnp
from jax.experimental import pallas as pl
from jax.experimental.pallas import tpu as pltpu

_INV_SQRT2 = 1.0 / math.sqrt(2.0)
_LN_EPS = 1e-5  # PyTorch LayerNorm default


# ----------------------------- in-kernel helpers -----------------------------

def _gelu_exact(x):
    # PyTorch F.gelu / nn.GELU default: exact erf formulation (EUP slot).
    return 0.5 * x * (1.0 + jax.lax.erf(x * _INV_SQRT2))


def _layernorm(x, g, b):
    mean = jnp.mean(x, axis=-1, keepdims=True)
    var = jnp.mean(jnp.square(x - mean), axis=-1, keepdims=True)
    return (x - mean) * jax.lax.rsqrt(var + _LN_EPS) * g + b


# ------------------------------ Pallas kernels --------------------------------

def _linear_kernel(x_ref, w_ref, b_ref, o_ref):
    # o = x @ w + b    x:(M,K)  w:(K,N) pre-transposed  b:(1,N)
    o_ref[...] = (jnp.dot(x_ref[...], w_ref[...],
                          preferred_element_type=jnp.float32) + b_ref[...])


def pallas_linear(x, w, b):
    """y = x @ w + b with w already stored in (K, N) layout, b shaped (1, N)."""
    M, K = x.shape
    N = w.shape[1]
    return pl.pallas_call(
        _linear_kernel,
        out_shape=jax.ShapeDtypeStruct((M, N), jnp.float32),
        grid=(1,),
        in_specs=[pl.BlockSpec((M, K), lambda i: (0, 0)),
                  pl.BlockSpec((K, N), lambda i: (0, 0)),
                  pl.BlockSpec((1, N), lambda i: (0, 0))],
        out_specs=pl.BlockSpec((M, N), lambda i: (0, 0)),
    )(x, w, b)


def _encoder_layer_kernel(x_ref, wqkv_ref, bqkv_ref, wo_ref, bo_ref,
                          ln1g_ref, ln1b_ref, wff1_ref, bff1_ref,
                          wff2_ref, bff2_ref, ln2g_ref, ln2b_ref,
                          o_ref, *, num_heads, seq_valid):
    """One nn.TransformerEncoderLayer (post-norm, gelu, batch_first, eval),
    fully fused: everything stays in VMEM for one batch element."""
    x = x_ref[0]                                          # (S_pad, D)
    S, D = x.shape
    Dh = D // num_heads
    scale = 1.0 / math.sqrt(Dh)

    # --- QKV projection (single MXU matmul, packed layout) ---
    qkv = (jnp.dot(x, wqkv_ref[...], preferred_element_type=jnp.float32)
           + bqkv_ref[...])                               # (S, 3D)

    # mask padded key columns (sequence was padded S_valid -> S_pad)
    key_mask = (jax.lax.broadcasted_iota(jnp.int32, (S, S), 1) < seq_valid)

    # --- multi-head attention, all heads in-kernel; lane-dense (S, D) out ---
    head_outs = []
    for h in range(num_heads):                            # static unroll, H=4
        qh = qkv[:, h * Dh:(h + 1) * Dh]                  # (S, Dh)
        kh = qkv[:, D + h * Dh:D + (h + 1) * Dh]
        vh = qkv[:, 2 * D + h * Dh:2 * D + (h + 1) * Dh]
        s = jax.lax.dot_general(qh, kh, (((1,), (1,)), ((), ())),
                                preferred_element_type=jnp.float32) * scale
        s = jnp.where(key_mask, s, -1e30)
        m = jnp.max(s, axis=-1, keepdims=True)
        p = jnp.exp(s - m)
        denom = jnp.sum(p, axis=-1, keepdims=True)
        p = p * pl.reciprocal(denom, approx=False)        # one recip + vmul
        head_outs.append(jnp.dot(p, vh, preferred_element_type=jnp.float32))
    attn = jnp.concatenate(head_outs, axis=-1)            # (S, D) = (S, 128)

    # --- attention output projection + residual + LayerNorm1 ---
    sa = (jnp.dot(attn, wo_ref[...], preferred_element_type=jnp.float32)
          + bo_ref[...])
    h1 = _layernorm(x + sa, ln1g_ref[...], ln1b_ref[...])

    # --- FFN with in-kernel exact GELU + residual + LayerNorm2 ---
    ff = (jnp.dot(h1, wff1_ref[...], preferred_element_type=jnp.float32)
          + bff1_ref[...])
    ff = _gelu_exact(ff)
    ff = (jnp.dot(ff, wff2_ref[...], preferred_element_type=jnp.float32)
          + bff2_ref[...])
    o_ref[0] = _layernorm(h1 + ff, ln2g_ref[...], ln2b_ref[...])


def pallas_encoder_layer(h, p, *, num_heads, seq_valid):
    B, S, D = h.shape
    FF = p["ff1_w"].shape[1]

    def full2(shape):
        return pl.BlockSpec(shape, lambda b: (0, 0))

    return pl.pallas_call(
        functools.partial(_encoder_layer_kernel, num_heads=num_heads,
                          seq_valid=seq_valid),
        out_shape=jax.ShapeDtypeStruct((B, S, D), jnp.float32),
        grid=(B,),
        in_specs=[
            pl.BlockSpec((1, S, D), lambda b: (b, 0, 0)),   # activations
            full2((D, 3 * D)), full2((1, 3 * D)),           # in_proj
            full2((D, D)), full2((1, D)),                   # out_proj
            full2((1, D)), full2((1, D)),                   # ln1
            full2((D, FF)), full2((1, FF)),                 # ff1
            full2((FF, D)), full2((1, D)),                  # ff2
            full2((1, D)), full2((1, D)),                   # ln2
        ],
        out_specs=pl.BlockSpec((1, S, D), lambda b: (b, 0, 0)),
        compiler_params=pltpu.CompilerParams(
            dimension_semantics=("parallel",)),
    )(h, p["in_proj_w"], p["in_proj_b"], p["out_proj_w"], p["out_proj_b"],
      p["ln1_g"], p["ln1_b"], p["ff1_w"], p["ff1_b"],
      p["ff2_w"], p["ff2_b"], p["ln2_g"], p["ln2_b"])


def _head_kernel(x_ref, ng_ref, nb_ref, w1_ref, b1_ref, w2_ref, b2_ref, o_ref):
    # final LayerNorm on cls token + projector (Linear -> GELU -> Linear)
    x = _layernorm(x_ref[...], ng_ref[...], nb_ref[...])
    z = (jnp.dot(x, w1_ref[...], preferred_element_type=jnp.float32)
         + b1_ref[...])
    z = _gelu_exact(z)
    o_ref[...] = (jnp.dot(z, w2_ref[...], preferred_element_type=jnp.float32)
                  + b2_ref[...])


def pallas_head(cls_feat, params):
    B, D = cls_feat.shape
    Hp = params["proj_w1"].shape[1]
    out_dim = params["proj_w2"].shape[1]

    def full(shape):
        return pl.BlockSpec(shape, lambda i: (0, 0))

    return pl.pallas_call(
        _head_kernel,
        out_shape=jax.ShapeDtypeStruct((B, out_dim), jnp.float32),
        grid=(1,),
        in_specs=[full((B, D)), full((1, D)), full((1, D)),
                  full((D, Hp)), full((1, Hp)),
                  full((Hp, out_dim)), full((1, out_dim))],
        out_specs=full((B, out_dim)),
    )(cls_feat, params["norm_g"], params["norm_b"],
      params["proj_w1"], params["proj_b1"],
      params["proj_w2"], params["proj_b2"])


# --------------------------------- forward -----------------------------------

def forward(params, x, *, patch_size, hidden_dim, num_heads):
    B = x.shape[0]
    x = x.reshape(B, -1).astype(jnp.float32)          # == torch x.view(B, -1)
    num_patches = x.shape[1] // patch_size
    x = x.reshape(B * num_patches, patch_size)

    # patch embedding (single Pallas linear)
    emb = pallas_linear(x, params["patch_w"], params["patch_b"])
    h = emb.reshape(B, num_patches, hidden_dim)

    # prepend cls token, add positional embedding (tiny JAX glue, ~24 KB)
    cls = jnp.broadcast_to(params["cls_token"], (B, 1, hidden_dim))
    h = jnp.concatenate([cls, h], axis=1) + params["pos_embed"]   # (B, S, D)

    # pad sequence to a multiple of 8 sublanes; padded keys masked in-kernel
    seq_valid = num_patches + 1
    seq_pad = ((seq_valid + 7) // 8) * 8
    if seq_pad != seq_valid:
        h = jnp.pad(h, ((0, 0), (0, seq_pad - seq_valid), (0, 0)))

    # transformer encoder: one fused Pallas kernel per layer
    for lp in params["layers"]:
        h = pallas_encoder_layer(h, lp, num_heads=num_heads,
                                 seq_valid=seq_valid)

    # final LayerNorm on cls token + projector head (fused kernel)
    return pallas_head(h[:, 0, :], params)


# -------------------------------- parameters ----------------------------------

def init_params(key, *, input_dim, out_dim, patch_size, hidden_dim,
                num_layers, num_heads):
    del num_heads  # head count does not change parameter shapes
    num_patches = input_dim // patch_size
    keys = iter(jax.random.split(key, 8 + 4 * num_layers))

    def nrm(shape, std=0.02):
        return jax.random.normal(next(keys), shape, jnp.float32) * std

    ff = hidden_dim * 4
    # All weight matrices are stored pre-transposed as (in_features, out_features)
    # so no per-forward transpose is needed; biases are stored as (1, N).
    params = dict(
        patch_w=nrm((patch_size, hidden_dim)),
        patch_b=jnp.zeros((1, hidden_dim), jnp.float32),
        pos_embed=jax.random.normal(next(keys),
                                    (1, num_patches + 1, hidden_dim),
                                    jnp.float32),
        cls_token=jax.random.normal(next(keys), (1, 1, hidden_dim),
                                    jnp.float32),
        norm_g=jnp.ones((1, hidden_dim), jnp.float32),
        norm_b=jnp.zeros((1, hidden_dim), jnp.float32),
        proj_w1=nrm((hidden_dim, 512)),
        proj_b1=jnp.zeros((1, 512), jnp.float32),
        proj_w2=nrm((512, out_dim)),
        proj_b2=jnp.zeros((1, out_dim), jnp.float32),
        layers=[],
    )
    for _ in range(num_layers):
        params["layers"].append(dict(
            in_proj_w=nrm((hidden_dim, 3 * hidden_dim)),
            in_proj_b=jnp.zeros((1, 3 * hidden_dim), jnp.float32),
            out_proj_w=nrm((hidden_dim, hidden_dim)),
            out_proj_b=jnp.zeros((1, hidden_dim), jnp.float32),
            ff1_w=nrm((hidden_dim, ff)),
            ff1_b=jnp.zeros((1, ff), jnp.float32),
            ff2_w=nrm((ff, hidden_dim)),
            ff2_b=jnp.zeros((1, hidden_dim), jnp.float32),
            ln1_g=jnp.ones((1, hidden_dim), jnp.float32),
            ln1_b=jnp.zeros((1, hidden_dim), jnp.float32),
            ln2_g=jnp.ones((1, hidden_dim), jnp.float32),
            ln2_b=jnp.zeros((1, hidden_dim), jnp.float32),
        ))
    return params


# ----------------------------------- main --------------------------------------

if __name__ == "__main__":
    B, C, Himg, Wimg = 2, 4, 16, 16
    input_dim = C * Himg * Wimg           # 1024
    patch_size = 64                       # module default -> 16 patches
    hidden_dim = 128
    num_layers = 2
    num_heads = 4
    out_dim = 32

    key = jax.random.PRNGKey(0)
    pkey, xkey = jax.random.split(key)
    params = init_params(pkey, input_dim=input_dim, out_dim=out_dim,
                         patch_size=patch_size, hidden_dim=hidden_dim,
                         num_layers=num_layers, num_heads=num_heads)
    x = jax.random.normal(xkey, (B, C, Himg, Wimg), jnp.float32)

    fwd = jax.jit(functools.partial(forward, patch_size=patch_size,
                                    hidden_dim=hidden_dim,
                                    num_heads=num_heads))
    out = fwd(params, x)
    jax.block_until_ready(out)
    assert out.shape == (B, out_dim), out.shape
    assert jnp.all(jnp.isfinite(out))
    print("KERNEL_OK")
</pallas_src>

<mosaic_0001>
module attributes {stable_mosaic.version = 11 : i64} {
  func.func @_linear_kernel(%arg0: i32, %arg1: memref<32x64xf32, #tpu.memory_space<vmem>>, %arg2: memref<64x128xf32, #tpu.memory_space<vmem>>, %arg3: memref<1x128xf32, #tpu.memory_space<vmem>>, %arg4: memref<32x128xf32, #tpu.memory_space<vmem>>) attributes {dimension_semantics = [#tpu.dimension_semantics<arbitrary>], iteration_bounds = array<i64: 1>, scalar_prefetch = 0 : i64, scratch_operands = 0 : i64, tpu.core_type = #tpu.core_type<tc>, window_params = [{pipeline_mode = #tpu.pipeline_mode<synchronous>, transform_indices = @transform_0, window_bounds = array<i64: 32, 64>}, {pipeline_mode = #tpu.pipeline_mode<synchronous>, transform_indices = @transform_1, window_bounds = array<i64: 64, 128>}, {pipeline_mode = #tpu.pipeline_mode<synchronous>, transform_indices = @transform_2, window_bounds = array<i64: 1, 128>}, {pipeline_mode = #tpu.pipeline_mode<synchronous>, transform_indices = @transform_3, window_bounds = array<i64: 32, 128>}]} {
    %c0 = arith.constant 0 : index
    %c0_0 = arith.constant 0 : index
    %0 = vector.load %arg1[%c0, %c0_0] : memref<32x64xf32, #tpu.memory_space<vmem>>, vector<32x64xf32>
    %c0_1 = arith.constant 0 : index
    %c0_2 = arith.constant 0 : index
    %1 = vector.load %arg2[%c0_1, %c0_2] : memref<64x128xf32, #tpu.memory_space<vmem>>, vector<64x128xf32>
    %cst = arith.constant dense<0.000000e+00> : vector<32x128xf32>
    %2 = tpu.matmul %0, %1, %cst {dimension_numbers = #tpu.dot_dimension_numbers<[1], [0], [0], [1], [0, 0, 1, 1], [], []>} : vector<32x64xf32>, vector<64x128xf32>, vector<32x128xf32> -> vector<32x128xf32>
    %c0_3 = arith.constant 0 : index
    %c0_4 = arith.constant 0 : index
    %3 = vector.load %arg3[%c0_3, %c0_4] : memref<1x128xf32, #tpu.memory_space<vmem>>, vector<1x128xf32>
    %4 = vector.broadcast %3 : vector<1x128xf32> to vector<32x128xf32>
    %5 = arith.addf %2, %4 : vector<32x128xf32>
    %c0_5 = arith.constant 0 : index
    %c0_6 = arith.constant 0 : index
    %6 = vector.load %arg4[%c0_5, %c0_6] : memref<32x128xf32, #tpu.memory_space<vmem>>, vector<32x128xf32>
    tpu.vector_store %arg4[%c0_5, %c0_6], %5 {strides = array<i32>} : memref<32x128xf32, #tpu.memory_space<vmem>>, vector<32x128xf32>,
    return
  }
  func.func @transform_0(%arg0: i32) -> (i32, i32) {
    %c0_i32 = arith.constant 0 : i32
    %c0_i32_0 = arith.constant 0 : i32
    %c0_i32_1 = arith.constant 0 : i32
    return %c0_i32, %c0_i32_0 : i32, i32
  }
  func.func @transform_1(%arg0: i32) -> (i32, i32) {
    %c0_i32 = arith.constant 0 : i32
    %c0_i32_0 = arith.constant 0 : i32
    %c0_i32_1 = arith.constant 0 : i32
    return %c0_i32, %c0_i32_0 : i32, i32
  }
  func.func @transform_2(%arg0: i32) -> (i32, i32) {
    %c0_i32 = arith.constant 0 : i32
    %c0_i32_0 = arith.constant 0 : i32
    %c0_i32_1 = arith.constant 0 : i32
    return %c0_i32, %c0_i32_0 : i32, i32
  }
  func.func @transform_3(%arg0: i32) -> (i32, i32) {
    %c0_i32 = arith.constant 0 : i32
    %c0_i32_0 = arith.constant 0 : i32
    %c0_i32_1 = arith.constant 0 : i32
    return %c0_i32, %c0_i32_0 : i32, i32
  }
}

module attributes {stable_mosaic.version = 11 : i64} {
  func.func @_encoder_layer_kernel(%arg0: i32, %arg1: memref<1x24x128xf32, #tpu.memory_space<vmem>>, %arg2: memref<128x384xf32, #tpu.memory_space<vmem>>, %arg3: memref<1x384xf32, #tpu.memory_space<vmem>>, %arg4: memref<128x128xf32, #tpu.memory_space<vmem>>, %arg5: memref<1x128xf32, #tpu.memory_space<vmem>>, %arg6: memref<1x128xf32, #tpu.memory_space<vmem>>, %arg7: memref<1x128xf32, #tpu.memory_space<vmem>>, %arg8: memref<128x512xf32, #tpu.memory_space<vmem>>, %arg9: memref<1x512xf32, #tpu.memory_space<vmem>>, %arg10: memref<512x128xf32, #tpu.memory_space<vmem>>, %arg11: memref<1x128xf32, #tpu.memory_space<vmem>>, %arg12: memref<1x128xf32, #tpu.memory_space<vmem>>, %arg13: memref<1x128xf32, #tpu.memory_space<vmem>>, %arg14: memref<1x24x128xf32, #tpu.memory_space<vmem>>) attributes {dimension_semantics = [#tpu.dimension_semantics<parallel>], iteration_bounds = array<i64: 2>, scalar_prefetch = 0 : i64, scratch_operands = 0 : i64, tpu.core_type = #tpu.core_type<tc>, window_params = [{transform_indices = @transform_0, window_bounds = array<i64: 1, 24, 128>}, {pipeline_mode = #tpu.pipeline_mode<synchronous>, transform_indices = @transform_1, window_bounds = array<i64: 128, 384>}, {pipeline_mode = #tpu.pipeline_mode<synchronous>, transform_indices = @transform_2, window_bounds = array<i64: 1, 384>}, {pipeline_mode = #tpu.pipeline_mode<synchronous>, transform_indices = @transform_3, window_bounds = array<i64: 128, 128>}, {pipeline_mode = #tpu.pipeline_mode<synchronous>, transform_indices = @transform_4, window_bounds = array<i64: 1, 128>}, {pipeline_mode = #tpu.pipeline_mode<synchronous>, transform_indices = @transform_5, window_bounds = array<i64: 1, 128>}, {pipeline_mode = #tpu.pipeline_mode<synchronous>, transform_indices = @transform_6, window_bounds = array<i64: 1, 128>}, {pipeline_mode = #tpu.pipeline_mode<synchronous>, transform_indices = @transform_7, window_bounds = array<i64: 128, 512>}, {pipeline_mode = #tpu.pipeline_mode<synchronous>, transform_indices = @transform_8, window_bounds = array<i64: 1, 512>}, {pipeline_mode = #tpu.pipeline_mode<synchronous>, transform_indices = @transform_9, window_bounds = array<i64: 512, 128>}, {pipeline_mode = #tpu.pipeline_mode<synchronous>, transform_indices = @transform_10, window_bounds = array<i64: 1, 128>}, {pipeline_mode = #tpu.pipeline_mode<synchronous>, transform_indices = @transform_11, window_bounds = array<i64: 1, 128>}, {pipeline_mode = #tpu.pipeline_mode<synchronous>, transform_indices = @transform_12, window_bounds = array<i64: 1, 128>}, {transform_indices = @transform_13, window_bounds = array<i64: 1, 24, 128>}]} {
    %c0 = arith.constant 0 : index
    %c0_0 = arith.constant 0 : index
    %c0_1 = arith.constant 0 : index
    %0 = vector.load %arg1[%c0, %c0_0, %c0_1] : memref<1x24x128xf32, #tpu.memory_space<vmem>>, vector<1x24x128xf32>
    %1 = vector.shape_cast %0 : vector<1x24x128xf32> to vector<24x128xf32>
    %c0_2 = arith.constant 0 : index
    %c0_3 = arith.constant 0 : index
    %2 = vector.load %arg2[%c0_2, %c0_3] : memref<128x384xf32, #tpu.memory_space<vmem>>, vector<128x384xf32>
    %cst = arith.constant dense<0.000000e+00> : vector<24x384xf32>
    %3 = tpu.matmul %1, %2, %cst {dimension_numbers = #tpu.dot_dimension_numbers<[1], [0], [0], [1], [0, 0, 1, 1], [], []>} : vector<24x128xf32>, vector<128x384xf32>, vector<24x384xf32> -> vector<24x384xf32>
    %c0_4 = arith.constant 0 : index
    %c0_5 = arith.constant 0 : index
    %4 = vector.load %arg3[%c0_4, %c0_5] : memref<1x384xf32, #tpu.memory_space<vmem>>, vector<1x384xf32>
    %5 = vector.broadcast %4 : vector<1x384xf32> to vector<24x384xf32>
    %6 = arith.addf %3, %5 : vector<24x384xf32>
    %7 = tpu.iota {dimensions = array<i32: 1>} : vector<24x24xi32>
    %c17_i32 = arith.constant 17 : i32
    %8 = vector.broadcast %c17_i32 : i32 to vector<24x24xi32>
    %9 = arith.cmpi slt, %7, %8 : vector<24x24xi32>
    %10 = vector.extract_strided_slice %6 {offsets = [0, 0], sizes = [24, 32], strides = [1, 1]} : vector<24x384xf32> to vector<24x32xf32>
    %11 = vector.extract_strided_slice %6 {offsets = [0, 128], sizes = [24, 32], strides = [1, 1]} : vector<24x384xf32> to vector<24x32xf32>
    %12 = vector.extract_strided_slice %6 {offsets = [0, 256], sizes = [24, 32], strides = [1, 1]} : vector<24x384xf32> to vector<24x32xf32>
    %cst_6 = arith.constant dense<0.000000e+00> : vector<24x24xf32>
    %13 = tpu.matmul %10, %11, %cst_6 {dimension_numbers = #tpu.dot_dimension_numbers<[1], [1], [0], [0], [0, 0, 1, 0], [], []>} : vector<24x32xf32>, vector<24x32xf32>, vector<24x24xf32> -> vector<24x24xf32>
    %cst_7 = arith.constant 0.176776692 : f32
    %14 = vector.broadcast %cst_7 : f32 to vector<24x24xf32>
    %15 = arith.mulf %13, %14 : vector<24x24xf32>
    %cst_8 = arith.constant -1.000000e+30 : f32
    %16 = vector.broadcast %cst_8 : f32 to vector<24x24xf32>
    %17 = arith.select %9, %15, %16 : vector<24x24xi1>, vector<24x24xf32>
    %cst_9 = arith.constant dense<0xFF800000> : vector<24xf32>
    %18 = vector.multi_reduction <maximumf>, %17, %cst_9 [1] : vector<24x24xf32> to vector<24xf32>
    %19 = vector.shape_cast %18 : vector<24xf32> to vector<24x1xf32>
    %20 = vector.broadcast %19 : vector<24x1xf32> to vector<24x24xf32>
    %21 = arith.subf %17, %20 : vector<24x24xf32>
    %22 = math.exp %21 : vector<24x24xf32>
    %cst_10 = arith.constant dense<0.000000e+00> : vector<24xf32>
    %23 = vector.multi_reduction <add>, %22, %cst_10 [1] : vector<24x24xf32> to vector<24xf32>
    %24 = vector.shape_cast %23 : vector<24xf32> to vector<24x1xf32>
    %25 = tpu.reciprocal %24 : vector<24x1xf32> -> vector<24x1xf32>
    %26 = vector.broadcast %25 : vector<24x1xf32> to vector<24x24xf32>
    %27 = arith.mulf %22, %26 : vector<24x24xf32>
    %cst_11 = arith.constant dense<0.000000e+00> : vector<24x32xf32>
    %28 = tpu.matmul %27, %12, %cst_11 {dimension_numbers = #tpu.dot_dimension_numbers<[1], [0], [0], [1], [0, 0, 1, 1], [], []>} : vector<24x24xf32>, vector<24x32xf32>, vector<24x32xf32> -> vector<24x32xf32>
    %29 = vector.extract_strided_slice %6 {offsets = [0, 32], sizes = [24, 32], strides = [1, 1]} : vector<24x384xf32> to vector<24x32xf32>
    %30 = vector.extract_strided_slice %6 {offsets = [0, 160], sizes = [24, 32], strides = [1, 1]} : vector<24x384xf32> to vector<24x32xf32>
    %31 = vector.extract_strided_slice %6 {offsets = [0, 288], sizes = [24, 32], strides = [1, 1]} : vector<24x384xf32> to vector<24x32xf32>
    %cst_12 = arith.constant dense<0.000000e+00> : vector<24x24xf32>
    %32 = tpu.matmul %29, %30, %cst_12 {dimension_numbers = #tpu.dot_dimension_numbers<[1], [1], [0], [0], [0, 0, 1, 0], [], []>} : vector<24x32xf32>, vector<24x32xf32>, vector<24x24xf32> -> vector<24x24xf32>
    %cst_13 = arith.constant 0.176776692 : f32
    %33 = vector.broadcast %cst_13 : f32 to vector<24x24xf32>
    %34 = arith.mulf %32, %33 : vector<24x24xf32>
    %cst_14 = arith.constant -1.000000e+30 : f32
    %35 = vector.broadcast %cst_14 : f32 to vector<24x24xf32>
    %36 = arith.select %9, %34, %35 : vector<24x24xi1>, vector<24x24xf32>
    %cst_15 = arith.constant dense<0xFF800000> : vector<24xf32>
    %37 = vector.multi_reduction <maximumf>, %36, %cst_15 [1] : vector<24x24xf32> to vector<24xf32>
    %38 = vector.shape_cast %37 : vector<24xf32> to vector<24x1xf32>
    %39 = vector.broadcast %38 : vector<24x1xf32> to vector<24x24xf32>
    %40 = arith.subf %36, %39 : vector<24x24xf32>
    %41 = math.exp %40 : vector<24x24xf32>
    %cst_16 = arith.constant dense<0.000000e+00> : vector<24xf32>
    %42 = vector.multi_reduction <add>, %41, %cst_16 [1] : vector<24x24xf32> to vector<24xf32>
    %43 = vector.shape_cast %42 : vector<24xf32> to vector<24x1xf32>
    %44 = tpu.reciprocal %43 : vector<24x1xf32> -> vector<24x1xf32>
    %45 = vector.broadcast %44 : vector<24x1xf32> to vector<24x24xf32>
    %46 = arith.mulf %41, %45 : vector<24x24xf32>
    %cst_17 = arith.constant dense<0.000000e+00> : vector<24x32xf32>
    %47 = tpu.matmul %46, %31, %cst_17 {dimension_numbers = #tpu.dot_dimension_numbers<[1], [0], [0], [1], [0, 0, 1, 1], [], []>} : vector<24x24xf32>, vector<24x32xf32>, vector<24x32xf32> -> vector<24x32xf32>
    %48 = vector.extract_strided_slice %6 {offsets = [0, 64], sizes = [24, 32], strides = [1, 1]} : vector<24x384xf32> to vector<24x32xf32>
    %49 = vector.extract_strided_slice %6 {offsets = [0, 192], sizes = [24, 32], strides = [1, 1]} : vector<24x384xf32> to vector<24x32xf32>
    %50 = vector.extract_strided_slice %6 {offsets = [0, 320], sizes = [24, 32], strides = [1, 1]} : vector<24x384xf32> to vector<24x32xf32>
    %cst_18 = arith.constant dense<0.000000e+00> : vector<24x24xf32>
    %51 = tpu.matmul %48, %49, %cst_18 {dimension_numbers = #tpu.dot_dimension_numbers<[1], [1], [0], [0], [0, 0, 1, 0], [], []>} : vector<24x32xf32>, vector<24x32xf32>, vector<24x24xf32> -> vector<24x24xf32>
    %cst_19 = arith.constant 0.176776692 : f32
    %52 = vector.broadcast %cst_19 : f32 to vector<24x24xf32>
    %53 = arith.mulf %51, %52 : vector<24x24xf32>
    %cst_20 = arith.constant -1.000000e+30 : f32
    %54 = vector.broadcast %cst_20 : f32 to vector<24x24xf32>
    %55 = arith.select %9, %53, %54 : vector<24x24xi1>, vector<24x24xf32>
    %cst_21 = arith.constant dense<0xFF800000> : vector<24xf32>
    %56 = vector.multi_reduction <maximumf>, %55, %cst_21 [1] : vector<24x24xf32> to vector<24xf32>
    %57 = vector.shape_cast %56 : vector<24xf32> to vector<24x1xf32>
    %58 = vector.broadcast %57 : vector<24x1xf32> to vector<24x24xf32>
    %59 = arith.subf %55, %58 : vector<24x24xf32>
    %60 = math.exp %59 : vector<24x24xf32>
    %cst_22 = arith.constant dense<0.000000e+00> : vector<24xf32>
    %61 = vector.multi_reduction <add>, %60, %cst_22 [1] : vector<24x24xf32> to vector<24xf32>
    %62 = vector.shape_cast %61 : vector<24xf32> to vector<24x1xf32>
    %63 = tpu.reciprocal %62 : vector<24x1xf32> -> vector<24x1xf32>
    %64 = vector.broadcast %63 : vector<24x1xf32> to vector<24x24xf32>
    %65 = arith.mulf %60, %64 : vector<24x24xf32>
    %cst_23 = arith.constant dense<0.000000e+00> : vector<24x32xf32>
    %66 = tpu.matmul %65, %50, %cst_23 {dimension_numbers = #tpu.dot_dimension_numbers<[1], [0], [0], [1], [0, 0, 1, 1], [], []>} : vector<24x24xf32>, vector<24x32xf32>, vector<24x32xf32> -> vector<24x32xf32>
    %67 = vector.extract_strided_slice %6 {offsets = [0, 96], sizes = [24, 32], strides = [1, 1]} : vector<24x384xf32> to vector<24x32xf32>
    %68 = vector.extract_strided_slice %6 {offsets = [0, 224], sizes = [24, 32], strides = [1, 1]} : vector<24x384xf32> to vector<24x32xf32>
    %69 = vector.extract_strided_slice %6 {offsets = [0, 352], sizes = [24, 32], strides = [1, 1]} : vector<24x384xf32> to vector<24x32xf32>
    %cst_24 = arith.constant dense<0.000000e+00> : vector<24x24xf32>
    %70 = tpu.matmul %67, %68, %cst_24 {dimension_numbers = #tpu.dot_dimension_numbers<[1], [1], [0], [0], [0, 0, 1, 0], [], []>} : vector<24x32xf32>, vector<24x32xf32>, vector<24x24xf32> -> vector<24x24xf32>
    %cst_25 = arith.constant 0.176776692 : f32
    %71 = vector.broadcast %cst_25 : f32 to vector<24x24xf32>
    %72 = arith.mulf %70, %71 : vector<24x24xf32>
    %cst_26 = arith.constant -1.000000e+30 : f32
    %73 = vector.broadcast %cst_26 : f32 to vector<24x24xf32>
    %74 = arith.select %9, %72, %73 : vector<24x24xi1>, vector<24x24xf32>
    %cst_27 = arith.constant dense<0xFF800000> : vector<24xf32>
    %75 = vector.multi_reduction <maximumf>, %74, %cst_27 [1] : vector<24x24xf32> to vector<24xf32>
    %76 = vector.shape_cast %75 : vector<24xf32> to vector<24x1xf32>
    %77 = vector.broadcast %76 : vector<24x1xf32> to vector<24x24xf32>
    %78 = arith.subf %74, %77 : vector<24x24xf32>
    %79 = math.exp %78 : vector<24x24xf32>
    %cst_28 = arith.constant dense<0.000000e+00> : vector<24xf32>
    %80 = vector.multi_reduction <add>, %79, %cst_28 [1] : vector<24x24xf32> to vector<24xf32>
    %81 = vector.shape_cast %80 : vector<24xf32> to vector<24x1xf32>
    %82 = tpu.reciprocal %81 : vector<24x1xf32> -> vector<24x1xf32>
    %83 = vector.broadcast %82 : vector<24x1xf32> to vector<24x24xf32>
    %84 = arith.mulf %79, %83 : vector<24x24xf32>
    %cst_29 = arith.constant dense<0.000000e+00> : vector<24x32xf32>
    %85 = tpu.matmul %84, %69, %cst_29 {dimension_numbers = #tpu.dot_dimension_numbers<[1], [0], [0], [1], [0, 0, 1, 1], [], []>} : vector<24x24xf32>, vector<24x32xf32>, vector<24x32xf32> -> vector<24x32xf32>
    %86 = tpu.concatenate %28, %47, %66, %85 in 1 : vector<24x32xf32>, vector<24x32xf32>, vector<24x32xf32>, vector<24x32xf32> -> vector<24x128xf32>
    %c0_30 = arith.constant 0 : index
    %c0_31 = arith.constant 0 : index
    %87 = vector.load %arg4[%c0_30, %c0_31] : memref<128x128xf32, #tpu.memory_space<vmem>>, vector<128x128xf32>
    %cst_32 = arith.constant dense<0.000000e+00> : vector<24x128xf32>
    %88 = tpu.matmul %86, %87, %cst_32 {dimension_numbers = #tpu.dot_dimension_numbers<[1], [0], [0], [1], [0, 0, 1, 1], [], []>} : vector<24x128xf32>, vector<128x128xf32>, vector<24x128xf32> -> vector<24x128xf32>
    %c0_33 = arith.constant 0 : index
    %c0_34 = arith.constant 0 : index
    %89 = vector.load %arg5[%c0_33, %c0_34] : memref<1x128xf32, #tpu.memory_space<vmem>>, vector<1x128xf32>
    %90 = vector.broadcast %89 : vector<1x128xf32> to vector<24x128xf32>
    %91 = arith.addf %88, %90 : vector<24x128xf32>
    %92 = arith.addf %1, %91 : vector<24x128xf32>
    %c0_35 = arith.constant 0 : index
    %c0_36 = arith.constant 0 : index
    %93 = vector.load %arg6[%c0_35, %c0_36] : memref<1x128xf32, #tpu.memory_space<vmem>>, vector<1x128xf32>
    %c0_37 = arith.constant 0 : index
    %c0_38 = arith.constant 0 : index
    %94 = vector.load %arg7[%c0_37, %c0_38] : memref<1x128xf32, #tpu.memory_space<vmem>>, vector<1x128xf32>
    %cst_39 = arith.constant dense<0.000000e+00> : vector<24xf32>
    %95 = vector.multi_reduction <add>, %92, %cst_39 [1] : vector<24x128xf32> to vector<24xf32>
    %96 = vector.shape_cast %95 : vector<24xf32> to vector<24x1xf32>
    %cst_40 = arith.constant 1.280000e+02 : f32
    %97 = vector.broadcast %cst_40 : f32 to vector<24x1xf32>
    %98 = arith.divf %96, %97 : vector<24x1xf32>
    %99 = vector.broadcast %98 : vector<24x1xf32> to vector<24x128xf32>
    %100 = arith.subf %92, %99 : vector<24x128xf32>
    %101 = arith.mulf %100, %100 : vector<24x128xf32>
    %cst_41 = arith.constant dense<0.000000e+00> : vector<24xf32>
    %102 = vector.multi_reduction <add>, %101, %cst_41 [1] : vector<24x128xf32> to vector<24xf32>
    %103 = vector.shape_cast %102 : vector<24xf32> to vector<24x1xf32>
    %cst_42 = arith.constant 1.280000e+02 : f32
    %104 = vector.broadcast %cst_42 : f32 to vector<24x1xf32>
    %105 = arith.divf %103, %104 : vector<24x1xf32>
    %106 = vector.broadcast %98 : vector<24x1xf32> to vector<24x128xf32>
    %107 = arith.subf %92, %106 : vector<24x128xf32>
    %cst_43 = arith.constant 9.99999974E-6 : f32
    %108 = vector.broadcast %cst_43 : f32 to vector<24x1xf32>
    %109 = arith.addf %105, %108 : vector<24x1xf32>
    %110 = math.rsqrt %109 : vector<24x1xf32>
    %111 = vector.broadcast %110 : vector<24x1xf32> to vector<24x128xf32>
    %112 = arith.mulf %107, %111 : vector<24x128xf32>
    %113 = vector.broadcast %93 : vector<1x128xf32> to vector<24x128xf32>
    %114 = arith.mulf %112, %113 : vector<24x128xf32>
    %115 = vector.broadcast %94 : vector<1x128xf32> to vector<24x128xf32>
    %116 = arith.addf %114, %115 : vector<24x128xf32>
    %c0_44 = arith.constant 0 : index
    %c0_45 = arith.constant 0 : index
    %117 = vector.load %arg8[%c0_44, %c0_45] : memref<128x512xf32, #tpu.memory_space<vmem>>, vector<128x512xf32>
    %cst_46 = arith.constant dense<0.000000e+00> : vector<24x512xf32>
    %118 = tpu.matmul %116, %117, %cst_46 {dimension_numbers = #tpu.dot_dimension_numbers<[1], [0], [0], [1], [0, 0, 1, 1], [], []>} : vector<24x128xf32>, vector<128x512xf32>, vector<24x512xf32> -> vector<24x512xf32>
    %c0_47 = arith.constant 0 : index
    %c0_48 = arith.constant 0 : index
    %119 = vector.load %arg9[%c0_47, %c0_48] : memref<1x512xf32, #tpu.memory_space<vmem>>, vector<1x512xf32>
    %120 = vector.broadcast %119 : vector<1x512xf32> to vector<24x512xf32>
    %121 = arith.addf %118, %120 : vector<24x512xf32>
    %cst_49 = arith.constant 5.000000e-01 : f32
    %122 = vector.broadcast %cst_49 : f32 to vector<24x512xf32>
    %123 = arith.mulf %122, %121 : vector<24x512xf32>
    %cst_50 = arith.constant 0.707106769 : f32
    %124 = vector.broadcast %cst_50 : f32 to vector<24x512xf32>
    %125 = arith.mulf %121, %124 : vector<24x512xf32>
    %126 = math.erf %125 : vector<24x512xf32>
    %cst_51 = arith.constant 1.000000e+00 : f32
    %127 = vector.broadcast %cst_51 : f32 to vector<24x512xf32>
    %128 = arith.addf %127, %126 : vector<24x512xf32>
    %129 = arith.mulf %123, %128 : vector<24x512xf32>
    %c0_52 = arith.constant 0 : index
    %c0_53 = arith.constant 0 : index
    %130 = vector.load %arg10[%c0_52, %c0_53] : memref<512x128xf32, #tpu.memory_space<vmem>>, vector<512x128xf32>
    %cst_54 = arith.constant dense<0.000000e+00> : vector<24x128xf32>
    %131 = tpu.matmul %129, %130, %cst_54 {dimension_numbers = #tpu.dot_dimension_numbers<[1], [0], [0], [1], [0, 0, 1, 1], [], []>} : vector<24x512xf32>, vector<512x128xf32>, vector<24x128xf32> -> vector<24x128xf32>
    %c0_55 = arith.constant 0 : index
    %c0_56 = arith.constant 0 : index
    %132 = vector.load %arg11[%c0_55, %c0_56] : memref<1x128xf32, #tpu.memory_space<vmem>>, vector<1x128xf32>
    %133 = vector.broadcast %132 : vector<1x128xf32> to vector<24x128xf32>
    %134 = arith.addf %131, %133 : vector<24x128xf32>
    %135 = arith.addf %116, %134 : vector<24x128xf32>
    %c0_57 = arith.constant 0 : index
    %c0_58 = arith.constant 0 : index
    %136 = vector.load %arg12[%c0_57, %c0_58] : memref<1x128xf32, #tpu.memory_space<vmem>>, vector<1x128xf32>
    %c0_59 = arith.constant 0 : index
    %c0_60 = arith.constant 0 : index
    %137 = vector.load %arg13[%c0_59, %c0_60] : memref<1x128xf32, #tpu.memory_space<vmem>>, vector<1x128xf32>
    %cst_61 = arith.constant dense<0.000000e+00> : vector<24xf32>
    %138 = vector.multi_reduction <add>, %135, %cst_61 [1] : vector<24x128xf32> to vector<24xf32>
    %139 = vector.shape_cast %138 : vector<24xf32> to vector<24x1xf32>
    %cst_62 = arith.constant 1.280000e+02 : f32
    %140 = vector.broadcast %cst_62 : f32 to vector<24x1xf32>
    %141 = arith.divf %139, %140 : vector<24x1xf32>
    %142 = vector.broadcast %141 : vector<24x1xf32> to vector<24x128xf32>
    %143 = arith.subf %135, %142 : vector<24x128xf32>
    %144 = arith.mulf %143, %143 : vector<24x128xf32>
    %cst_63 = arith.constant dense<0.000000e+00> : vector<24xf32>
    %145 = vector.multi_reduction <add>, %144, %cst_63 [1] : vector<24x128xf32> to vector<24xf32>
    %146 = vector.shape_cast %145 : vector<24xf32> to vector<24x1xf32>
    %cst_64 = arith.constant 1.280000e+02 : f32
    %147 = vector.broadcast %cst_64 : f32 to vector<24x1xf32>
    %148 = arith.divf %146, %147 : vector<24x1xf32>
    %149 = vector.broadcast %141 : vector<24x1xf32> to vector<24x128xf32>
    %150 = arith.subf %135, %149 : vector<24x128xf32>
    %cst_65 = arith.constant 9.99999974E-6 : f32
    %151 = vector.broadcast %cst_65 : f32 to vector<24x1xf32>
    %152 = arith.addf %148, %151 : vector<24x1xf32>
    %153 = math.rsqrt %152 : vector<24x1xf32>
    %154 = vector.broadcast %153 : vector<24x1xf32> to vector<24x128xf32>
    %155 = arith.mulf %150, %154 : vector<24x128xf32>
    %156 = vector.broadcast %136 : vector<1x128xf32> to vector<24x128xf32>
    %157 = arith.mulf %155, %156 : vector<24x128xf32>
    %158 = vector.broadcast %137 : vector<1x128xf32> to vector<24x128xf32>
    %159 = arith.addf %157, %158 : vector<24x128xf32>
    %c0_66 = arith.constant 0 : index
    %c0_67 = arith.constant 0 : index
    %c0_68 = arith.constant 0 : index
    %160 = vector.load %arg14[%c0_66, %c0_67, %c0_68] : memref<1x24x128xf32, #tpu.memory_space<vmem>>, vector<1x24x128xf32>
    %161 = vector.shape_cast %160 : vector<1x24x128xf32> to vector<24x128xf32>
    %162 = vector.shape_cast %159 : vector<24x128xf32> to vector<1x24x128xf32>
    tpu.vector_store %arg14[%c0_66, %c0_67, %c0_68], %162 {strides = array<i32>} : memref<1x24x128xf32, #tpu.memory_space<vmem>>, vector<1x24x128xf32>,
    return
  }
  func.func @transform_0(%arg0: i32) -> (i32, i32, i32) {
    %c0_i32 = arith.constant 0 : i32
    %c0_i32_0 = arith.constant 0 : i32
    %c0_i32_1 = arith.constant 0 : i32
    return %arg0, %c0_i32, %c0_i32_0 : i32, i32, i32
  }
  func.func @transform_1(%arg0: i32) -> (i32, i32) {
    %c0_i32 = arith.constant 0 : i32
    %c0_i32_0 = arith.constant 0 : i32
    %c0_i32_1 = arith.constant 0 : i32
    return %c0_i32, %c0_i32_0 : i32, i32
  }
  func.func @transform_2(%arg0: i32) -> (i32, i32) {
    %c0_i32 = arith.constant 0 : i32
    %c0_i32_0 = arith.constant 0 : i32
    %c0_i32_1 = arith.constant 0 : i32
    return %c0_i32, %c0_i32_0 : i32, i32
  }
  func.func @transform_3(%arg0: i32) -> (i32, i32) {
    %c0_i32 = arith.constant 0 : i32
    %c0_i32_0 = arith.constant 0 : i32
    %c0_i32_1 = arith.constant 0 : i32
    return %c0_i32, %c0_i32_0 : i32, i32
  }
  func.func @transform_4(%arg0: i32) -> (i32, i32) {
    %c0_i32 = arith.constant 0 : i32
    %c0_i32_0 = arith.constant 0 : i32
    %c0_i32_1 = arith.constant 0 : i32
    return %c0_i32, %c0_i32_0 : i32, i32
  }
  func.func @transform_5(%arg0: i32) -> (i32, i32) {
    %c0_i32 = arith.constant 0 : i32
    %c0_i32_0 = arith.constant 0 : i32
    %c0_i32_1 = arith.constant 0 : i32
    return %c0_i32, %c0_i32_0 : i32, i32
  }
  func.func @transform_6(%arg0: i32) -> (i32, i32) {
    %c0_i32 = arith.constant 0 : i32
    %c0_i32_0 = arith.constant 0 : i32
    %c0_i32_1 = arith.constant 0 : i32
    return %c0_i32, %c0_i32_0 : i32, i32
  }
  func.func @transform_7(%arg0: i32) -> (i32, i32) {
    %c0_i32 = arith.constant 0 : i32
    %c0_i32_0 = arith.constant 0 : i32
    %c0_i32_1 = arith.constant 0 : i32
    return %c0_i32, %c0_i32_0 : i32, i32
  }
  func.func @transform_8(%arg0: i32) -> (i32, i32) {
    %c0_i32 = arith.constant 0 : i32
    %c0_i32_0 = arith.constant 0 : i32
    %c0_i32_1 = arith.constant 0 : i32
    return %c0_i32, %c0_i32_0 : i32, i32
  }
  func.func @transform_9(%arg0: i32) -> (i32, i32) {
    %c0_i32 = arith.constant 0 : i32
    %c0_i32_0 = arith.constant 0 : i32
    %c0_i32_1 = arith.constant 0 : i32
    return %c0_i32, %c0_i32_0 : i32, i32
  }
  func.func @transform_10(%arg0: i32) -> (i32, i32) {
    %c0_i32 = arith.constant 0 : i32
    %c0_i32_0 = arith.constant 0 : i32
    %c0_i32_1 = arith.constant 0 : i32
    return %c0_i32, %c0_i32_0 : i32, i32
  }
  func.func @transform_11(%arg0: i32) -> (i32, i32) {
    %c0_i32 = arith.constant 0 : i32
    %c0_i32_0 = arith.constant 0 : i32
    %c0_i32_1 = arith.constant 0 : i32
    return %c0_i32, %c0_i32_0 : i32, i32
  }
  func.func @transform_12(%arg0: i32) -> (i32, i32) {
    %c0_i32 = arith.constant 0 : i32
    %c0_i32_0 = arith.constant 0 : i32
    %c0_i32_1 = arith.constant 0 : i32
    return %c0_i32, %c0_i32_0 : i32, i32
  }
  func.func @transform_13(%arg0: i32) -> (i32, i32, i32) {
    %c0_i32 = arith.constant 0 : i32
    %c0_i32_0 = arith.constant 0 : i32
    %c0_i32_1 = arith.constant 0 : i32
    return %arg0, %c0_i32, %c0_i32_0 : i32, i32, i32
  }
}

module attributes {stable_mosaic.version = 11 : i64} {
  func.func @_encoder_layer_kernel(%arg0: i32, %arg1: memref<1x24x128xf32, #tpu.memory_space<vmem>>, %arg2: memref<128x384xf32, #tpu.memory_space<vmem>>, %arg3: memref<1x384xf32, #tpu.memory_space<vmem>>, %arg4: memref<128x128xf32, #tpu.memory_space<vmem>>, %arg5: memref<1x128xf32, #tpu.memory_space<vmem>>, %arg6: memref<1x128xf32, #tpu.memory_space<vmem>>, %arg7: memref<1x128xf32, #tpu.memory_space<vmem>>, %arg8: memref<128x512xf32, #tpu.memory_space<vmem>>, %arg9: memref<1x512xf32, #tpu.memory_space<vmem>>, %arg10: memref<512x128xf32, #tpu.memory_space<vmem>>, %arg11: memref<1x128xf32, #tpu.memory_space<vmem>>, %arg12: memref<1x128xf32, #tpu.memory_space<vmem>>, %arg13: memref<1x128xf32, #tpu.memory_space<vmem>>, %arg14: memref<1x24x128xf32, #tpu.memory_space<vmem>>) attributes {dimension_semantics = [#tpu.dimension_semantics<parallel>], iteration_bounds = array<i64: 2>, scalar_prefetch = 0 : i64, scratch_operands = 0 : i64, tpu.core_type = #tpu.core_type<tc>, window_params = [{transform_indices = @transform_0, window_bounds = array<i64: 1, 24, 128>}, {pipeline_mode = #tpu.pipeline_mode<synchronous>, transform_indices = @transform_1, window_bounds = array<i64: 128, 384>}, {pipeline_mode = #tpu.pipeline_mode<synchronous>, transform_indices = @transform_2, window_bounds = array<i64: 1, 384>}, {pipeline_mode = #tpu.pipeline_mode<synchronous>, transform_indices = @transform_3, window_bounds = array<i64: 128, 128>}, {pipeline_mode = #tpu.pipeline_mode<synchronous>, transform_indices = @transform_4, window_bounds = array<i64: 1, 128>}, {pipeline_mode = #tpu.pipeline_mode<synchronous>, transform_indices = @transform_5, window_bounds = array<i64: 1, 128>}, {pipeline_mode = #tpu.pipeline_mode<synchronous>, transform_indices = @transform_6, window_bounds = array<i64: 1, 128>}, {pipeline_mode = #tpu.pipeline_mode<synchronous>, transform_indices = @transform_7, window_bounds = array<i64: 128, 512>}, {pipeline_mode = #tpu.pipeline_mode<synchronous>, transform_indices = @transform_8, window_bounds = array<i64: 1, 512>}, {pipeline_mode = #tpu.pipeline_mode<synchronous>, transform_indices = @transform_9, window_bounds = array<i64: 512, 128>}, {pipeline_mode = #tpu.pipeline_mode<synchronous>, transform_indices = @transform_10, window_bounds = array<i64: 1, 128>}, {pipeline_mode = #tpu.pipeline_mode<synchronous>, transform_indices = @transform_11, window_bounds = array<i64: 1, 128>}, {pipeline_mode = #tpu.pipeline_mode<synchronous>, transform_indices = @transform_12, window_bounds = array<i64: 1, 128>}, {transform_indices = @transform_13, window_bounds = array<i64: 1, 24, 128>}]} {
    %c0 = arith.constant 0 : index
    %c0_0 = arith.constant 0 : index
    %c0_1 = arith.constant 0 : index
    %0 = vector.load %arg1[%c0, %c0_0, %c0_1] : memref<1x24x128xf32, #tpu.memory_space<vmem>>, vector<1x24x128xf32>
    %1 = vector.shape_cast %0 : vector<1x24x128xf32> to vector<24x128xf32>
    %c0_2 = arith.constant 0 : index
    %c0_3 = arith.constant 0 : index
    %2 = vector.load %arg2[%c0_2, %c0_3] : memref<128x384xf32, #tpu.memory_space<vmem>>, vector<128x384xf32>
    %cst = arith.constant dense<0.000000e+00> : vector<24x384xf32>
    %3 = tpu.matmul %1, %2, %cst {dimension_numbers = #tpu.dot_dimension_numbers<[1], [0], [0], [1], [0, 0, 1, 1], [], []>} : vector<24x128xf32>, vector<128x384xf32>, vector<24x384xf32> -> vector<24x384xf32>
    %c0_4 = arith.constant 0 : index
    %c0_5 = arith.constant 0 : index
    %4 = vector.load %arg3[%c0_4, %c0_5] : memref<1x384xf32, #tpu.memory_space<vmem>>, vector<1x384xf32>
    %5 = vector.broadcast %4 : vector<1x384xf32> to vector<24x384xf32>
    %6 = arith.addf %3, %5 : vector<24x384xf32>
    %7 = tpu.iota {dimensions = array<i32: 1>} : vector<24x24xi32>
    %c17_i32 = arith.constant 17 : i32
    %8 = vector.broadcast %c17_i32 : i32 to vector<24x24xi32>
    %9 = arith.cmpi slt, %7, %8 : vector<24x24xi32>
    %10 = vector.extract_strided_slice %6 {offsets = [0, 0], sizes = [24, 32], strides = [1, 1]} : vector<24x384xf32> to vector<24x32xf32>
    %11 = vector.extract_strided_slice %6 {offsets = [0, 128], sizes = [24, 32], strides = [1, 1]} : vector<24x384xf32> to vector<24x32xf32>
    %12 = vector.extract_strided_slice %6 {offsets = [0, 256], sizes = [24, 32], strides = [1, 1]} : vector<24x384xf32> to vector<24x32xf32>
    %cst_6 = arith.constant dense<0.000000e+00> : vector<24x24xf32>
    %13 = tpu.matmul %10, %11, %cst_6 {dimension_numbers = #tpu.dot_dimension_numbers<[1], [1], [0], [0], [0, 0, 1, 0], [], []>} : vector<24x32xf32>, vector<24x32xf32>, vector<24x24xf32> -> vector<24x24xf32>
    %cst_7 = arith.constant 0.176776692 : f32
    %14 = vector.broadcast %cst_7 : f32 to vector<24x24xf32>
    %15 = arith.mulf %13, %14 : vector<24x24xf32>
    %cst_8 = arith.constant -1.000000e+30 : f32
    %16 = vector.broadcast %cst_8 : f32 to vector<24x24xf32>
    %17 = arith.select %9, %15, %16 : vector<24x24xi1>, vector<24x24xf32>
    %cst_9 = arith.constant dense<0xFF800000> : vector<24xf32>
    %18 = vector.multi_reduction <maximumf>, %17, %cst_9 [1] : vector<24x24xf32> to vector<24xf32>
    %19 = vector.shape_cast %18 : vector<24xf32> to vector<24x1xf32>
    %20 = vector.broadcast %19 : vector<24x1xf32> to vector<24x24xf32>
    %21 = arith.subf %17, %20 : vector<24x24xf32>
    %22 = math.exp %21 : vector<24x24xf32>
    %cst_10 = arith.constant dense<0.000000e+00> : vector<24xf32>
    %23 = vector.multi_reduction <add>, %22, %cst_10 [1] : vector<24x24xf32> to vector<24xf32>
    %24 = vector.shape_cast %23 : vector<24xf32> to vector<24x1xf32>
    %25 = tpu.reciprocal %24 : vector<24x1xf32> -> vector<24x1xf32>
    %26 = vector.broadcast %25 : vector<24x1xf32> to vector<24x24xf32>
    %27 = arith.mulf %22, %26 : vector<24x24xf32>
    %cst_11 = arith.constant dense<0.000000e+00> : vector<24x32xf32>
    %28 = tpu.matmul %27, %12, %cst_11 {dimension_numbers = #tpu.dot_dimension_numbers<[1], [0], [0], [1], [0, 0, 1, 1], [], []>} : vector<24x24xf32>, vector<24x32xf32>, vector<24x32xf32> -> vector<24x32xf32>
    %29 = vector.extract_strided_slice %6 {offsets = [0, 32], sizes = [24, 32], strides = [1, 1]} : vector<24x384xf32> to vector<24x32xf32>
    %30 = vector.extract_strided_slice %6 {offsets = [0, 160], sizes = [24, 32], strides = [1, 1]} : vector<24x384xf32> to vector<24x32xf32>
    %31 = vector.extract_strided_slice %6 {offsets = [0, 288], sizes = [24, 32], strides = [1, 1]} : vector<24x384xf32> to vector<24x32xf32>
    %cst_12 = arith.constant dense<0.000000e+00> : vector<24x24xf32>
    %32 = tpu.matmul %29, %30, %cst_12 {dimension_numbers = #tpu.dot_dimension_numbers<[1], [1], [0], [0], [0, 0, 1, 0], [], []>} : vector<24x32xf32>, vector<24x32xf32>, vector<24x24xf32> -> vector<24x24xf32>
    %cst_13 = arith.constant 0.176776692 : f32
    %33 = vector.broadcast %cst_13 : f32 to vector<24x24xf32>
    %34 = arith.mulf %32, %33 : vector<24x24xf32>
    %cst_14 = arith.constant -1.000000e+30 : f32
    %35 = vector.broadcast %cst_14 : f32 to vector<24x24xf32>
    %36 = arith.select %9, %34, %35 : vector<24x24xi1>, vector<24x24xf32>
    %cst_15 = arith.constant dense<0xFF800000> : vector<24xf32>
    %37 = vector.multi_reduction <maximumf>, %36, %cst_15 [1] : vector<24x24xf32> to vector<24xf32>
    %38 = vector.shape_cast %37 : vector<24xf32> to vector<24x1xf32>
    %39 = vector.broadcast %38 : vector<24x1xf32> to vector<24x24xf32>
    %40 = arith.subf %36, %39 : vector<24x24xf32>
    %41 = math.exp %40 : vector<24x24xf32>
    %cst_16 = arith.constant dense<0.000000e+00> : vector<24xf32>
    %42 = vector.multi_reduction <add>, %41, %cst_16 [1] : vector<24x24xf32> to vector<24xf32>
    %43 = vector.shape_cast %42 : vector<24xf32> to vector<24x1xf32>
    %44 = tpu.reciprocal %43 : vector<24x1xf32> -> vector<24x1xf32>
    %45 = vector.broadcast %44 : vector<24x1xf32> to vector<24x24xf32>
    %46 = arith.mulf %41, %45 : vector<24x24xf32>
    %cst_17 = arith.constant dense<0.000000e+00> : vector<24x32xf32>
    %47 = tpu.matmul %46, %31, %cst_17 {dimension_numbers = #tpu.dot_dimension_numbers<[1], [0], [0], [1], [0, 0, 1, 1], [], []>} : vector<24x24xf32>, vector<24x32xf32>, vector<24x32xf32> -> vector<24x32xf32>
    %48 = vector.extract_strided_slice %6 {offsets = [0, 64], sizes = [24, 32], strides = [1, 1]} : vector<24x384xf32> to vector<24x32xf32>
    %49 = vector.extract_strided_slice %6 {offsets = [0, 192], sizes = [24, 32], strides = [1, 1]} : vector<24x384xf32> to vector<24x32xf32>
    %50 = vector.extract_strided_slice %6 {offsets = [0, 320], sizes = [24, 32], strides = [1, 1]} : vector<24x384xf32> to vector<24x32xf32>
    %cst_18 = arith.constant dense<0.000000e+00> : vector<24x24xf32>
    %51 = tpu.matmul %48, %49, %cst_18 {dimension_numbers = #tpu.dot_dimension_numbers<[1], [1], [0], [0], [0, 0, 1, 0], [], []>} : vector<24x32xf32>, vector<24x32xf32>, vector<24x24xf32> -> vector<24x24xf32>
    %cst_19 = arith.constant 0.176776692 : f32
    %52 = vector.broadcast %cst_19 : f32 to vector<24x24xf32>
    %53 = arith.mulf %51, %52 : vector<24x24xf32>
    %cst_20 = arith.constant -1.000000e+30 : f32
    %54 = vector.broadcast %cst_20 : f32 to vector<24x24xf32>
    %55 = arith.select %9, %53, %54 : vector<24x24xi1>, vector<24x24xf32>
    %cst_21 = arith.constant dense<0xFF800000> : vector<24xf32>
    %56 = vector.multi_reduction <maximumf>, %55, %cst_21 [1] : vector<24x24xf32> to vector<24xf32>
    %57 = vector.shape_cast %56 : vector<24xf32> to vector<24x1xf32>
    %58 = vector.broadcast %57 : vector<24x1xf32> to vector<24x24xf32>
    %59 = arith.subf %55, %58 : vector<24x24xf32>
    %60 = math.exp %59 : vector<24x24xf32>
    %cst_22 = arith.constant dense<0.000000e+00> : vector<24xf32>
    %61 = vector.multi_reduction <add>, %60, %cst_22 [1] : vector<24x24xf32> to vector<24xf32>
    %62 = vector.shape_cast %61 : vector<24xf32> to vector<24x1xf32>
    %63 = tpu.reciprocal %62 : vector<24x1xf32> -> vector<24x1xf32>
    %64 = vector.broadcast %63 : vector<24x1xf32> to vector<24x24xf32>
    %65 = arith.mulf %60, %64 : vector<24x24xf32>
    %cst_23 = arith.constant dense<0.000000e+00> : vector<24x32xf32>
    %66 = tpu.matmul %65, %50, %cst_23 {dimension_numbers = #tpu.dot_dimension_numbers<[1], [0], [0], [1], [0, 0, 1, 1], [], []>} : vector<24x24xf32>, vector<24x32xf32>, vector<24x32xf32> -> vector<24x32xf32>
    %67 = vector.extract_strided_slice %6 {offsets = [0, 96], sizes = [24, 32], strides = [1, 1]} : vector<24x384xf32> to vector<24x32xf32>
    %68 = vector.extract_strided_slice %6 {offsets = [0, 224], sizes = [24, 32], strides = [1, 1]} : vector<24x384xf32> to vector<24x32xf32>
    %69 = vector.extract_strided_slice %6 {offsets = [0, 352], sizes = [24, 32], strides = [1, 1]} : vector<24x384xf32> to vector<24x32xf32>
    %cst_24 = arith.constant dense<0.000000e+00> : vector<24x24xf32>
    %70 = tpu.matmul %67, %68, %cst_24 {dimension_numbers = #tpu.dot_dimension_numbers<[1], [1], [0], [0], [0, 0, 1, 0], [], []>} : vector<24x32xf32>, vector<24x32xf32>, vector<24x24xf32> -> vector<24x24xf32>
    %cst_25 = arith.constant 0.176776692 : f32
    %71 = vector.broadcast %cst_25 : f32 to vector<24x24xf32>
    %72 = arith.mulf %70, %71 : vector<24x24xf32>
    %cst_26 = arith.constant -1.000000e+30 : f32
    %73 = vector.broadcast %cst_26 : f32 to vector<24x24xf32>
    %74 = arith.select %9, %72, %73 : vector<24x24xi1>, vector<24x24xf32>
    %cst_27 = arith.constant dense<0xFF800000> : vector<24xf32>
    %75 = vector.multi_reduction <maximumf>, %74, %cst_27 [1] : vector<24x24xf32> to vector<24xf32>
    %76 = vector.shape_cast %75 : vector<24xf32> to vector<24x1xf32>
    %77 = vector.broadcast %76 : vector<24x1xf32> to vector<24x24xf32>
    %78 = arith.subf %74, %77 : vector<24x24xf32>
    %79 = math.exp %78 : vector<24x24xf32>
    %cst_28 = arith.constant dense<0.000000e+00> : vector<24xf32>
    %80 = vector.multi_reduction <add>, %79, %cst_28 [1] : vector<24x24xf32> to vector<24xf32>
    %81 = vector.shape_cast %80 : vector<24xf32> to vector<24x1xf32>
    %82 = tpu.reciprocal %81 : vector<24x1xf32> -> vector<24x1xf32>
    %83 = vector.broadcast %82 : vector<24x1xf32> to vector<24x24xf32>
    %84 = arith.mulf %79, %83 : vector<24x24xf32>
    %cst_29 = arith.constant dense<0.000000e+00> : vector<24x32xf32>
    %85 = tpu.matmul %84, %69, %cst_29 {dimension_numbers = #tpu.dot_dimension_numbers<[1], [0], [0], [1], [0, 0, 1, 1], [], []>} : vector<24x24xf32>, vector<24x32xf32>, vector<24x32xf32> -> vector<24x32xf32>
    %86 = tpu.concatenate %28, %47, %66, %85 in 1 : vector<24x32xf32>, vector<24x32xf32>, vector<24x32xf32>, vector<24x32xf32> -> vector<24x128xf32>
    %c0_30 = arith.constant 0 : index
    %c0_31 = arith.constant 0 : index
    %87 = vector.load %arg4[%c0_30, %c0_31] : memref<128x128xf32, #tpu.memory_space<vmem>>, vector<128x128xf32>
    %cst_32 = arith.constant dense<0.000000e+00> : vector<24x128xf32>
    %88 = tpu.matmul %86, %87, %cst_32 {dimension_numbers = #tpu.dot_dimension_numbers<[1], [0], [0], [1], [0, 0, 1, 1], [], []>} : vector<24x128xf32>, vector<128x128xf32>, vector<24x128xf32> -> vector<24x128xf32>
    %c0_33 = arith.constant 0 : index
    %c0_34 = arith.constant 0 : index
    %89 = vector.load %arg5[%c0_33, %c0_34] : memref<1x128xf32, #tpu.memory_space<vmem>>, vector<1x128xf32>
    %90 = vector.broadcast %89 : vector<1x128xf32> to vector<24x128xf32>
    %91 = arith.addf %88, %90 : vector<24x128xf32>
    %92 = arith.addf %1, %91 : vector<24x128xf32>
    %c0_35 = arith.constant 0 : index
    %c0_36 = arith.constant 0 : index
    %93 = vector.load %arg6[%c0_35, %c0_36] : memref<1x128xf32, #tpu.memory_space<vmem>>, vector<1x128xf32>
    %c0_37 = arith.constant 0 : index
    %c0_38 = arith.constant 0 : index
    %94 = vector.load %arg7[%c0_37, %c0_38] : memref<1x128xf32, #tpu.memory_space<vmem>>, vector<1x128xf32>
    %cst_39 = arith.constant dense<0.000000e+00> : vector<24xf32>
    %95 = vector.multi_reduction <add>, %92, %cst_39 [1] : vector<24x128xf32> to vector<24xf32>
    %96 = vector.shape_cast %95 : vector<24xf32> to vector<24x1xf32>
    %cst_40 = arith.constant 1.280000e+02 : f32
    %97 = vector.broadcast %cst_40 : f32 to vector<24x1xf32>
    %98 = arith.divf %96, %97 : vector<24x1xf32>
    %99 = vector.broadcast %98 : vector<24x1xf32> to vector<24x128xf32>
    %100 = arith.subf %92, %99 : vector<24x128xf32>
    %101 = arith.mulf %100, %100 : vector<24x128xf32>
    %cst_41 = arith.constant dense<0.000000e+00> : vector<24xf32>
    %102 = vector.multi_reduction <add>, %101, %cst_41 [1] : vector<24x128xf32> to vector<24xf32>
    %103 = vector.shape_cast %102 : vector<24xf32> to vector<24x1xf32>
    %cst_42 = arith.constant 1.280000e+02 : f32
    %104 = vector.broadcast %cst_42 : f32 to vector<24x1xf32>
    %105 = arith.divf %103, %104 : vector<24x1xf32>
    %106 = vector.broadcast %98 : vector<24x1xf32> to vector<24x128xf32>
    %107 = arith.subf %92, %106 : vector<24x128xf32>
    %cst_43 = arith.constant 9.99999974E-6 : f32
    %108 = vector.broadcast %cst_43 : f32 to vector<24x1xf32>
    %109 = arith.addf %105, %108 : vector<24x1xf32>
    %110 = math.rsqrt %109 : vector<24x1xf32>
    %111 = vector.broadcast %110 : vector<24x1xf32> to vector<24x128xf32>
    %112 = arith.mulf %107, %111 : vector<24x128xf32>
    %113 = vector.broadcast %93 : vector<1x128xf32> to vector<24x128xf32>
    %114 = arith.mulf %112, %113 : vector<24x128xf32>
    %115 = vector.broadcast %94 : vector<1x128xf32> to vector<24x128xf32>
    %116 = arith.addf %114, %115 : vector<24x128xf32>
    %c0_44 = arith.constant 0 : index
    %c0_45 = arith.constant 0 : index
    %117 = vector.load %arg8[%c0_44, %c0_45] : memref<128x512xf32, #tpu.memory_space<vmem>>, vector<128x512xf32>
    %cst_46 = arith.constant dense<0.000000e+00> : vector<24x512xf32>
    %118 = tpu.matmul %116, %117, %cst_46 {dimension_numbers = #tpu.dot_dimension_numbers<[1], [0], [0], [1], [0, 0, 1, 1], [], []>} : vector<24x128xf32>, vector<128x512xf32>, vector<24x512xf32> -> vector<24x512xf32>
    %c0_47 = arith.constant 0 : index
    %c0_48 = arith.constant 0 : index
    %119 = vector.load %arg9[%c0_47, %c0_48] : memref<1x512xf32, #tpu.memory_space<vmem>>, vector<1x512xf32>
    %120 = vector.broadcast %119 : vector<1x512xf32> to vector<24x512xf32>
    %121 = arith.addf %118, %120 : vector<24x512xf32>
    %cst_49 = arith.constant 5.000000e-01 : f32
    %122 = vector.broadcast %cst_49 : f32 to vector<24x512xf32>
    %123 = arith.mulf %122, %121 : vector<24x512xf32>
    %cst_50 = arith.constant 0.707106769 : f32
    %124 = vector.broadcast %cst_50 : f32 to vector<24x512xf32>
    %125 = arith.mulf %121, %124 : vector<24x512xf32>
    %126 = math.erf %125 : vector<24x512xf32>
    %cst_51 = arith.constant 1.000000e+00 : f32
    %127 = vector.broadcast %cst_51 : f32 to vector<24x512xf32>
    %128 = arith.addf %127, %126 : vector<24x512xf32>
    %129 = arith.mulf %123, %128 : vector<24x512xf32>
    %c0_52 = arith.constant 0 : index
    %c0_53 = arith.constant 0 : index
    %130 = vector.load %arg10[%c0_52, %c0_53] : memref<512x128xf32, #tpu.memory_space<vmem>>, vector<512x128xf32>
    %cst_54 = arith.constant dense<0.000000e+00> : vector<24x128xf32>
    %131 = tpu.matmul %129, %130, %cst_54 {dimension_numbers = #tpu.dot_dimension_numbers<[1], [0], [0], [1], [0, 0, 1, 1], [], []>} : vector<24x512xf32>, vector<512x128xf32>, vector<24x128xf32> -> vector<24x128xf32>
    %c0_55 = arith.constant 0 : index
    %c0_56 = arith.constant 0 : index
    %132 = vector.load %arg11[%c0_55, %c0_56] : memref<1x128xf32, #tpu.memory_space<vmem>>, vector<1x128xf32>
    %133 = vector.broadcast %132 : vector<1x128xf32> to vector<24x128xf32>
    %134 = arith.addf %131, %133 : vector<24x128xf32>
    %135 = arith.addf %116, %134 : vector<24x128xf32>
    %c0_57 = arith.constant 0 : index
    %c0_58 = arith.constant 0 : index
    %136 = vector.load %arg12[%c0_57, %c0_58] : memref<1x128xf32, #tpu.memory_space<vmem>>, vector<1x128xf32>
    %c0_59 = arith.constant 0 : index
    %c0_60 = arith.constant 0 : index
    %137 = vector.load %arg13[%c0_59, %c0_60] : memref<1x128xf32, #tpu.memory_space<vmem>>, vector<1x128xf32>
    %cst_61 = arith.constant dense<0.000000e+00> : vector<24xf32>
    %138 = vector.multi_reduction <add>, %135, %cst_61 [1] : vector<24x128xf32> to vector<24xf32>
    %139 = vector.shape_cast %138 : vector<24xf32> to vector<24x1xf32>
    %cst_62 = arith.constant 1.280000e+02 : f32
    %140 = vector.broadcast %cst_62 : f32 to vector<24x1xf32>
    %141 = arith.divf %139, %140 : vector<24x1xf32>
    %142 = vector.broadcast %141 : vector<24x1xf32> to vector<24x128xf32>
    %143 = arith.subf %135, %142 : vector<24x128xf32>
    %144 = arith.mulf %143, %143 : vector<24x128xf32>
    %cst_63 = arith.constant dense<0.000000e+00> : vector<24xf32>
    %145 = vector.multi_reduction <add>, %144, %cst_63 [1] : vector<24x128xf32> to vector<24xf32>
    %146 = vector.shape_cast %145 : vector<24xf32> to vector<24x1xf32>
    %cst_64 = arith.constant 1.280000e+02 : f32
    %147 = vector.broadcast %cst_64 : f32 to vector<24x1xf32>
    %148 = arith.divf %146, %147 : vector<24x1xf32>
    %149 = vector.broadcast %141 : vector<24x1xf32> to vector<24x128xf32>
    %150 = arith.subf %135, %149 : vector<24x128xf32>
    %cst_65 = arith.constant 9.99999974E-6 : f32
    %151 = vector.broadcast %cst_65 : f32 to vector<24x1xf32>
    %152 = arith.addf %148, %151 : vector<24x1xf32>
    %153 = math.rsqrt %152 : vector<24x1xf32>
    %154 = vector.broadcast %153 : vector<24x1xf32> to vector<24x128xf32>
    %155 = arith.mulf %150, %154 : vector<24x128xf32>
    %156 = vector.broadcast %136 : vector<1x128xf32> to vector<24x128xf32>
    %157 = arith.mulf %155, %156 : vector<24x128xf32>
    %158 = vector.broadcast %137 : vector<1x128xf32> to vector<24x128xf32>
    %159 = arith.addf %157, %158 : vector<24x128xf32>
    %c0_66 = arith.constant 0 : index
    %c0_67 = arith.constant 0 : index
    %c0_68 = arith.constant 0 : index
    %160 = vector.load %arg14[%c0_66, %c0_67, %c0_68] : memref<1x24x128xf32, #tpu.memory_space<vmem>>, vector<1x24x128xf32>
    %161 = vector.shape_cast %160 : vector<1x24x128xf32> to vector<24x128xf32>
    %162 = vector.shape_cast %159 : vector<24x128xf32> to vector<1x24x128xf32>
    tpu.vector_store %arg14[%c0_66, %c0_67, %c0_68], %162 {strides = array<i32>} : memref<1x24x128xf32, #tpu.memory_space<vmem>>, vector<1x24x128xf32>,
    return
  }
  func.func @transform_0(%arg0: i32) -> (i32, i32, i32) {
    %c0_i32 = arith.constant 0 : i32
    %c0_i32_0 = arith.constant 0 : i32
    %c0_i32_1 = arith.constant 0 : i32
    return %arg0, %c0_i32, %c0_i32_0 : i32, i32, i32
  }
  func.func @transform_1(%arg0: i32) -> (i32, i32) {
    %c0_i32 = arith.constant 0 : i32
    %c0_i32_0 = arith.constant 0 : i32
    %c0_i32_1 = arith.constant 0 : i32
    return %c0_i32, %c0_i32_0 : i32, i32
  }
  func.func @transform_2(%arg0: i32) -> (i32, i32) {
    %c0_i32 = arith.constant 0 : i32
    %c0_i32_0 = arith.constant 0 : i32
    %c0_i32_1 = arith.constant 0 : i32
    return %c0_i32, %c0_i32_0 : i32, i32
  }
  func.func @transform_3(%arg0: i32) -> (i32, i32) {
    %c0_i32 = arith.constant 0 : i32
    %c0_i32_0 = arith.constant 0 : i32
    %c0_i32_1 = arith.constant 0 : i32
    return %c0_i32, %c0_i32_0 : i32, i32
  }
  func.func @transform_4(%arg0: i32) -> (i32, i32) {
    %c0_i32 = arith.constant 0 : i32
    %c0_i32_0 = arith.constant 0 : i32
    %c0_i32_1 = arith.constant 0 : i32
    return %c0_i32, %c0_i32_0 : i32, i32
  }
  func.func @transform_5(%arg0: i32) -> (i32, i32) {
    %c0_i32 = arith.constant 0 : i32
    %c0_i32_0 = arith.constant 0 : i32
    %c0_i32_1 = arith.constant 0 : i32
    return %c0_i32, %c0_i32_0 : i32, i32
  }
  func.func @transform_6(%arg0: i32) -> (i32, i32) {
    %c0_i32 = arith.constant 0 : i32
    %c0_i32_0 = arith.constant 0 : i32
    %c0_i32_1 = arith.constant 0 : i32
    return %c0_i32, %c0_i32_0 : i32, i32
  }
  func.func @transform_7(%arg0: i32) -> (i32, i32) {
    %c0_i32 = arith.constant 0 : i32
    %c0_i32_0 = arith.constant 0 : i32
    %c0_i32_1 = arith.constant 0 : i32
    return %c0_i32, %c0_i32_0 : i32, i32
  }
  func.func @transform_8(%arg0: i32) -> (i32, i32) {
    %c0_i32 = arith.constant 0 : i32
    %c0_i32_0 = arith.constant 0 : i32
    %c0_i32_1 = arith.constant 0 : i32
    return %c0_i32, %c0_i32_0 : i32, i32
  }
  func.func @transform_9(%arg0: i32) -> (i32, i32) {
    %c0_i32 = arith.constant 0 : i32
    %c0_i32_0 = arith.constant 0 : i32
    %c0_i32_1 = arith.constant 0 : i32
    return %c0_i32, %c0_i32_0 : i32, i32
  }
  func.func @transform_10(%arg0: i32) -> (i32, i32) {
    %c0_i32 = arith.constant 0 : i32
    %c0_i32_0 = arith.constant 0 : i32
    %c0_i32_1 = arith.constant 0 : i32
    return %c0_i32, %c0_i32_0 : i32, i32
  }
  func.func @transform_11(%arg0: i32) -> (i32, i32) {
    %c0_i32 = arith.constant 0 : i32
    %c0_i32_0 = arith.constant 0 : i32
    %c0_i32_1 = arith.constant 0 : i32
    return %c0_i32, %c0_i32_0 : i32, i32
  }
  func.func @transform_12(%arg0: i32) -> (i32, i32) {
    %c0_i32 = arith.constant 0 : i32
    %c0_i32_0 = arith.constant 0 : i32
    %c0_i32_1 = arith.constant 0 : i32
    return %c0_i32, %c0_i32_0 : i32, i32
  }
  func.func @transform_13(%arg0: i32) -> (i32, i32, i32) {
    %c0_i32 = arith.constant 0 : i32
    %c0_i32_0 = arith.constant 0 : i32
    %c0_i32_1 = arith.constant 0 : i32
    return %arg0, %c0_i32, %c0_i32_0 : i32, i32, i32
  }
}

module attributes {stable_mosaic.version = 11 : i64} {
  func.func @_head_kernel(%arg0: i32, %arg1: memref<2x128xf32, #tpu.memory_space<vmem>>, %arg2: memref<1x128xf32, #tpu.memory_space<vmem>>, %arg3: memref<1x128xf32, #tpu.memory_space<vmem>>, %arg4: memref<128x512xf32, #tpu.memory_space<vmem>>, %arg5: memref<1x512xf32, #tpu.memory_space<vmem>>, %arg6: memref<512x32xf32, #tpu.memory_space<vmem>>, %arg7: memref<1x32xf32, #tpu.memory_space<vmem>>, %arg8: memref<2x32xf32, #tpu.memory_space<vmem>>) attributes {dimension_semantics = [#tpu.dimension_semantics<arbitrary>], iteration_bounds = array<i64: 1>, scalar_prefetch = 0 : i64, scratch_operands = 0 : i64, tpu.core_type = #tpu.core_type<tc>, window_params = [{pipeline_mode = #tpu.pipeline_mode<synchronous>, transform_indices = @transform_0, window_bounds = array<i64: 2, 128>}, {pipeline_mode = #tpu.pipeline_mode<synchronous>, transform_indices = @transform_1, window_bounds = array<i64: 1, 128>}, {pipeline_mode = #tpu.pipeline_mode<synchronous>, transform_indices = @transform_2, window_bounds = array<i64: 1, 128>}, {pipeline_mode = #tpu.pipeline_mode<synchronous>, transform_indices = @transform_3, window_bounds = array<i64: 128, 512>}, {pipeline_mode = #tpu.pipeline_mode<synchronous>, transform_indices = @transform_4, window_bounds = array<i64: 1, 512>}, {pipeline_mode = #tpu.pipeline_mode<synchronous>, transform_indices = @transform_5, window_bounds = array<i64: 512, 32>}, {pipeline_mode = #tpu.pipeline_mode<synchronous>, transform_indices = @transform_6, window_bounds = array<i64: 1, 32>}, {pipeline_mode = #tpu.pipeline_mode<synchronous>, transform_indices = @transform_7, window_bounds = array<i64: 2, 32>}]} {
    %c0 = arith.constant 0 : index
    %c0_0 = arith.constant 0 : index
    %0 = vector.load %arg1[%c0, %c0_0] : memref<2x128xf32, #tpu.memory_space<vmem>>, vector<2x128xf32>
    %c0_1 = arith.constant 0 : index
    %c0_2 = arith.constant 0 : index
    %1 = vector.load %arg2[%c0_1, %c0_2] : memref<1x128xf32, #tpu.memory_space<vmem>>, vector<1x128xf32>
    %c0_3 = arith.constant 0 : index
    %c0_4 = arith.constant 0 : index
    %2 = vector.load %arg3[%c0_3, %c0_4] : memref<1x128xf32, #tpu.memory_space<vmem>>, vector<1x128xf32>
    %cst = arith.constant dense<0.000000e+00> : vector<2xf32>
    %3 = vector.multi_reduction <add>, %0, %cst [1] : vector<2x128xf32> to vector<2xf32>
    %4 = vector.shape_cast %3 : vector<2xf32> to vector<2x1xf32>
    %cst_5 = arith.constant 1.280000e+02 : f32
    %5 = vector.broadcast %cst_5 : f32 to vector<2x1xf32>
    %6 = arith.divf %4, %5 : vector<2x1xf32>
    %7 = vector.broadcast %6 : vector<2x1xf32> to vector<2x128xf32>
    %8 = arith.subf %0, %7 : vector<2x128xf32>
    %9 = arith.mulf %8, %8 : vector<2x128xf32>
    %cst_6 = arith.constant dense<0.000000e+00> : vector<2xf32>
    %10 = vector.multi_reduction <add>, %9, %cst_6 [1] : vector<2x128xf32> to vector<2xf32>
    %11 = vector.shape_cast %10 : vector<2xf32> to vector<2x1xf32>
    %cst_7 = arith.constant 1.280000e+02 : f32
    %12 = vector.broadcast %cst_7 : f32 to vector<2x1xf32>
    %13 = arith.divf %11, %12 : vector<2x1xf32>
    %14 = vector.broadcast %6 : vector<2x1xf32> to vector<2x128xf32>
    %15 = arith.subf %0, %14 : vector<2x128xf32>
    %cst_8 = arith.constant 9.99999974E-6 : f32
    %16 = vector.broadcast %cst_8 : f32 to vector<2x1xf32>
    %17 = arith.addf %13, %16 : vector<2x1xf32>
    %18 = math.rsqrt %17 : vector<2x1xf32>
    %19 = vector.broadcast %18 : vector<2x1xf32> to vector<2x128xf32>
    %20 = arith.mulf %15, %19 : vector<2x128xf32>
    %21 = vector.broadcast %1 : vector<1x128xf32> to vector<2x128xf32>
    %22 = arith.mulf %20, %21 : vector<2x128xf32>
    %23 = vector.broadcast %2 : vector<1x128xf32> to vector<2x128xf32>
    %24 = arith.addf %22, %23 : vector<2x128xf32>
    %c0_9 = arith.constant 0 : index
    %c0_10 = arith.constant 0 : index
    %25 = vector.load %arg4[%c0_9, %c0_10] : memref<128x512xf32, #tpu.memory_space<vmem>>, vector<128x512xf32>
    %cst_11 = arith.constant dense<0.000000e+00> : vector<2x512xf32>
    %26 = tpu.matmul %24, %25, %cst_11 {dimension_numbers = #tpu.dot_dimension_numbers<[1], [0], [0], [1], [0, 0, 1, 1], [], []>} : vector<2x128xf32>, vector<128x512xf32>, vector<2x512xf32> -> vector<2x512xf32>
    %c0_12 = arith.constant 0 : index
    %c0_13 = arith.constant 0 : index
    %27 = vector.load %arg5[%c0_12, %c0_13] : memref<1x512xf32, #tpu.memory_space<vmem>>, vector<1x512xf32>
    %28 = vector.broadcast %27 : vector<1x512xf32> to vector<2x512xf32>
    %29 = arith.addf %26, %28 : vector<2x512xf32>
    %cst_14 = arith.constant 5.000000e-01 : f32
    %30 = vector.broadcast %cst_14 : f32 to vector<2x512xf32>
    %31 = arith.mulf %30, %29 : vector<2x512xf32>
    %cst_15 = arith.constant 0.707106769 : f32
    %32 = vector.broadcast %cst_15 : f32 to vector<2x512xf32>
    %33 = arith.mulf %29, %32 : vector<2x512xf32>
    %34 = math.erf %33 : vector<2x512xf32>
    %cst_16 = arith.constant 1.000000e+00 : f32
    %35 = vector.broadcast %cst_16 : f32 to vector<2x512xf32>
    %36 = arith.addf %35, %34 : vector<2x512xf32>
    %37 = arith.mulf %31, %36 : vector<2x512xf32>
    %c0_17 = arith.constant 0 : index
    %c0_18 = arith.constant 0 : index
    %38 = vector.load %arg6[%c0_17, %c0_18] : memref<512x32xf32, #tpu.memory_space<vmem>>, vector<512x32xf32>
    %cst_19 = arith.constant dense<0.000000e+00> : vector<2x32xf32>
    %39 = tpu.matmul %37, %38, %cst_19 {dimension_numbers = #tpu.dot_dimension_numbers<[1], [0], [0], [1], [0, 0, 1, 1], [], []>} : vector<2x512xf32>, vector<512x32xf32>, vector<2x32xf32> -> vector<2x32xf32>
    %c0_20 = arith.constant 0 : index
    %c0_21 = arith.constant 0 : index
    %40 = vector.load %arg7[%c0_20, %c0_21] : memref<1x32xf32, #tpu.memory_space<vmem>>, vector<1x32xf32>
    %41 = vector.broadcast %40 : vector<1x32xf32> to vector<2x32xf32>
    %42 = arith.addf %39, %41 : vector<2x32xf32>
    %c0_22 = arith.constant 0 : index
    %c0_23 = arith.constant 0 : index
    %43 = vector.load %arg8[%c0_22, %c0_23] : memref<2x32xf32, #tpu.memory_space<vmem>>, vector<2x32xf32>
    tpu.vector_store %arg8[%c0_22, %c0_23], %42 {strides = array<i32>} : memref<2x32xf32, #tpu.memory_space<vmem>>, vector<2x32xf32>,
    return
  }
  func.func @transform_0(%arg0: i32) -> (i32, i32) {
    %c0_i32 = arith.constant 0 : i32
    %c0_i32_0 = arith.constant 0 : i32
    %c0_i32_1 = arith.constant 0 : i32
    return %c0_i32, %c0_i32_0 : i32, i32
  }
  func.func @transform_1(%arg0: i32) -> (i32, i32) {
    %c0_i32 = arith.constant 0 : i32
    %c0_i32_0 = arith.constant 0 : i32
    %c0_i32_1 = arith.constant 0 : i32
    return %c0_i32, %c0_i32_0 : i32, i32
  }
  func.func @transform_2(%arg0: i32) -> (i32, i32) {
    %c0_i32 = arith.constant 0 : i32
    %c0_i32_0 = arith.constant 0 : i32
    %c0_i32_1 = arith.constant 0 : i32
    return %c0_i32, %c0_i32_0 : i32, i32
  }
  func.func @transform_3(%arg0: i32) -> (i32, i32) {
    %c0_i32 = arith.constant 0 : i32
    %c0_i32_0 = arith.constant 0 : i32
    %c0_i32_1 = arith.constant 0 : i32
    return %c0_i32, %c0_i32_0 : i32, i32
  }
  func.func @transform_4(%arg0: i32) -> (i32, i32) {
    %c0_i32 = arith.constant 0 : i32
    %c0_i32_0 = arith.constant 0 : i32
    %c0_i32_1 = arith.constant 0 : i32
    return %c0_i32, %c0_i32_0 : i32, i32
  }
  func.func @transform_5(%arg0: i32) -> (i32, i32) {
    %c0_i32 = arith.constant 0 : i32
    %c0_i32_0 = arith.constant 0 : i32
    %c0_i32_1 = arith.constant 0 : i32
    return %c0_i32, %c0_i32_0 : i32, i32
  }
  func.func @transform_6(%arg0: i32) -> (i32, i32) {
    %c0_i32 = arith.constant 0 : i32
    %c0_i32_0 = arith.constant 0 : i32
    %c0_i32_1 = arith.constant 0 : i32
    return %c0_i32, %c0_i32_0 : i32, i32
  }
  func.func @transform_7(%arg0: i32) -> (i32, i32) {
    %c0_i32 = arith.constant 0 : i32
    %c0_i32_0 = arith.constant 0 : i32
    %c0_i32_1 = arith.constant 0 : i32
    return %c0_i32, %c0_i32_0 : i32, i32
  }
}

</mosaic_0001>

<bundles_post_ra>
// kernel: forward.4
= control target key start
LH: loop header
LB: loop body
LE: loop exit
PB: predicated region body
PF: predicated region fallthrough
CT: control target
= control target key end

     0   :  { %8 = vsyncpa [#allocation3], 0  ;;  %s244_s12 = smov [#allocation2]   ;;  %s310_s0 = inlined_call_operand.vmem [shape: f32[32,64], index: 0, kind: input, shape index: {}]   ;;  %s311_s1 = inlined_call_operand.hbm [shape: f32[64,128], index: 1, kind: input, shape index: {}]   ;;  %s312_s2 = inlined_call_operand.vmem [shape: f32[1,128], index: 2, kind: input, shape index: {}]   ;;  %s313_s3 = inlined_call_operand.vmem [shape: f32[32,128], index: 3, kind: output, shape index: {}]  }
   0x1   :  { %s16_s13 = sshll.u32 %s244_s12, 4  ;;  %s220_s16 = scalar_lea.hbm %s311_s1, 1024  ;;  %s17_s13 = int_to_ptr.vmem [resolvable:$true] %s16_s13 }
   0x2   :  { %p221_p0 = scmp.ne.s32.totalorder %s311_s1, %s220_s16  ;;  %p224_p1 = scmp.lt.u32.totalorder %s220_s16, %s311_s1 }
   0x4   :  { %p226_p2 = pnand %p224_p1, %p221_p0 }
   0x6   :  { %229 = shalt.err (!%p226_p2)
}
   0x7   :  { %s230_s21 = scalar_lea.vmem %s17_s13, 1024  ;;  %p235_p4 = scmp.lt.s32.totalorder %s17_s13, %s17_s13 }
   0x8   :  { %p231_p3 = scmp.ne.s32.totalorder %s17_s13, %s230_s21  ;;  %p236_p5 = scmp.lt.s32.totalorder %s230_s21, %s230_s21 }
   0xa   :  { %p237_p6 = por %p236_p5, %p235_p4 }
   0xc   :  { %p238_p7 = pnand %p237_p6, %p231_p3 }
   0xe   :  { %241 = shalt.err (!%p238_p7)
}
   0xf   :  { %s245_s22 = smov 128   ;;  %s246_s23 = smov 8  }
  0x10   :  { %22 = dma.hbm_to_vmem [thread:$0]  %s311_s1, 1024, %s17_s13, [#allocation3], %s245_s22, %s245_s22, %s246_s23  }
  0x11   :  { %242 = dma.done.wait [#allocation3], 1024  }
  0x12   :  { %243 = vsyncadd [#allocation3], 4294966272  ;;  %v32_v0 = vld [vmem:[#allocation2] sm:$0xff]  ;;  %v33_v1 = vld [vmem:[#allocation2 + $0x8] sm:$0xff]  ;;  %vm47_vm0 = vcmask 523264  }
  0x13   :  { %v34_v2 = vld [vmem:[#allocation2 + $0x10] sm:$0xff]  ;;  %v193_v3 = vpack.c.bf16 %v33_v1, %v32_v0  ;;  %v35_v4 = vld [vmem:[#allocation2 + $0x18] sm:$0xff]  ;;  %v36_v6 = vld [vmem:[#allocation2 + $0x20] sm:$0xff] }
  0x14   :  { %v197_v5 = vpack.c.bf16 %v35_v4, %v34_v2  ;;  %v37_v7 = vld [vmem:[#allocation2 + $0x28] sm:$0xff]  ;;  %v28_v8 = vld [vmem:[%s310_s0] sm:$0xff]  ;;  %v30_v9 = vld [vmem:[%s310_s0 + $0x10] sm:$0xff] }
  0x15   :  { %194 = vmatprep.subr.bf16.mxu0 %v193_v3  ;;  %209 = vmatprep.subr.bf16.mxu1 %v193_v3  ;;  %v201_v10 = vpack.c.bf16 %v37_v7, %v36_v6  ;;  %v38_v11 = vld [vmem:[#allocation2 + $0x30] sm:$0xff]  ;;  %v39_v12 = vld [vmem:[#allocation2 + $0x38] sm:$0xff]  ;;  %v29_v14 = vld [vmem:[%s310_s0 + $0x8] sm:$0xff] }
  0x16   :  { %196 = vmatpush3.bf16.msra.mxu0 %v193_v3  ;;  %213 = vmatpush3.bf16.msra.mxu1 %v193_v3  ;;  %v205_v13 = vpack.c.bf16 %v39_v12, %v38_v11  ;;  %v31_v15 = vld [vmem:[%s310_s0 + $0x18] sm:$0xff]  ;;  %v154_v16 = vld [vmem:[%s312_s2] ss:$0 sm:$0xff] }
  0x17   :  { %198 = vmatprep.subr.bf16.mxu0 %v197_v5  ;;  %210 = vmatprep.subr.bf16.mxu1 %v197_v5 }
  0x18   :  { %187 = vmatprep.mubr.msk.f32.mxu0 %vm47_vm0, %v28_v8  ;;  %190 = vmatprep.mubr.msk.f32.mxu1 %vm47_vm0, %v30_v9 }
  0x1a   :  { %200 = vmatpush3.bf16.msra.mxu0 %v197_v5  ;;  %214 = vmatpush3.bf16.msra.mxu1 %v197_v5 }
  0x1b   :  { %202 = vmatprep.subr.bf16.mxu0 %v201_v10  ;;  %211 = vmatprep.subr.bf16.mxu1 %v201_v10 }
  0x1e   :  { %204 = vmatpush3.bf16.msra.mxu0 %v201_v10  ;;  %215 = vmatpush3.bf16.msra.mxu1 %v201_v10 }
  0x1f   :  { %206 = vmatprep.subr.bf16.mxu0 %v205_v13  ;;  %212 = vmatprep.subr.bf16.mxu1 %v205_v13 }
  0x22   :  { %208 = vmatpush3.bf16.msra.mxu0 %v205_v13  ;;  %216 = vmatpush3.bf16.msra.mxu1 %v205_v13 }
  0x25   :  { %188 = vmatmul.mubr.msk.f32.vlgmr.msra.gmra.mrb[0].mxu0 %vm47_vm0, %v29_v14  ;;  %191 = vmatmul.mubr.msk.f32.vlgmr.msra.gmra.mrb[0].mxu1 %vm47_vm0, %v31_v15 }
  0xf8   :  { %v189_v17 = vpop.f32.mrb[0].mxu0  ;;  %v192_v18 = vpop.f32.mrb[0].mxu1 }
  0xf9   :  { %v132_v19 = vadd.f32 %v189_v17, %v154_v16  ;;  %v142_v20 = vadd.f32 %v192_v18, %v154_v16  ;;  %v126_v21 = vpop.f32.mrb[1].mxu0  ;;  %v136_v22 = vpop.f32.mrb[1].mxu1 }
  0xfa   :  { %v127_v23 = vadd.f32 %v154_v16, %v126_v21  ;;  %v137_v24 = vadd.f32 %v154_v16, %v136_v22 }
  0xfb   :  { %146 = vst [vmem:[%s313_s3 + $0x8] sm:$0xff] %v132_v19  ;;  %148 = vst [vmem:[%s313_s3 + $0x18] sm:$0xff] %v142_v20 }
  0xfc   :  { %145 = vst [vmem:[%s313_s3] sm:$0xff] %v127_v23  ;;  %147 = vst [vmem:[%s313_s3 + $0x10] sm:$0xff] %v137_v24 }
  0xfd   :  { %153 = vsyncpa [#allocation3], 1 }

// kernel: forward.7
= control target key start
LH: loop header
LB: loop body
LE: loop exit
PB: predicated region body
PF: predicated region fallthrough
CT: control target
= control target key end

     0   :  { %vm30_vm0 = vcmask 1041408   ;;  %s1231_s0 = inlined_call_operand.vmem [shape: f32[2,128], index: 0, kind: input, shape index: {}]   ;;  %s1232_s1 = inlined_call_operand.vmem [shape: f32[1,128], index: 1, kind: input, shape index: {}]   ;;  %s1233_s2 = inlined_call_operand.vmem [shape: f32[1,128], index: 2, kind: input, shape index: {}]   ;;  %s1234_s3 = inlined_call_operand.vmem [shape: f32[128,512], index: 3, kind: input, shape index: {}]   ;;  %s1235_s4 = inlined_call_operand.vmem [shape: f32[1,512], index: 4, kind: input, shape index: {}]   ;;  %s1236_s5 = inlined_call_operand.vmem [shape: f32[512,32], index: 5, kind: input, shape index: {}]   ;;  %s1237_s6 = inlined_call_operand.vmem [shape: f32[1,32], index: 6, kind: input, shape index: {}]   ;;  %s1238_s7 = inlined_call_operand.hbm [shape: f32[2,32], index: 7, kind: output, shape index: {}]  }
   0x1   :  { %v27_v0 = vld [vmem:[%s1231_s0] sm:$0x3] }
   0x2   :  { %12 = vsyncpa [#allocation3], 0  ;;  %v31_v1 = vsel %vm30_vm0, %v27_v0, 0.0  ;;  %v60_v2 = vld [vmem:[%s1234_s3 + $0x8] sm:$0xff]  ;;  %v62_v4 = vld [vmem:[%s1234_s3 + $0x18] sm:$0xff]  ;;  %s772_s0 = smov [#allocation2]  }
   0x3   :  { %32 = vadd.xlane.f32.xlu0 %v31_v1  ;;  %v64_v3 = vld [vmem:[%s1234_s3 + $0x28] sm:$0xff]  ;;  %v66_v6 = vld [vmem:[%s1234_s3 + $0x38] sm:$0xff]  ;;  %v59_v7 = vld [vmem:[%s1234_s3] sm:$0xff]  ;;  %s526_s10 = sshll.u32 %s772_s0, 4  ;;  %vm518_vm1 = vcmask 254976   ;;  %s527_s10 = int_to_ptr.vmem [resolvable:$true] %s526_s10 }
   0x4   :  { %v607_v5 = vpack.c.bf16 %v64_v3, %v60_v2  ;;  %v63_v8 = vld [vmem:[%s1234_s3 + $0x20] sm:$0xff]  ;;  %v639_v9 = vpack.c.bf16 %v66_v6, %v62_v4  ;;  %v61_v11 = vld [vmem:[%s1234_s3 + $0x10] sm:$0xff]  ;;  %v68_v13 = vld [vmem:[%s1234_s3 + $0x48] sm:$0xff]  ;;  %s747_s11 = scalar_lea.vmem %s527_s10, 32  ;;  %p752_p1 = scmp.lt.s32.totalorder %s527_s10, %s527_s10 }
   0x5   :  { %v609_v10 = vpack.c.bf16 %v63_v8, %v59_v7  ;;  %v65_v12 = vld [vmem:[%s1234_s3 + $0x30] sm:$0xff]  ;;  %v72_v15 = vld [vmem:[%s1234_s3 + $0x68] sm:$0xff]  ;;  %v70_v16 = vld [vmem:[%s1234_s3 + $0x58] sm:$0xff]  ;;  %v771_v7 = vmov 0.0   ;;  %p748_p0 = scmp.ne.s32.totalorder %s527_s10, %s747_s11  ;;  %p753_p2 = scmp.lt.s32.totalorder %s747_s11, %s747_s11 }
   0x6   :  { %608 = vmatprep.subr.bf16.mxu0 %v607_v5  ;;  %v641_v14 = vpack.c.bf16 %v65_v12, %v61_v11  ;;  %v74_v17 = vld [vmem:[%s1234_s3 + $0x78] sm:$0xff]  ;;  %640 = vmatprep.subr.bf16.mxu1 %v639_v9  ;;  %v611_v18 = vpack.c.bf16 %v72_v15, %v68_v13  ;;  %v67_v20 = vld [vmem:[%s1234_s3 + $0x40] sm:$0xff]  ;;  %v69_v22 = vld [vmem:[%s1234_s3 + $0x50] sm:$0xff] }
   0x7   :  { %610 = vmatpush1.bf16.msra.mxu0 %v609_v10  ;;  %v643_v19 = vpack.c.bf16 %v74_v17, %v70_v16  ;;  %v71_v21 = vld [vmem:[%s1234_s3 + $0x60] sm:$0xff]  ;;  %v73_v24 = vld [vmem:[%s1234_s3 + $0x70] sm:$0xff]  ;;  %v76_v25 = vld [vmem:[%s1234_s3 + $0x88] sm:$0xff]  ;;  %209 = vmatprep.mubr.f32.mxu0 %v771_v7  ;;  %p754_p3 = por %p753_p2, %p752_p1 }
   0x8   :  { %642 = vmatpush1.bf16.msra.mxu1 %v641_v14  ;;  %v613_v23 = vpack.c.bf16 %v71_v21, %v67_v20  ;;  %v80_v26 = vld [vmem:[%s1234_s3 + $0xa8] sm:$0xff]  ;;  %612 = vmatprep.subr.bf16.mxu0 %v611_v18  ;;  %v645_v27 = vpack.c.bf16 %v73_v24, %v69_v22  ;;  %v78_v29 = vld [vmem:[%s1234_s3 + $0x98] sm:$0xff]  ;;  %v75_v31 = vld [vmem:[%s1234_s3 + $0x80] sm:$0xff] }
   0x9   :  { %644 = vmatprep.subr.bf16.mxu1 %v643_v19  ;;  %v615_v28 = vpack.c.bf16 %v80_v26, %v76_v25  ;;  %v82_v30 = vld [vmem:[%s1234_s3 + $0xb8] sm:$0xff]  ;;  %v79_v33 = vld [vmem:[%s1234_s3 + $0xa0] sm:$0xff]  ;;  %v77_v34 = vld [vmem:[%s1234_s3 + $0x90] sm:$0xff]  ;;  %280 = vmatprep.mubr.f32.mxu1 %v771_v7  ;;  %p755_p4 = pnand %p754_p3, %p748_p0 }
   0xa   :  { %v647_v32 = vpack.c.bf16 %v82_v30, %v78_v29  ;;  %v81_v35 = vld [vmem:[%s1234_s3 + $0xb0] sm:$0xff]  ;;  %v617_v36 = vpack.c.bf16 %v79_v33, %v75_v31  ;;  %v84_v43 = vld [vmem:[%s1234_s3 + $0xc8] sm:$0xff]  ;;  %v86_v45 = vld [vmem:[%s1234_s3 + $0xd8] sm:$0xff] }
   0xb   :  { %614 = vmatpush1.bf16.msra.mxu0 %v613_v23  ;;  %v649_v37 = vpack.c.bf16 %v81_v35, %v77_v34  ;;  %v88_v44 = vld [vmem:[%s1234_s3 + $0xe8] sm:$0xff]  ;;  %v90_v47 = vld [vmem:[%s1234_s3 + $0xf8] sm:$0xff]  ;;  %v83_v48 = vld [vmem:[%s1234_s3 + $0xc0] sm:$0xff] }
   0xc   :  { %646 = vmatpush1.bf16.msra.mxu1 %v645_v27  ;;  %616 = vmatprep.subr.bf16.mxu0 %v615_v28  ;;  %v619_v46 = vpack.c.bf16 %v88_v44, %v84_v43  ;;  %v87_v49 = vld [vmem:[%s1234_s3 + $0xe0] sm:$0xff]  ;;  %v651_v50 = vpack.c.bf16 %v90_v47, %v86_v45  ;;  %v85_v52 = vld [vmem:[%s1234_s3 + $0xd0] sm:$0xff]  ;;  %v92_v55 = vld [vmem:[%s1234_s3 + $0x108] sm:$0xff] }
   0xd   :  { %648 = vmatprep.subr.bf16.mxu1 %v647_v32  ;;  %v621_v51 = vpack.c.bf16 %v87_v49, %v83_v48  ;;  %v89_v53 = vld [vmem:[%s1234_s3 + $0xf0] sm:$0xff]  ;;  %v96_v56 = vld [vmem:[%s1234_s3 + $0x128] sm:$0xff]  ;;  %v94_v57 = vld [vmem:[%s1234_s3 + $0x118] sm:$0xff] }
   0xe   :  { %v653_v54 = vpack.c.bf16 %v89_v53, %v85_v52  ;;  %v623_v58 = vpack.c.bf16 %v96_v56, %v92_v55  ;;  %v98_v59 = vld [vmem:[%s1234_s3 + $0x138] sm:$0xff]  ;;  %v91_v60 = vld [vmem:[%s1234_s3 + $0x100] sm:$0xff]  ;;  %v97_v1 = vld [vmem:[%s1234_s3 + $0x130] sm:$0xff] }
   0xf   :  { %618 = vmatpush1.bf16.msra.mxu0 %v617_v36  ;;  %v95_v61 = vld [vmem:[%s1234_s3 + $0x120] sm:$0xff]  ;;  %v655_v62 = vpack.c.bf16 %v98_v59, %v94_v57  ;;  %v100_v2 = vld [vmem:[%s1234_s3 + $0x148] sm:$0xff]  ;;  %v102_v5 = vld [vmem:[%s1234_s3 + $0x158] sm:$0xff] }
  0x10   :  { %650 = vmatpush1.bf16.msra.mxu1 %v649_v37  ;;  %620 = vmatprep.subr.bf16.mxu0 %v619_v46  ;;  %v625_v63 = vpack.c.bf16 %v95_v61, %v91_v60  ;;  %v104_v4 = vld [vmem:[%s1234_s3 + $0x168] sm:$0xff]  ;;  %v106_v6 = vld [vmem:[%s1234_s3 + $0x178] sm:$0xff]  ;;  %v99_v10 = vld [vmem:[%s1234_s3 + $0x140] sm:$0xff] }
  0x11   :  { %652 = vmatprep.subr.bf16.mxu1 %v651_v50  ;;  %v627_v8 = vpack.c.bf16 %v104_v4, %v100_v2  ;;  %v659_v9 = vpack.c.bf16 %v106_v6, %v102_v5  ;;  %v103_v11 = vld [vmem:[%s1234_s3 + $0x160] sm:$0xff]  ;;  %v101_v12 = vld [vmem:[%s1234_s3 + $0x150] sm:$0xff]  ;;  %v108_v15 = vld [vmem:[%s1234_s3 + $0x188] sm:$0xff] }
  0x12   :  { %v629_v13 = vpack.c.bf16 %v103_v11, %v99_v10  ;;  %v105_v14 = vld [vmem:[%s1234_s3 + $0x170] sm:$0xff]  ;;  %v112_v16 = vld [vmem:[%s1234_s3 + $0x1a8] sm:$0xff]  ;;  %v110_v19 = vld [vmem:[%s1234_s3 + $0x198] sm:$0xff] }
  0x13   :  { %622 = vmatpush1.bf16.msra.mxu0 %v621_v51  ;;  %v661_v17 = vpack.c.bf16 %v105_v14, %v101_v12  ;;  %v631_v18 = vpack.c.bf16 %v112_v16, %v108_v15  ;;  %v114_v20 = vld [vmem:[%s1234_s3 + $0x1b8] sm:$0xff]  ;;  %v107_v21 = vld [vmem:[%s1234_s3 + $0x180] sm:$0xff]  ;;  %v109_v24 = vld [vmem:[%s1234_s3 + $0x190] sm:$0xff] }
  0x14   :  { %654 = vmatpush1.bf16.msra.mxu1 %v653_v54  ;;  %624 = vmatprep.subr.bf16.mxu0 %v623_v58  ;;  %v663_v22 = vpack.c.bf16 %v114_v20, %v110_v19  ;;  %v111_v23 = vld [vmem:[%s1234_s3 + $0x1a0] sm:$0xff]  ;;  %v113_v25 = vld [vmem:[%s1234_s3 + $0x1b0] sm:$0xff]  ;;  %v116_v27 = vld [vmem:[%s1234_s3 + $0x1c8] sm:$0xff] }
  0x15   :  { %656 = vmatprep.subr.bf16.mxu1 %v655_v62  ;;  %v633_v26 = vpack.c.bf16 %v111_v23, %v107_v21  ;;  %v120_v28 = vld [vmem:[%s1234_s3 + $0x1e8] sm:$0xff]  ;;  %v118_v29 = vld [vmem:[%s1234_s3 + $0x1d8] sm:$0xff]  ;;  %v665_v30 = vpack.c.bf16 %v113_v25, %v109_v24  ;;  %v115_v33 = vld [vmem:[%s1234_s3 + $0x1c0] sm:$0xff] }
  0x16   :  { %v635_v31 = vpack.c.bf16 %v120_v28, %v116_v27  ;;  %v122_v32 = vld [vmem:[%s1234_s3 + $0x1f8] sm:$0xff]  ;;  %v119_v34 = vld [vmem:[%s1234_s3 + $0x1e0] sm:$0xff]  ;;  %v117_v36 = vld [vmem:[%s1234_s3 + $0x1d0] sm:$0xff] }
  0x17   :  { %626 = vmatpush1.bf16.msra.mxu0 %v625_v63  ;;  %v667_v35 = vpack.c.bf16 %v122_v32, %v118_v29  ;;  %v121_v37 = vld [vmem:[%s1234_s3 + $0x1f0] sm:$0xff]  ;;  %v355_v43 = vld [vmem:[%s1236_s5 + $0x180] sm:$0xff]  ;;  %v356_v45 = vld [vmem:[%s1236_s5 + $0x188] sm:$0xff] }
  0x18   :  { %628 = vmatprep.subr.bf16.mxu0 %v627_v8  ;;  %v703_v46 = vpack.c.bf16 %v356_v45, %v355_v43  ;;  %v534_v50 = vld [vmem:[%s1232_s1] ss:$0 sm:$0xff]  ;;  %v308_v54 = vld [vmem:[%s1236_s5 + $0x8] sm:$0xff]  ;;  %v325_v58 = vld [vmem:[%s1236_s5 + $0x90] sm:$0xff] }
  0x19   :  { %v535_v52 = vld [vmem:[%s1233_s2] ss:$0 sm:$0xff]  ;;  %v340_v57 = vld [vmem:[%s1236_s5 + $0x108] sm:$0xff]  ;;  %v326_v59 = vld [vmem:[%s1236_s5 + $0x98] sm:$0xff] }
  0x1a   :  { %v307_v53 = vld [vmem:[%s1236_s5] sm:$0xff]  ;;  %v358_v60 = vld [vmem:[%s1236_s5 + $0x198] sm:$0xff]  ;;  %v341_v5 = vld [vmem:[%s1236_s5 + $0x110] sm:$0xff] }
  0x1b   :  { %630 = vmatpush1.bf16.msra.mxu0 %v629_v13  ;;  %v339_v56 = vld [vmem:[%s1236_s5 + $0x100] sm:$0xff]  ;;  %v673_v62 = vpack.c.bf16 %v308_v54, %v307_v53  ;;  %v342_v6 = vld [vmem:[%s1236_s5 + $0x118] sm:$0xff]  ;;  %v328_v8 = vld [vmem:[%s1236_s5 + $0xa8] sm:$0xff] }
  0x1c   :  { %632 = vmatprep.subr.bf16.mxu0 %v631_v18  ;;  %v705_v63 = vpack.c.bf16 %v340_v57, %v339_v56  ;;  %v327_v7 = vld [vmem:[%s1236_s5 + $0xa0] sm:$0xff]  ;;  %v360_v10 = vld [vmem:[%s1236_s5 + $0x1a8] sm:$0xff]  ;;  %v709_v12 = vpack.c.bf16 %v342_v6, %v341_v5  ;;  %v329_v21 = vld [vmem:[%s1236_s5 + $0xb0] sm:$0xff] }
  0x1d   :  { %v311_v13 = vld [vmem:[%s1236_s5 + $0x20] sm:$0xff]  ;;  %v679_v14 = vpack.c.bf16 %v328_v8, %v327_v7  ;;  %v312_v16 = vld [vmem:[%s1236_s5 + $0x28] sm:$0xff]  ;;  %v361_v23 = vld [vmem:[%s1236_s5 + $0x1b0] sm:$0xff] }
  0x1e   :  { %v344_v18 = vld [vmem:[%s1236_s5 + $0x128] sm:$0xff]  ;;  %v681_v19 = vpack.c.bf16 %v312_v16, %v311_v13  ;;  %v362_v25 = vld [vmem:[%s1236_s5 + $0x1b8] sm:$0xff]  ;;  %v347_v43 = vld [vmem:[%s1236_s5 + $0x140] sm:$0xff] }
  0x1f   :  { %634 = vmatpush1.bf16.msra.mxu0 %v633_v26  ;;  %v313_v26 = vld [vmem:[%s1236_s5 + $0x30] sm:$0xff]  ;;  %v314_v27 = vld [vmem:[%s1236_s5 + $0x38] sm:$0xff]  ;;  %v715_v28 = vpack.c.bf16 %v362_v25, %v361_v23 }
  0x20   :  { %636 = vmatprep.subr.bf16.mxu0 %v635_v31  ;;  %v685_v29 = vpack.c.bf16 %v314_v27, %v313_v26  ;;  %v346_v31 = vld [vmem:[%s1236_s5 + $0x138] sm:$0xff]  ;;  %v337_v5 = vld [vmem:[%s1236_s5 + $0xf0] sm:$0xff] }
  0x21   :  { %v350_v56 = vld [vmem:[%s1236_s5 + $0x158] sm:$0xff]  ;;  %v369_v7 = vld [vmem:[%s1236_s5 + $0x1f0] sm:$0xff] }
  0x22   :  { %v338_v6 = vld [vmem:[%s1236_s5 + $0xf8] sm:$0xff] }
  0x23   :  { %v699_v8 = vpack.c.bf16 %v338_v6, %v337_v5 }
  0x90   :  { %v33_v38 = vpop.xlane.xlu0 %32 }
  0x91   :  { %v35_v39 = vmul.f32 0.0078125, %v33_v38  ;;  %v637_v38 = vpack.c.bf16 %v119_v34, %v115_v33  ;;  %v331_v33 = vld [vmem:[%s1236_s5 + $0xc0] sm:$0xff]  ;;  %v332_v34 = vld [vmem:[%s1236_s5 + $0xc8] sm:$0xff] }
  0x93   :  { %v889_v40 = vsub.f32 %v27_v0, %v35_v39  ;;  %v93_v0 = vld [vmem:[%s1234_s3 + $0x110] sm:$0xff]  ;;  %v669_v39 = vpack.c.bf16 %v121_v37, %v117_v36  ;;  %638 = vmatpush1.bf16.msra.mxu0 %v637_v38  ;;  %v687_v36 = vpack.c.bf16 %v332_v34, %v331_v33  ;;  %v364_v37 = vld [vmem:[%s1236_s5 + $0x1c8] sm:$0xff]  ;;  %v315_v38 = vld [vmem:[%s1236_s5 + $0x40] sm:$0xff] }
  0x94   :  { %v657_v3 = vpack.c.bf16 %v97_v1, %v93_v0  ;;  %v309_v0 = vld [vmem:[%s1236_s5 + $0x10] sm:$0xff]  ;;  %v310_v1 = vld [vmem:[%s1236_s5 + $0x18] sm:$0xff] }
  0x95   :  { %v37_v41 = vmul.f32 %v889_v40, %v889_v40  ;;  %v677_v11 = vpack.c.bf16 %v310_v1, %v309_v0 }
  0x96   :  { %658 = vmatpush1.bf16.msra.mxu1 %v657_v3  ;;  %v675_v3 = vpack.c.bf16 %v326_v59, %v325_v58  ;;  %v335_v58 = vld [vmem:[%s1236_s5 + $0xe0] sm:$0xff]  ;;  %v336_v59 = vld [vmem:[%s1236_s5 + $0xe8] sm:$0xff] }
  0x97   :  { %v38_v42 = vsel %vm30_vm0, %v37_v41, 0.0  ;;  %660 = vmatprep.subr.bf16.mxu1 %v659_v9  ;;  %v323_v41 = vld [vmem:[%s1236_s5 + $0x80] sm:$0xff] }
  0x98   :  { %39 = vadd.xlane.f32.xlu0 %v38_v42  ;;  %v324_v42 = vld [vmem:[%s1236_s5 + $0x88] sm:$0xff]  ;;  %v359_v9 = vld [vmem:[%s1236_s5 + $0x1a0] sm:$0xff] }
  0x99   :  { %v671_v44 = vpack.c.bf16 %v324_v42, %v323_v41  ;;  %v711_v15 = vpack.c.bf16 %v360_v10, %v359_v9  ;;  %v370_v9 = vld [vmem:[%s1236_s5 + $0x1f8] sm:$0xff]  ;;  %v321_v10 = vld [vmem:[%s1236_s5 + $0x70] sm:$0xff] }
  0x9a   :  { %662 = vmatpush1.bf16.msra.mxu1 %v661_v17  ;;  %v343_v17 = vld [vmem:[%s1236_s5 + $0x120] sm:$0xff] }
  0x9b   :  { %664 = vmatprep.subr.bf16.mxu1 %v663_v22  ;;  %672 = vmatprep.subr.bf16.mxu0 %v671_v44  ;;  %v713_v20 = vpack.c.bf16 %v344_v18, %v343_v17  ;;  %v330_v22 = vld [vmem:[%s1236_s5 + $0xb8] sm:$0xff]  ;;  %v348_v44 = vld [vmem:[%s1236_s5 + $0x148] sm:$0xff]  ;;  %v125_v17 = vlaneseq }
  0x9c   :  { %v683_v24 = vpack.c.bf16 %v330_v22, %v329_v21  ;;  %v721_v45 = vpack.c.bf16 %v348_v44, %v347_v43  ;;  %v123_v21 = vld [vmem:[%s1235_s4] sm:$0xf] }
  0x9d   :  { %v126_v18 = vshrl.u32 %v125_v17, 7 }
  0x9e   :  { %666 = vmatpush1.bf16.msra.mxu1 %v665_v30  ;;  %v345_v30 = vld [vmem:[%s1236_s5 + $0x130] sm:$0xff] }
  0x9f   :  { %668 = vmatprep.subr.bf16.mxu1 %v667_v35  ;;  %v717_v32 = vpack.c.bf16 %v346_v31, %v345_v30  ;;  %v363_v35 = vld [vmem:[%s1236_s5 + $0x1c0] sm:$0xff]  ;;  %v131_v22 = vsub.s32 1, %v126_v18  ;;  %v139_v23 = vsub.s32 3, %v126_v18 }
  0xa0   :  { %v719_v41 = vpack.c.bf16 %v364_v37, %v363_v35 }
  0xa1   :  { %v132_v26 = vrot.slane %v123_v21, %v131_v22  ;;  %v140_v27 = vrot.slane %v123_v21, %v139_v23 }
  0xa2   :  { %670 = vmatpush1.bf16.msra.mxu1 %v669_v39  ;;  %v316_v39 = vld [vmem:[%s1236_s5 + $0x48] sm:$0xff] }
  0xa3   :  { %704 = vmatprep.subr.bf16.mxu1 %v703_v46  ;;  %v689_v42 = vpack.c.bf16 %v316_v39, %v315_v38  ;;  %v333_v46 = vld [vmem:[%s1236_s5 + $0xd0] sm:$0xff] }
 0x125   :  { %v40_v47 = vpop.xlane.xlu0 %39 }
 0x126   :  { %v41_v48 = vmul.f32 0.0078125, %v40_v47  ;;  %v334_v47 = vld [vmem:[%s1236_s5 + $0xd8] sm:$0xff] }
 0x128   :  { %v42_v49 = vadd.f32 1e-05, %v41_v48  ;;  %v365_v48 = vld [vmem:[%s1236_s5 + $0x1d0] sm:$0xff] }
 0x12a   :  { %737 = vrsqrt.f32 %v42_v49  ;;  %v691_v49 = vpack.c.bf16 %v334_v47, %v333_v46 }
 0x134   :  { %v738_v51 = vpop.eup %737 }
 0x135   :  { %v44_v55 = vmul.f32 %v738_v51, %v889_v40  ;;  %v357_v40 = vld [vmem:[%s1236_s5 + $0x190] sm:$0xff] }
 0x136   :  { %v707_v4 = vpack.c.bf16 %v358_v60, %v357_v40  ;;  %v317_v51 = vld [vmem:[%s1236_s5 + $0x50] sm:$0xff]  ;;  %v367_v40 = vld [vmem:[%s1236_s5 + $0x1e0] sm:$0xff]  ;;  %v695_v60 = vpack.c.bf16 %v336_v59, %v335_v58 }
 0x137   :  { %v51_v61 = vmul.f32 %v534_v50, %v44_v55  ;;  %v366_v50 = vld [vmem:[%s1236_s5 + $0x1d8] sm:$0xff]  ;;  %v349_v55 = vld [vmem:[%s1236_s5 + $0x150] sm:$0xff]  ;;  %v536_v59 = vld [vmem:[%s1237_s6] ss:$0 sm:$0xff] }
 0x138   :  { %v723_v53 = vpack.c.bf16 %v366_v50, %v365_v48  ;;  %v725_v57 = vpack.c.bf16 %v350_v56, %v349_v55 }
 0x139   :  { %v58_v2 = vadd.f32 %v535_v52, %v51_v61  ;;  %v318_v52 = vld [vmem:[%s1236_s5 + $0x58] sm:$0xff]  ;;  %v368_v61 = vld [vmem:[%s1236_s5 + $0x1e8] sm:$0xff] }
 0x13a   :  { %v693_v54 = vpack.c.bf16 %v318_v52, %v317_v51  ;;  %v727_v0 = vpack.c.bf16 %v368_v61, %v367_v40 }
 0x13b   :  { %210 = vmatmul.mubr.f32.vlgmr.msra.gmra.mrb[0].mxu0 %v58_v2  ;;  %281 = vmatmul.mubr.f32.vlgmr.msra.gmra.mrb[0].mxu1 %v58_v2  ;;  %v351_v2 = vld [vmem:[%s1236_s5 + $0x160] sm:$0xff] }
 0x13c   :  { %674 = vmatpush3.bf16.msra.mxu0 %v673_v62  ;;  %706 = vmatpush3.bf16.msra.mxu1 %v705_v63  ;;  %v319_v62 = vld [vmem:[%s1236_s5 + $0x60] sm:$0xff]  ;;  %v320_v63 = vld [vmem:[%s1236_s5 + $0x68] sm:$0xff] }
 0x13d   :  { %676 = vmatprep.subr.bf16.mxu0 %v675_v3  ;;  %708 = vmatprep.subr.bf16.mxu1 %v707_v4  ;;  %v697_v1 = vpack.c.bf16 %v320_v63, %v319_v62  ;;  %v352_v3 = vld [vmem:[%s1236_s5 + $0x168] sm:$0xff] }
 0x13e   :  { %v729_v4 = vpack.c.bf16 %v352_v3, %v351_v2 }
 0x140   :  { %678 = vmatpush3.bf16.msra.mxu0 %v677_v11  ;;  %710 = vmatpush3.bf16.msra.mxu1 %v709_v12  ;;  %v322_v11 = vld [vmem:[%s1236_s5 + $0x78] sm:$0xff]  ;;  %v731_v12 = vpack.c.bf16 %v370_v9, %v369_v7 }
 0x141   :  { %680 = vmatprep.subr.bf16.mxu0 %v679_v14  ;;  %712 = vmatprep.subr.bf16.mxu1 %v711_v15  ;;  %v701_v13 = vpack.c.bf16 %v322_v11, %v321_v10  ;;  %v353_v14 = vld [vmem:[%s1236_s5 + $0x170] sm:$0xff]  ;;  %v354_v15 = vld [vmem:[%s1236_s5 + $0x178] sm:$0xff] }
 0x142   :  { %v733_v16 = vpack.c.bf16 %v354_v15, %v353_v14 }
 0x144   :  { %682 = vmatpush3.bf16.msra.mxu0 %v681_v19  ;;  %714 = vmatpush3.bf16.msra.mxu1 %v713_v20  ;;  %v127_v19 = vsub.s32 0, %v126_v18  ;;  %v135_v20 = vsub.s32 2, %v126_v18 }
 0x145   :  { %684 = vmatprep.subr.bf16.mxu0 %v683_v24  ;;  %716 = vmatprep.subr.bf16.mxu1 %v715_v28 }
 0x146   :  { %v128_v24 = vrot.slane %v123_v21, %v127_v19  ;;  %v136_v25 = vrot.slane %v123_v21, %v135_v20 }
 0x148   :  { %686 = vmatpush3.bf16.msra.mxu0 %v685_v29  ;;  %718 = vmatpush3.bf16.msra.mxu1 %v717_v32 }
 0x149   :  { %688 = vmatprep.subr.bf16.mxu0 %v687_v36  ;;  %720 = vmatprep.subr.bf16.mxu1 %v719_v41 }
 0x14c   :  { %690 = vmatpush3.bf16.msra.mxu0 %v689_v42  ;;  %722 = vmatpush3.bf16.msra.mxu1 %v721_v45 }
 0x14d   :  { %692 = vmatprep.subr.bf16.mxu0 %v691_v49  ;;  %724 = vmatprep.subr.bf16.mxu1 %v723_v53 }
 0x150   :  { %694 = vmatpush3.bf16.msra.mxu0 %v693_v54  ;;  %726 = vmatpush3.bf16.msra.mxu1 %v725_v57 }
 0x151   :  { %696 = vmatprep.subr.bf16.mxu0 %v695_v60  ;;  %728 = vmatprep.subr.bf16.mxu1 %v727_v0 }
 0x154   :  { %698 = vmatpush3.bf16.msra.mxu0 %v697_v1  ;;  %730 = vmatpush3.bf16.msra.mxu1 %v729_v4 }
 0x155   :  { %700 = vmatprep.subr.bf16.mxu0 %v699_v8  ;;  %732 = vmatprep.subr.bf16.mxu1 %v731_v12 }
 0x158   :  { %702 = vmatpush3.bf16.msra.mxu0 %v701_v13  ;;  %734 = vmatpush3.bf16.msra.mxu1 %v733_v16 }
 0x20e   :  { %v211_v28 = vpop.f32.mrb[0].mxu0  ;;  %v282_v29 = vpop.f32.mrb[0].mxu1 }
 0x20f   :  { %v212_v30 = vadd.f32 %v211_v28, %v128_v24  ;;  %v283_v31 = vadd.f32 %v282_v29, %v136_v25  ;;  %v213_v32 = vpop.f32.mrb[1].mxu0  ;;  %v284_v33 = vpop.f32.mrb[1].mxu1 }
 0x210   :  { %v214_v34 = vadd.f32 %v213_v32, %v132_v26  ;;  %v285_v35 = vadd.f32 %v284_v33, %v140_v27 }
 0x211   :  { %v291_v36 = vmul.f32 0.70710677, %v212_v30  ;;  %v293_v37 = vmul.f32 0.70710677, %v283_v31  ;;  %v287_v49 = vmul.f32 0.5, %v212_v30  ;;  %v289_v52 = vmul.f32 0.5, %v283_v31 }
 0x212   :  { %v292_v38 = vmul.f32 0.70710677, %v214_v34  ;;  %v294_v39 = vmul.f32 0.70710677, %v285_v35  ;;  %v288_v47 = vmul.f32 0.5, %v214_v34  ;;  %v290_v50 = vmul.f32 0.5, %v285_v35 }
 0x213   :  { %739 = verf.f32 %v291_v36 }
 0x214   :  { %741 = verf.f32 %v293_v37 }
 0x215   :  { %743 = verf.f32 %v292_v38 }
 0x216   :  { %745 = verf.f32 %v294_v39 }
 0x21d   :  { %v740_v41 = vpop.eup %739 }
 0x21e   :  { %v742_v42 = vpop.eup %741  ;;  %v299_v44 = vadd.f32 1.0, %v740_v41 }
 0x21f   :  { %v744_v43 = vpop.eup %743  ;;  %v301_v46 = vadd.f32 1.0, %v742_v42 }
 0x220   :  { %v746_v45 = vpop.eup %745  ;;  %v300_v48 = vadd.f32 1.0, %v744_v43  ;;  %v303_v54 = vmul.f32 %v299_v44, %v287_v49 }
 0x221   :  { %v302_v51 = vadd.f32 1.0, %v746_v45  ;;  %v305_v56 = vmul.f32 %v301_v46, %v289_v52 }
 0x222   :  { %v304_v53 = vmul.f32 %v300_v48, %v288_v47 }
 0x223   :  { %v306_v55 = vmul.f32 %v302_v51, %v290_v50 }
 0x224   :  { %442 = vmatprep.mubr.f32.mxu0 %v304_v53 }
 0x225   :  { %512 = vmatprep.mubr.f32.mxu1 %v306_v55  ;;  %443 = vmatmul.mubr.f32.vlgmr.msra.gmra.mrb[2].mxu0 %v303_v54 }
 0x226   :  { %513 = vmatmul.mubr.f32.vlgmr.msra.gmra.mrb[2].mxu1 %v305_v56 }
 0x2f8   :  { %v569_v57 = vpop.f32.mrb[2].mxu0 }
 0x2f9   :  { %v604_v58 = vpop.f32.mrb[2].mxu1  ;;  %v570_v40 = vpop.f32.mrb[3].mxu0 }
 0x2fa   :  { %v571_v60 = vadd.f32 %v570_v40, %v569_v57  ;;  %v605_v61 = vpop.f32.mrb[3].mxu1 }
 0x2fb   :  { %v606_v62 = vadd.f32 %v605_v61, %v604_v58 }
 0x2fc   :  { %v445_v63 = vadd.f32 %v571_v60, %v536_v59 }
 0x2fe   :  { %v515_v0 = vadd.f32 %v606_v62, %v445_v63 }
 0x300   :  { %519 = vst.msk [vmem:[#allocation2] sm:$0x3] %vm518_vm1, %v515_v0 }
 0x301   :  { %758 = shalt.err (!%p755_p4)
}
 0x302   :  { %s759_s13 = scalar_lea.hbm %s1238_s7, 32 }
 0x303   :  { %p760_p5 = scmp.ne.s32.totalorder %s1238_s7, %s759_s13  ;;  %p763_p6 = scmp.lt.u32.totalorder %s759_s13, %s1238_s7 }
 0x305   :  { %p765_p7 = pnand %p763_p6, %p760_p5 }
 0x307   :  { %768 = shalt.err (!%p765_p7)
}
 0x308   :  { %529 = dma.vmem_to_hbm [thread:$0]  %s527_s10, 32, %s1238_s7, [#allocation3]  }
 0x309   :  { %769 = dma.done.wait [#allocation3], 32  }
 0x30a   :  { %770 = vsyncadd [#allocation3], 4294967264 }
 0x30b   :  { %533 = vsyncpa [#allocation3], 1 }

// kernel: forward.5
= control target key start
LH: loop header
LB: loop body
LE: loop exit
PB: predicated region body
PF: predicated region fallthrough
CT: control target
= control target key end

     0   :  { %s4357_s0 = inlined_call_operand.vmem [shape: f32[2,24,128], index: 0, kind: input, shape index: {}]   ;;  %s4358_s1 = inlined_call_operand.hbm [shape: f32[128,384], index: 1, kind: input, shape index: {}]   ;;  %s4359_s2 = inlined_call_operand.vmem [shape: f32[1,384], index: 2, kind: input, shape index: {}]   ;;  %s4360_s3 = inlined_call_operand.hbm [shape: f32[128,128], index: 3, kind: input, shape index: {}]   ;;  %s4361_s4 = inlined_call_operand.vmem [shape: f32[1,128], index: 4, kind: input, shape index: {}]   ;;  %s4362_s5 = inlined_call_operand.vmem [shape: f32[1,128], index: 5, kind: input, shape index: {}]   ;;  %s4363_s6 = inlined_call_operand.vmem [shape: f32[1,128], index: 6, kind: input, shape index: {}]   ;;  %s4364_s7 = inlined_call_operand.vmem [shape: f32[128,512], index: 7, kind: input, shape index: {}]   ;;  %s4365_s8 = inlined_call_operand.vmem [shape: f32[1,512], index: 8, kind: input, shape index: {}]   ;;  %s4366_s9 = inlined_call_operand.hbm [shape: f32[512,128], index: 9, kind: input, shape index: {}]   ;;  %s4367_s10 = inlined_call_operand.vmem [shape: f32[1,128], index: 10, kind: input, shape index: {}]   ;;  %s4368_s11 = inlined_call_operand.vmem [shape: f32[1,128], index: 11, kind: input, shape index: {}]   ;;  %s4369_s12 = inlined_call_operand.vmem [shape: f32[1,128], index: 12, kind: input, shape index: {}]   ;;  %s4370_s13 = inlined_call_operand.vmem [shape: f32[2,24,128], index: 13, kind: output, shape index: {}]  }
   0x1   :  { %4375 = sst [smem:[#allocation10_spill]] %s4370_s13 }
   0x2   :  { %18 = vsyncpa [#allocation3], 0 }
   0x3   :  { %19 = vsyncpa [#allocation5], 0  ;;  %s3591_s25 = smov 0  }
   0x4 LB: > { %4376 = sst [smem:[#allocation9_spill]] %s3506_s25  ;;  %s3508_s26 = smov [#allocation4]   ;;  %s3506_s25 = sphi %s3591_s25, %s25_s25  }
   0x5   : > { %s362_s27 = sshll.u32 %s3508_s26, 4  ;;  %s3597_s28 = sadd.s32 4294967295, %s3506_s25   ;;  %s3606_s27 = int_to_ptr.vmem [resolvable:$true] %s362_s27 }
   0x6   : > { %p2570_p0 = scmp.ge.s32.totalorder %s3506_s25, 1  ;;  %p334_p1 = scmp.lt.s32.totalorder %s3506_s25, 3 }
   0x7   : > { %p4373_p2 = scmp.eq.s32.totalorder %s3597_s28, 0  ;;  %s3509_s30 = smov [#allocation2]  }
   0x8   : > { %p3602_p3 = pnand %p2570_p0, %p334_p1  ;;  %s346_s14 = sshll.u32 %s3509_s30, 4  ;;  %s3610_s14 = int_to_ptr.vmem [resolvable:$true] %s346_s14 }
   0x9   : > { %s3510_s16 = smov [#allocation6]   ;;  %s3408_s20 = scalar_lea.hbm %s4360_s3, 2048 }
   0xa   : > { %s4377_s29 = scalar_select %p3602_p3, 1, 0 }
   0xb   : > { %p3244_p4 = pneg %p3602_p3  ;;  %s3618_s17 = sshll.u32 %s3510_s16, 4  ;;  %s391_s17 = int_to_ptr.vmem [resolvable:$true] %s3618_s17 }
   0xc   : > { %p3409_p6 = scmp.ne.s32.totalorder %s4360_s3, %s3408_s20  ;;  %p3415_p10 = scmp.lt.u32.totalorder %s3408_s20, %s4360_s3 }
   0xd   : > { %p3614_p5 = pnand %p4373_p2, %p3244_p4 }
   0xf   : > { %p3628_p7 = pneg %p3614_p5 }
  0x11   : > { %p3411_p8 = pnand %p3628_p7, %p3409_p6 }
  0x13   : > { %p3412_p9 = pneg %p3411_p8 }
  0x15   : > { %p3417_p11 = pnand %p3415_p10, %p3412_p9 }
  0x17   : > { %3420 = shalt.err (!%p3417_p11)
}
  0x18   : > { %s3421_s30 = scalar_lea.vmem %s3606_s27, 2048  ;;  %p3429_p1 = scmp.lt.s32.totalorder %s3606_s27, %s3606_s27 }
  0x19   : > { %p3422_p12 = scmp.ne.s32.totalorder %s3606_s27, %s3421_s30  ;;  %p3430_p4 = scmp.lt.s32.totalorder %s3421_s30, %s3421_s30 }
  0x1b   : > { %p3424_p13 = pnand %p3422_p12, %p3628_p7  ;;  %p3431_p6 = por %p3430_p4, %p3429_p1 }
  0x1d   : > { %p3425_p0 = pneg %p3424_p13 }
  0x1f   : > { %p3432_p8 = pnand %p3431_p6, %p3425_p0 }
  0x21   : > { %3435 = shalt.err (!%p3432_p8)
}
  0x22   : > { %s4372_s16 = smov 128   ;;  %s3512_s18 = smov 8  }
  0x23   : > { %3250 = dma.hbm_to_vmem [thread:$0]  (!%p3614_p5), %s4360_s3, 2048, %s3606_s27, [#allocation5], %s4372_s16, %s4372_s16, %s3512_s18  }
  0x24   : > { %s3436_s24 = scalar_lea.hbm %s4358_s1, 6144 }
  0x25   : > { %p3437_p9 = scmp.ne.s32.totalorder %s4358_s1, %s3436_s24  ;;  %p3443_p12 = scmp.lt.u32.totalorder %s3436_s24, %s4358_s1 }
  0x27   : > { %p3439_p10 = pnand %p3437_p9, %p3628_p7 }
  0x29   : > { %p3440_p11 = pneg %p3439_p10 }
  0x2b   : > { %p3445_p13 = pnand %p3443_p12, %p3440_p11 }
  0x2d   : > { %3448 = shalt.err (!%p3445_p13)
}
  0x2e   : > { %s3449_s27 = scalar_lea.vmem %s3610_s14, 6144  ;;  %p3457_p6 = scmp.lt.s32.totalorder %s3610_s14, %s3610_s14 }
  0x2f   : > { %p3450_p0 = scmp.ne.s32.totalorder %s3610_s14, %s3449_s27  ;;  %p3458_p8 = scmp.lt.s32.totalorder %s3449_s27, %s3449_s27 }
  0x31   : > { %p3452_p1 = pnand %p3450_p0, %p3628_p7  ;;  %p3459_p9 = por %p3458_p8, %p3457_p6 }
  0x33   : > { %p3453_p4 = pneg %p3452_p1 }
  0x35   : > { %p3460_p10 = pnand %p3459_p9, %p3453_p4 }
  0x37   : > { %3463 = shalt.err (!%p3460_p10)
}
  0x38   : > { %s3513_s19 = smov 384   ;;  %s3514_s13 = smov 24  }
  0x39   : > { %3247 = dma.hbm_to_vmem [thread:$0]  (!%p3614_p5), %s4358_s1, 6144, %s3610_s14, [#allocation3], %s3513_s19, %s3513_s19, %s3514_s13  }
  0x3a   : > { %s3464_s24 = scalar_lea.hbm %s4366_s9, 8192 }
  0x3b   : > { %p3465_p11 = scmp.ne.s32.totalorder %s4366_s9, %s3464_s24  ;;  %p3471_p0 = scmp.lt.u32.totalorder %s3464_s24, %s4366_s9 }
  0x3d   : > { %p3467_p12 = pnand %p3465_p11, %p3628_p7 }
  0x3f   : > { %p3468_p13 = pneg %p3467_p12 }
  0x41   : > { %p3473_p1 = pnand %p3471_p0, %p3468_p13 }
  0x43   : > { %3476 = shalt.err (!%p3473_p1)
}
  0x44   : > { %s3477_s25 = scalar_lea.vmem %s391_s17, 8192  ;;  %p3485_p9 = scmp.lt.s32.totalorder %s391_s17, %s391_s17 }
  0x45   : > { %p3478_p4 = scmp.ne.s32.totalorder %s391_s17, %s3477_s25  ;;  %p3486_p10 = scmp.lt.s32.totalorder %s3477_s25, %s3477_s25 }
  0x47   : > { %p3480_p6 = pnand %p3478_p4, %p3628_p7  ;;  %p3487_p2 = por %p3486_p10, %p3485_p9 }
  0x49   : > { %p3481_p8 = pneg %p3480_p6 }
  0x4b   : > { %p3488_p3 = pnand %p3487_p2, %p3481_p8 }
  0x4d   : > { %3491 = shalt.err (!%p3488_p3)
}
  0x4e   : > { %s4380_s14 = smov 128   ;;  %p4381_p11 = scmp.ne.s32.totalorder %s4377_s29, 0 }
  0x4f   : > { %3253 = dma.hbm_to_vmem [thread:$0]  (!%p3614_p5), %s4366_s9, 8192, %s391_s17, [#allocation5], %s4380_s14, %s4380_s14, %s3512_s18  }
  0x50   : > { %423 = sbr.rel (%p4381_p11) target bundleno = 2714 (0xa9a), region = 72  ;;  %p4382_p7 = scmp.eq.s32.totalorder (!%p4381_p11), %s3597_s28, 0 }
  0x57   : > { %3497 = dma.done.wait (%p4382_p7), [#allocation3], 6144   ;;  %p4383_p12 = pmov %p4382_p7 }
  0x58   : > { %p4384_p2 = pmov %p4382_p7 }
  0x59   : > { %3499 = vsyncadd (%p4383_p12), [#allocation3], 4294961152 }
  0x5a   : > { %3501 = dma.done.wait (%p4384_p2), [#allocation5], 10240   ;;  %p4385_p3 = pmov %p4384_p2 }
  0x5b   : > { %v3515_v0 = vmov 0.0   ;;  %v3516_v1 = vmov 0.0|0.0   ;;  %v489_v2 = vld [vmem:[#allocation2 + $0x8] sm:$0xff]  ;;  %v492_v3 = vld [vmem:[#allocation2 + $0x20] sm:$0xff]  ;;  %v491_v6 = vld [vmem:[#allocation2 + $0x18] sm:$0xff]  ;;  %p475_p5 = scmp.lt.s32.totalorder %s3597_s28, 1 }
  0x5c   : > { %3503 = vsyncadd (%p4385_p3), [#allocation5], 4294957056  ;;  %617 = vmatprep.mubr.f32.mxu0 %v3515_v0  ;;  %3027 = vmatprep.subr.bf16.mxu1 %v3516_v1  ;;  %v488_v4 = vld [vmem:[#allocation2] sm:$0xff]  ;;  %v2995_v5 = vpack.c.bf16 %v492_v3, %v489_v2  ;;  %v495_v7 = vld [vmem:[#allocation2 + $0x38] sm:$0xff]  ;;  %vm3517_vm0 = vmmov 0   ;;  %vm719_vm1 = vcmask 261120  }
  0x5d   : > { %v498_v8 = vld [vmem:[#allocation2 + $0x50] sm:$0xff]  ;;  %v2997_v9 = vpack.c.bf16 %v491_v6, %v488_v4  ;;  %v497_v12 = vld [vmem:[#allocation2 + $0x48] sm:$0xff]  ;;  %v504_v14 = vld [vmem:[#allocation2 + $0x80] sm:$0xff]  ;;  %s4391_s28 = smov (!%p475_p5, %s3597_s28), 1  ;;  %2825 = vmatprep.mubr.msk.f32.mxu1 %vm3517_vm0, %v3515_v0  ;;  %s3518_s20 = smov 64   ;;  %vm824_vm4 = vcmask 195584  }
  0x5e   : > { %v2999_v10 = vpack.c.bf16 %v498_v8, %v495_v7  ;;  %v494_v11 = vld [vmem:[#allocation2 + $0x30] sm:$0xff]  ;;  %v501_v13 = vld [vmem:[#allocation2 + $0x68] sm:$0xff]  ;;  %2996 = vmatprep.subr.bf16.mxu0 %v2995_v5  ;;  %v500_v17 = vld [vmem:[#allocation2 + $0x60] sm:$0xff]  ;;  %s3231_s29 = smul.u32 24, %s4391_s28  ;;  %s3519_s21 = smov 96   ;;  %vm1712_vm5 = vcmask 523264  }
  0x5f   : > { %2998 = vmatpush1.bf16.msra.mxu0 %v2997_v9  ;;  %v3001_v15 = vpack.c.bf16 %v497_v12, %v494_v11  ;;  %v3003_v16 = vpack.c.bf16 %v504_v14, %v501_v13  ;;  %v503_v18 = vld [vmem:[#allocation2 + $0x78] sm:$0xff]  ;;  %v510_v20 = vld [vmem:[#allocation2 + $0xb0] sm:$0xff]  ;;  %v509_v24 = vld [vmem:[#allocation2 + $0xa8] sm:$0xff]  ;;  %s3520_s22 = smov 32   ;;  %vm1716_vm6 = vcmask 785408   ;;  %s4388_s24 = sld [smem:[#allocation10_spill]] }
  0x60   : > { %3000 = vmatprep.subr.bf16.mxu0 %v2999_v10  ;;  %v507_v19 = vld [vmem:[#allocation2 + $0x98] sm:$0xff]  ;;  %v3005_v21 = vpack.c.bf16 %v503_v18, %v500_v17  ;;  %v506_v23 = vld [vmem:[#allocation2 + $0x90] sm:$0xff]  ;;  %v513_v25 = vld [vmem:[#allocation2 + $0xc8] sm:$0xff]  ;;  %s3725_s23 = scalar_lea.vmem %s4357_s0, %s3231_s29 }
  0x61   : > { %v3007_v22 = vpack.c.bf16 %v510_v20, %v507_v19  ;;  %v516_v26 = vld [vmem:[#allocation2 + $0xe0] sm:$0xff]  ;;  %v490_v27 = vld [vmem:[#allocation2 + $0x10] sm:$0xff]  ;;  %v3009_v28 = vpack.c.bf16 %v509_v24, %v506_v23  ;;  %v493_v29 = vld [vmem:[#allocation2 + $0x28] sm:$0xff] }
  0x62   : > { %v496_v30 = vld [vmem:[#allocation2 + $0x40] sm:$0xff]  ;;  %v499_v31 = vld [vmem:[#allocation2 + $0x58] sm:$0xff]  ;;  %v3011_v32 = vpack.c.bf16 %v516_v26, %v513_v25  ;;  %v3028_v35 = vpack.c.bf16 %v493_v29, %v490_v27  ;;  %v522_v37 = vld [vmem:[#allocation2 + $0x110] sm:$0xff] }
  0x63   : > { %3002 = vmatpush1.bf16.msra.mxu0 %v3001_v15  ;;  %v512_v33 = vld [vmem:[#allocation2 + $0xc0] sm:$0xff]  ;;  %v515_v34 = vld [vmem:[#allocation2 + $0xd8] sm:$0xff]  ;;  %v3031_v38 = vpack.c.bf16 %v499_v31, %v496_v30  ;;  %v502_v40 = vld [vmem:[#allocation2 + $0x70] sm:$0xff]  ;;  %v538_v15 = vlaneseq }
  0x64   : > { %3004 = vmatprep.subr.bf16.mxu0 %v3003_v16  ;;  %v519_v36 = vld [vmem:[#allocation2 + $0xf8] sm:$0xff]  ;;  %3029 = vmatpush3.bf16.msra.mxu1 %v3028_v35  ;;  %v3013_v39 = vpack.c.bf16 %v515_v34, %v512_v33  ;;  %v505_v41 = vld [vmem:[#allocation2 + $0x88] sm:$0xff]  ;;  %v518_v43 = vld [vmem:[#allocation2 + $0xf0] sm:$0xff] }
  0x65   : > { %3030 = vmatprep.subr.bf16.mxu1 %v3516_v1  ;;  %v3015_v42 = vpack.c.bf16 %v522_v37, %v519_v36  ;;  %v521_v44 = vld [vmem:[#allocation2 + $0x108] sm:$0xff]  ;;  %v528_v46 = vld [vmem:[#allocation2 + $0x140] sm:$0xff]  ;;  %v3034_v47 = vpack.c.bf16 %v505_v41, %v502_v40  ;;  %v511_v50 = vld [vmem:[#allocation2 + $0xb8] sm:$0xff]  ;;  %v3748_v16 = vshrl.u32 %v538_v15, 7  ;;  %s484_s26 = scalar_lea.vmem %s4388_s24, %s3231_s29 }
  0x66   : > { %v525_v45 = vld [vmem:[#allocation2 + $0x128] sm:$0xff]  ;;  %v3017_v48 = vpack.c.bf16 %v521_v44, %v518_v43  ;;  %v508_v49 = vld [vmem:[#allocation2 + $0xa0] sm:$0xff]  ;;  %v527_v53 = vld [vmem:[#allocation2 + $0x138] sm:$0xff] }
  0x67   : > { %3006 = vmatpush1.bf16.msra.mxu0 %v3005_v21  ;;  %v3019_v51 = vpack.c.bf16 %v528_v46, %v525_v45  ;;  %v524_v52 = vld [vmem:[#allocation2 + $0x120] sm:$0xff]  ;;  %v531_v54 = vld [vmem:[#allocation2 + $0x158] sm:$0xff]  ;;  %v534_v55 = vld [vmem:[#allocation2 + $0x170] sm:$0xff]  ;;  %v3037_v56 = vpack.c.bf16 %v511_v50, %v508_v49  ;;  %v544_v17 = vsub.s32 1, %v3748_v16 }
  0x68   : > { %3008 = vmatprep.subr.bf16.mxu0 %v3007_v22  ;;  %3032 = vmatpush3.bf16.msra.mxu1 %v3031_v38  ;;  %v3021_v57 = vpack.c.bf16 %v527_v53, %v524_v52  ;;  %v514_v58 = vld [vmem:[#allocation2 + $0xd0] sm:$0xff]  ;;  %v517_v59 = vld [vmem:[#allocation2 + $0xe8] sm:$0xff]  ;;  %v3023_v60 = vpack.c.bf16 %v534_v55, %v531_v54  ;;  %v520_v3 = vld [vmem:[#allocation2 + $0x100] sm:$0xff]  ;;  %v540_v22 = vsub.s32 0, %v3748_v16 }
  0x69   : > { %3033 = vmatprep.subr.bf16.mxu1 %v3516_v1  ;;  %v530_v61 = vld [vmem:[#allocation2 + $0x150] sm:$0xff]  ;;  %v533_v62 = vld [vmem:[#allocation2 + $0x168] sm:$0xff]  ;;  %v3040_v63 = vpack.c.bf16 %v517_v59, %v514_v58  ;;  %v523_v4 = vld [vmem:[#allocation2 + $0x118] sm:$0xff] }
  0x6a   : > { %v3025_v2 = vpack.c.bf16 %v533_v62, %v530_v61  ;;  %v3043_v5 = vpack.c.bf16 %v523_v4, %v520_v3  ;;  %v485_v6 = vld [vmem:[%s3725_s23] sm:$0xff]  ;;  %v526_v7 = vld [vmem:[#allocation2 + $0x130] sm:$0xff]  ;;  %v529_v8 = vld [vmem:[#allocation2 + $0x148] sm:$0xff] }
  0x6b   : > { %3010 = vmatpush1.bf16.msra.mxu0 %v3009_v28  ;;  %v3046_v9 = vpack.c.bf16 %v529_v8, %v526_v7  ;;  %v486_v10 = vld [vmem:[%s3725_s23 + $0x8] sm:$0xff]  ;;  %v487_v11 = vld [vmem:[%s3725_s23 + $0x10] sm:$0xff]  ;;  %v532_v12 = vld [vmem:[#allocation2 + $0x160] sm:$0xff] }
  0x6c   : > { %3012 = vmatprep.subr.bf16.mxu0 %v3011_v32  ;;  %3035 = vmatpush3.bf16.msra.mxu1 %v3034_v47  ;;  %v535_v13 = vld [vmem:[#allocation2 + $0x178] sm:$0xff]  ;;  %v3754_v18 = vld [vmem:[%s4359_s2] sm:$0x7]  ;;  %vm3765_vm2 = vmpackc.low %vm719_vm1, %vm719_vm1 }
  0x6d   : > { %3036 = vmatprep.subr.bf16.mxu1 %v3516_v1  ;;  %v3049_v14 = vpack.c.bf16 %v535_v13, %v532_v12  ;;  %v545_v21 = vrot.slane %v3754_v18, %v544_v17  ;;  %v541_v27 = vrot.slane %v3754_v18, %v540_v22  ;;  %v3850_v12 = vand.u32 127, %v538_v15 }
  0x6f   : > { %3014 = vmatpush1.bf16.msra.mxu0 %v3013_v39  ;;  %vm718_vm3 = vcmp.lt.s32.totalorder %v3850_v12, 17 }
  0x70   : > { %3016 = vmatprep.subr.bf16.mxu0 %v3015_v42  ;;  %3038 = vmatpush3.bf16.msra.mxu1 %v3037_v56 }
  0x71   : > { %3039 = vmatprep.subr.bf16.mxu1 %v3516_v1 }
  0x73   : > { %3018 = vmatpush1.bf16.msra.mxu0 %v3017_v48 }
  0x74   : > { %3020 = vmatprep.subr.bf16.mxu0 %v3019_v51  ;;  %3041 = vmatpush3.bf16.msra.mxu1 %v3040_v63 }
  0x75   : > { %3042 = vmatprep.subr.bf16.mxu1 %v3516_v1 }
  0x77   : > { %3022 = vmatpush1.bf16.msra.mxu0 %v3021_v57 }
  0x78   : > { %3024 = vmatprep.subr.bf16.mxu0 %v3023_v60  ;;  %3044 = vmatpush3.bf16.msra.mxu1 %v3043_v5  ;;  %v548_v5 = vsub.s32 2, %v3748_v16 }
  0x79   : > { %3045 = vmatprep.subr.bf16.mxu1 %v3516_v1 }
  0x7b   : > { %3026 = vmatpush1.bf16.msra.mxu0 %v3025_v2 }
  0x7c   : > { %3058 = vmatprep.subr.bf16.mxu0 %v3516_v1  ;;  %3047 = vmatpush3.bf16.msra.mxu1 %v3046_v9 }
  0x7d   : > { %3048 = vmatprep.subr.bf16.mxu1 %v3516_v1 }
  0x7e   : > { %618 = vmatmul.mubr.f32.vlgmr.msra.gmra.mrb[0].mxu0 %v485_v6 }
  0x7f   : > { %623 = vmatprep.mubr.f32.mxu0 %v3515_v0 }
  0x80   : > { %3050 = vmatpush3.bf16.msra.mxu1 %v3049_v14 }
  0x81   : > { %3051 = vmatprep.subr.bf16.mxu1 %v3516_v1 }
  0x82   : > { %624 = vmatmul.mubr.f32.gmra.mrb[2].mxu0 %v486_v10 }
  0x83   : > { %629 = vmatprep.mubr.f32.mxu0 %v3515_v0  ;;  %2826 = vmatmul.mubr.f32.vlgmr.msra.gmra.mrb[0].mxu1 %v485_v6  ;;  %v549_v6 = vrot.slane %v3754_v18, %v548_v5 }
  0x84   : > { %2828 = vmatprep.mubr.msk.f32.mxu1 %vm3517_vm0, %v3515_v0 }
  0x86   : > { %630 = vmatmul.mubr.f32.gmra.mrb[4].mxu0 %v487_v11 }
  0x87   : > { %2870 = vmatprep.mubr.msk.f32.mxu0 %vm3517_vm0, %v3515_v0  ;;  %2829 = vmatmul.mubr.f32.gmra.mrb[2].mxu1 %v486_v10 }
  0x88   : > { %2831 = vmatprep.mubr.msk.f32.mxu1 %vm3517_vm0, %v3515_v0 }
  0x8b   : > { %2832 = vmatmul.mubr.f32.gmra.mrb[4].mxu1 %v487_v11 }
  0x8c   : > { %2840 = vmatprep.mubr.msk.f32.mxu1 %vm3517_vm0, %v3515_v0 }
 0x151   : > { %v619_v19 = vpop.f32.mrb[0].mxu0 }
 0x152   : > { %v621_v20 = vpop.f32.mrb[1].mxu0  ;;  %v620_v34 = vadd.f32 %v619_v19, %v541_v27 }
 0x153   : > { %v622_v25 = vadd.f32 %v621_v20, %v545_v21 }
 0x155   : > { %v625_v23 = vpop.f32.mrb[2].mxu0 }
 0x156   : > { %v627_v24 = vpop.f32.mrb[3].mxu0  ;;  %v626_v36 = vadd.f32 %v625_v23, %v541_v27  ;;  %v702_v37 = vpop.f32.mrb[0].mxu1 }
 0x157   : > { %v628_v26 = vadd.f32 %v627_v24, %v545_v21  ;;  %v2827_v38 = vpop.f32.mrb[1].mxu1  ;;  %v703_v7 = vadd.f32 %v702_v37, %v549_v6 }
 0x159   : > { %v3052_v28 = vpack.c.bf16 %v628_v26, %v622_v25  ;;  %v631_v29 = vpop.f32.mrb[4].mxu0  ;;  %v3286_v30 = vpack.i.bf16 %v628_v26, %v622_v25 }
 0x15a   : > { %v633_v32 = vpop.f32.mrb[5].mxu0  ;;  %v632_v35 = vadd.f32 %v631_v29, %v541_v27  ;;  %v707_v39 = vpop.f32.mrb[2].mxu1 }
 0x15b   : > { %3287 = vrot.lane.b32.xlu1 %v3286_v30, %s3518_s20  ;;  %3282 = vrot.lane.b32.xlu0 %v3286_v30, %s3519_s21  ;;  %v634_v33 = vadd.f32 %v633_v32, %v545_v21  ;;  %v2830_v40 = vpop.f32.mrb[3].mxu1  ;;  %v708_v8 = vadd.f32 %v707_v39, %v549_v6 }
 0x15c   : > { %3054 = vmatpush3.bf16.xpose.msk.msra.mxu1 %vm3765_vm2, %v3052_v28 }
 0x15d   : > { %2838 = vmatprep.subr.mxu1 %v3515_v0  ;;  %v3056_v9 = vpack.c.bf16 %v708_v8, %v703_v7  ;;  %v3844_v10 = vpack.i.bf16 %v708_v8, %v703_v7 }
 0x15e   : > { %v712_v41 = vpop.f32.mrb[4].mxu1 }
 0x15f   : > { %957 = vrot.lane.b32.xlu0 %v634_v33, %s3519_s21  ;;  %947 = vrot.lane.b32.xlu1 %v620_v34, %s3519_s21  ;;  %v2833_v42 = vpop.f32.mrb[5].mxu1  ;;  %v3846_v11 = vadd.f32 %v712_v41, %v549_v6 }
 0x163   : > { %949 = vrot.lane.b32.xlu0 %v626_v36, %s3519_s21  ;;  %951 = vrot.lane.b32.xlu1 %v632_v35, %s3519_s21 }
 0x164   : > { %2839 = vmatpush3.xpose.msk.msra.mxu1 %vm719_vm1, %v634_v33 }
 0x165   : > { %3055 = vmatprep.subr.bf16.mxu1 %v3516_v1 }
 0x167   : > { %2841 = vmatmul.mubr.msk.f32.vlgmr.msra.gmra.mrb[6].mxu1 %vm719_vm1, %v620_v34  ;;  %1201 = vrot.lane.b32.xlu0 %v634_v33, %s3518_s20 }
 0x168   : > { %3292 = vrot.lane.b32.xlu1 %v3286_v30, %s3520_s22  ;;  %2843 = vmatprep.mubr.msk.f32.mxu1 %vm3517_vm0, %v3515_v0 }
 0x169   : > { %3057 = vmatpush3.bf16.msra.mxu1 %v3056_v9 }
 0x16a   : > { %2853 = vmatprep.subr.mxu1 %v3515_v0 }
 0x16b   : > { %2844 = vmatmul.mubr.msk.f32.gmra.mrb[8].mxu1 %vm719_vm1, %v626_v36  ;;  %1191 = vrot.lane.b32.xlu0 %v620_v34, %s3518_s20 }
 0x16c   : > { %1193 = vrot.lane.b32.xlu1 %v626_v36, %s3518_s20  ;;  %2846 = vmatprep.mubr.msk.f32.mxu1 %vm3517_vm0, %v3515_v0 }
 0x16d   : > { %2854 = vmatpush3.msra.mxu1 %v3846_v11 }
 0x16e   : > { %3062 = vmatprep.subr.bf16.mxu1 %v3516_v1 }
 0x16f   : > { %2847 = vmatmul.mubr.msk.f32.gmra.mrb[10].mxu1 %vm719_vm1, %v632_v35  ;;  %1195 = vrot.lane.b32.xlu0 %v632_v35, %s3518_s20 }
 0x170   : > { %1442 = vrot.lane.b32.xlu1 %v634_v33, %s3520_s22  ;;  %2855 = vmatprep.mubr.msk.f32.mxu1 %vm3517_vm0, %v3515_v0 }
 0x173   : > { %1432 = vrot.lane.b32.xlu0 %v620_v34, %s3520_s22 }
 0x174   : > { %1434 = vrot.lane.b32.xlu1 %v626_v36, %s3520_s22 }
 0x177   : > { %1436 = vrot.lane.b32.xlu0 %v632_v35, %s3520_s22 }
 0x1cd   : > { %v3283_v43 = vpop.permute.xlu0 %3282  ;;  %v3288_v46 = vpop.permute.xlu1 %3287 }
 0x1ce   : > { %v3285_v44 = vunpack.i.h.bf16 %v3283_v43  ;;  %v3284_v45 = vunpack.i.l.bf16 %v3283_v43  ;;  %v3290_v50 = vunpack.i.h.bf16 %v3288_v46  ;;  %v3289_v51 = vunpack.i.l.bf16 %v3288_v46 }
 0x1d0   : > { %v3059_v47 = vpack.c.bf16 %v3285_v44, %v3284_v45  ;;  %v3066_v53 = vpack.c.bf16 %v3290_v50, %v3289_v51 }
 0x1d1   : > { %v948_v48 = vpop.permute.xlu1 %947  ;;  %v958_v49 = vpop.permute.xlu0 %957 }
 0x1d2   : > { %3061 = vmatpush3.bf16.xpose.msk.msra.mxu0 %vm3765_vm2, %v3059_v47 }
 0x1d3   : > { %2868 = vmatprep.subr.mxu0 %v3515_v0 }
 0x1d5   : > { %v952_v52 = vpop.permute.xlu1 %951  ;;  %v950_v54 = vpop.permute.xlu0 %949 }
 0x1d9   : > { %v1202_v56 = vpop.permute.xlu0 %1201 }
 0x1da   : > { %2869 = vmatpush3.xpose.msk.msra.mxu0 %vm719_vm1, %v958_v49  ;;  %v3293_v55 = vpop.permute.xlu1 %3292 }
 0x1db   : > { %3065 = vmatprep.subr.bf16.mxu0 %v3516_v1  ;;  %v3295_v57 = vunpack.i.h.bf16 %v3293_v55  ;;  %v3294_v58 = vunpack.i.l.bf16 %v3293_v55 }
 0x1dd   : > { %2871 = vmatmul.mubr.msk.f32.vlgmr.msra.gmra.mrb[6].mxu0 %vm719_vm1, %v948_v48  ;;  %v3073_v59 = vpack.c.bf16 %v3295_v57, %v3294_v58  ;;  %v1192_v60 = vpop.permute.xlu0 %1191 }
 0x1de   : > { %3068 = vmatpush3.bf16.xpose.msk.msra.mxu0 %vm3765_vm2, %v3066_v53  ;;  %2873 = vmatprep.mubr.msk.f32.mxu0 %vm3517_vm0, %v3515_v0  ;;  %v1194_v61 = vpop.permute.xlu1 %1193 }
 0x1df   : > { %2898 = vmatprep.subr.mxu0 %v3515_v0 }
 0x1e1   : > { %2874 = vmatmul.mubr.msk.f32.gmra.mrb[8].mxu0 %vm719_vm1, %v950_v54  ;;  %v1196_v62 = vpop.permute.xlu0 %1195 }
 0x1e2   : > { %2876 = vmatprep.mubr.msk.f32.mxu0 %vm3517_vm0, %v3515_v0  ;;  %v1443_v63 = vpop.permute.xlu1 %1442 }
 0x1e5   : > { %2877 = vmatmul.mubr.msk.f32.gmra.mrb[10].mxu0 %vm719_vm1, %v952_v52  ;;  %v1433_v2 = vpop.permute.xlu0 %1432 }
 0x1e6   : > { %2899 = vmatpush3.xpose.msk.msra.mxu0 %vm719_vm1, %v1202_v56  ;;  %2900 = vmatprep.mubr.msk.f32.mxu0 %vm3517_vm0, %v3515_v0  ;;  %v1435_v3 = vpop.permute.xlu1 %1434 }
 0x1e7   : > { %3072 = vmatprep.subr.bf16.mxu0 %v3516_v1 }
 0x1e9   : > { %2901 = vmatmul.mubr.msk.f32.vlgmr.msra.gmra.mrb[12].mxu0 %vm719_vm1, %v1192_v60  ;;  %v1437_v4 = vpop.permute.xlu0 %1436 }
 0x1ea   : > { %3075 = vmatpush3.bf16.xpose.msk.msra.mxu0 %vm3765_vm2, %v3073_v59  ;;  %2903 = vmatprep.mubr.msk.f32.mxu0 %vm3517_vm0, %v3515_v0 }
 0x1eb   : > { %2928 = vmatprep.subr.mxu0 %v3515_v0 }
 0x1ed   : > { %2904 = vmatmul.mubr.msk.f32.gmra.mrb[14].mxu0 %vm719_vm1, %v1194_v61 }
 0x1ee   : > { %2906 = vmatprep.mubr.msk.f32.mxu0 %vm3517_vm0, %v3515_v0 }
 0x1f1   : > { %2907 = vmatmul.mubr.msk.f32.gmra.mrb[16].mxu0 %vm719_vm1, %v1196_v62 }
 0x1f2   : > { %2929 = vmatpush3.xpose.msk.msra.mxu0 %vm719_vm1, %v1443_v63  ;;  %2930 = vmatprep.mubr.msk.f32.mxu0 %vm3517_vm0, %v3515_v0 }
 0x1f3   : > { %3079 = vmatprep.subr.bf16.mxu0 %v3516_v1 }
 0x1f5   : > { %2931 = vmatmul.mubr.msk.f32.vlgmr.msra.gmra.mrb[18].mxu0 %vm719_vm1, %v1433_v2 }
 0x1f6   : > { %2933 = vmatprep.mubr.msk.f32.mxu0 %vm3517_vm0, %v3515_v0 }
 0x1f9   : > { %2934 = vmatmul.mubr.msk.f32.gmra.mrb[20].mxu0 %vm719_vm1, %v1435_v3 }
 0x1fa   : > { %2936 = vmatprep.mubr.msk.f32.mxu0 %vm3517_vm0, %v3515_v0 }
 0x1fd   : > { %2937 = vmatmul.mubr.msk.f32.gmra.mrb[22].mxu0 %vm719_vm1, %v1437_v4 }
 0x1fe   : > { %2986 = vmatprep.mubr.msk.f32.mxu0 %vm3517_vm0, %v3515_v0 }
 0x23a   : > { %v804_v13 = vpop.f32.mrb[6].mxu1 }
 0x23b   : > { %v818_v14 = vmul.f32 0.17677669, %v804_v13  ;;  %v2842_v18 = vpop.f32.mrb[7].mxu1 }
 0x23d   : > { %v3857_v19 = vsel %vm718_vm3, %v818_v14, -1e+30 }
 0x23e   : > { %v809_v20 = vpop.f32.mrb[8].mxu1  ;;  %v825_v21 = vsel %vm824_vm4, %v3857_v19, -inf }
 0x23f   : > { %v819_v15 = vmul.f32 0.17677669, %v809_v20  ;;  %826 = vmax.xlane.f32.xlu1 %v825_v21  ;;  %v2845_v23 = vpop.f32.mrb[9].mxu1 }
 0x241   : > { %v3863_v24 = vsel %vm718_vm3, %v819_v15, -1e+30 }
 0x242   : > { %v814_v25 = vpop.f32.mrb[10].mxu1  ;;  %v828_v26 = vsel %vm824_vm4, %v3863_v24, -inf }
 0x243   : > { %v820_v27 = vmul.f32 0.17677669, %v814_v25  ;;  %829 = vmax.xlane.f32.xlu0 %v828_v26  ;;  %v2848_v28 = vpop.f32.mrb[11].mxu1 }
 0x245   : > { %v823_v29 = vsel %vm718_vm3, %v820_v27, -1e+30 }
 0x246   : > { %v831_v30 = vsel %vm824_vm4, %v823_v29, -inf }
 0x247   : > { %832 = vmax.xlane.f32.xlu0 %v831_v30 }
 0x2b0   : > { %v1037_v31 = vpop.f32.mrb[6].mxu0 }
 0x2b1   : > { %v1051_v32 = vmul.f32 0.17677669, %v1037_v31  ;;  %v2872_v33 = vpop.f32.mrb[7].mxu0 }
 0x2b3   : > { %v3872_v34 = vsel %vm718_vm3, %v1051_v32, -1e+30 }
 0x2b4   : > { %v1042_v35 = vpop.f32.mrb[8].mxu0  ;;  %v1057_v36 = vsel %vm824_vm4, %v3872_v34, -inf }
 0x2b5   : > { %v1052_v37 = vmul.f32 0.17677669, %v1042_v35  ;;  %v2875_v38 = vpop.f32.mrb[9].mxu0  ;;  %1058 = vmax.xlane.f32.xlu1 %v1057_v36 }
 0x2b7   : > { %v3878_v39 = vsel %vm718_vm3, %v1052_v37, -1e+30 }
 0x2b8   : > { %v1047_v40 = vpop.f32.mrb[10].mxu0  ;;  %v1060_v41 = vsel %vm824_vm4, %v3878_v39, -inf }
 0x2b9   : > { %v1053_v42 = vmul.f32 0.17677669, %v1047_v40  ;;  %v2878_v43 = vpop.f32.mrb[11].mxu0  ;;  %1061 = vmax.xlane.f32.xlu0 %v1060_v41 }
 0x2bb   : > { %v3884_v44 = vsel %vm718_vm3, %v1053_v42, -1e+30 }
 0x2bc   : > { %v1281_v45 = vpop.f32.mrb[12].mxu0  ;;  %v1063_v46 = vsel %vm824_vm4, %v3884_v44, -inf }
 0x2bd   : > { %v1295_v47 = vmul.f32 0.17677669, %v1281_v45  ;;  %v2902_v48 = vpop.f32.mrb[13].mxu0  ;;  %1064 = vmax.xlane.f32.xlu1 %v1063_v46 }
 0x2bf   : > { %v3890_v49 = vsel %vm718_vm3, %v1295_v47, -1e+30 }
 0x2c0   : > { %v1286_v50 = vpop.f32.mrb[14].mxu0  ;;  %v1301_v51 = vsel %vm824_vm4, %v3890_v49, -inf }
 0x2c1   : > { %v1296_v52 = vmul.f32 0.17677669, %v1286_v50  ;;  %v2905_v53 = vpop.f32.mrb[15].mxu0  ;;  %1302 = vmax.xlane.f32.xlu0 %v1301_v51 }
 0x2c3   : > { %v3896_v54 = vsel %vm718_vm3, %v1296_v52, -1e+30 }
 0x2c4   : > { %v1291_v55 = vpop.f32.mrb[16].mxu0  ;;  %v1304_v56 = vsel %vm824_vm4, %v3896_v54, -inf }
 0x2c5   : > { %v1297_v57 = vmul.f32 0.17677669, %v1291_v55  ;;  %v2908_v58 = vpop.f32.mrb[17].mxu0  ;;  %1305 = vmax.xlane.f32.xlu1 %v1304_v56 }
 0x2c7   : > { %v3902_v59 = vsel %vm718_vm3, %v1297_v57, -1e+30 }
 0x2c8   : > { %v1522_v60 = vpop.f32.mrb[18].mxu0  ;;  %v1307_v61 = vsel %vm824_vm4, %v3902_v59, -inf }
 0x2c9   : > { %v1536_v62 = vmul.f32 0.17677669, %v1522_v60  ;;  %v2932_v63 = vpop.f32.mrb[19].mxu0  ;;  %1308 = vmax.xlane.f32.xlu0 %v1307_v61 }
 0x2cb   : > { %v3908_v2 = vsel %vm718_vm3, %v1536_v62, -1e+30 }
 0x2cc   : > { %v1527_v3 = vpop.f32.mrb[20].mxu0  ;;  %v1542_v4 = vsel %vm824_vm4, %v3908_v2, -inf  ;;  %v827_v20 = vpop.xlane.xlu1 %826 }
 0x2cd   : > { %v1537_v6 = vmul.f32 0.17677669, %v1527_v3  ;;  %v2935_v7 = vpop.f32.mrb[21].mxu0  ;;  %1543 = vmax.xlane.f32.xlu1 %v1542_v4  ;;  %v834_v21 = vsub.f32 %v3857_v19, %v827_v20 }
 0x2cf   : > { %v3914_v8 = vsel %vm718_vm3, %v1537_v6, -1e+30  ;;  %v837_v23 = vmul.f32 1.442695, %v834_v21 }
 0x2d0   : > { %v1532_v9 = vpop.f32.mrb[22].mxu0  ;;  %v1545_v13 = vsel %vm824_vm4, %v3914_v8, -inf  ;;  %v830_v18 = vpop.xlane.xlu0 %829 }
 0x2d1   : > { %v2938_v14 = vpop.f32.mrb[23].mxu0  ;;  %1546 = vmax.xlane.f32.xlu0 %v1545_v13  ;;  %3321 = vpow2.f32 %v837_v23  ;;  %v1538_v27 = vmul.f32 0.17677669, %v1532_v9  ;;  %v835_v12 = vsub.f32 %v3863_v24, %v830_v18 }
 0x2d3   : > { %v3925_v28 = vsel %vm718_vm3, %v1538_v27, -1e+30  ;;  %v839_v33 = vmul.f32 1.442695, %v835_v12 }
 0x2d4   : > { %v833_v15 = vpop.xlane.xlu0 %832  ;;  %v1548_v30 = vsel %vm824_vm4, %v3925_v28, -inf }
 0x2d5   : > { %v836_v25 = vsub.f32 %v823_v29, %v833_v15 }
 0x2d7   : > { %v841_v26 = vmul.f32 1.442695, %v836_v25 }
 0x2d9   : > { %3323 = vpow2.f32 %v841_v26 }
 0x2da   : > { %3325 = vpow2.f32 %v839_v33 }
 0x2db   : > { %v3929_v31 = vpop.eup %3321 }
 0x2dc   : > { %v843_v19 = vsel %vm824_vm4, %v3929_v31, 0.0 }
 0x2de   : > { %1097 = vrot.lane.b32.xlu1 %v3846_v11, %s3519_s21 }
 0x2e3   : > { %v3933_v32 = vpop.eup %3323 }
 0x2e4   : > { %v849_v29 = vsel %vm824_vm4, %v3933_v32, 0.0  ;;  %v3940_v35 = vpop.eup %3325 }
 0x2e5   : > { %v846_v36 = vsel %vm824_vm4, %v3940_v35, 0.0 }
 0x2e7   : > { %3297 = vrot.lane.b32.xlu0 %v3844_v10, %s3519_s21 }
 0x302   : > { %1549 = vmax.xlane.f32.xlu1 %v1548_v30 }
 0x306   : > { %844 = vadd.xlane.f32.xlu0 %v843_v19 }
 0x30a   : > { %850 = vadd.xlane.f32.xlu0 %v849_v29 }
 0x313   : > { %3302 = vrot.lane.b32.xlu1 %v3844_v10, %s3518_s20 }
 0x337   : > { %847 = vadd.xlane.f32.xlu1 %v846_v36 }
 0x342   : > { %v1059_v37 = vpop.xlane.xlu1 %1058 }
 0x343   : > { %v1066_v38 = vsub.f32 %v3872_v34, %v1059_v37 }
 0x345   : > { %v1069_v40 = vmul.f32 1.442695, %v1066_v38 }
 0x346   : > { %v1062_v41 = vpop.xlane.xlu0 %1061 }
 0x347   : > { %3327 = vpow2.f32 %v1069_v40  ;;  %v1067_v42 = vsub.f32 %v3878_v39, %v1062_v41 }
 0x349   : > { %v1071_v43 = vmul.f32 1.442695, %v1067_v42 }
 0x34a   : > { %v1065_v45 = vpop.xlane.xlu1 %1064 }
 0x34b   : > { %3329 = vpow2.f32 %v1071_v43  ;;  %v1068_v24 = vsub.f32 %v3884_v44, %v1065_v45 }
 0x34d   : > { %v1073_v46 = vmul.f32 1.442695, %v1068_v24 }
 0x34e   : > { %v1303_v47 = vpop.xlane.xlu0 %1302 }
 0x34f   : > { %3331 = vpow2.f32 %v1073_v46  ;;  %v1310_v48 = vsub.f32 %v3890_v49, %v1303_v47 }
 0x351   : > { %v3948_v50 = vpop.eup %3327  ;;  %v1313_v51 = vmul.f32 1.442695, %v1310_v48 }
 0x352   : > { %v1306_v52 = vpop.xlane.xlu1 %1305  ;;  %v1075_v34 = vsel %vm824_vm4, %v3948_v50, 0.0 }
 0x353   : > { %3333 = vpow2.f32 %v1313_v51  ;;  %v1311_v39 = vsub.f32 %v3896_v54, %v1306_v52  ;;  %1076 = vadd.xlane.f32.xlu1 %v1075_v34 }
 0x355   : > { %v3953_v53 = vpop.eup %3329  ;;  %v1315_v55 = vmul.f32 1.442695, %v1311_v39 }
 0x356   : > { %v1309_v44 = vpop.xlane.xlu0 %1308  ;;  %v1078_v56 = vsel %vm824_vm4, %v3953_v53, 0.0 }
 0x357   : > { %3335 = vpow2.f32 %v1315_v55  ;;  %v1312_v49 = vsub.f32 %v3902_v59, %v1309_v44  ;;  %1079 = vadd.xlane.f32.xlu0 %v1078_v56 }
 0x359   : > { %v3958_v57 = vpop.eup %3331  ;;  %v1317_v58 = vmul.f32 1.442695, %v1312_v49 }
 0x35a   : > { %v1544_v60 = vpop.xlane.xlu1 %1543  ;;  %v1081_v61 = vsel %vm824_vm4, %v3958_v57, 0.0 }
 0x35b   : > { %3337 = vpow2.f32 %v1317_v58  ;;  %v1551_v54 = vsub.f32 %v3908_v2, %v1544_v60  ;;  %1082 = vadd.xlane.f32.xlu1 %v1081_v61 }
 0x35d   : > { %v3963_v62 = vpop.eup %3333  ;;  %v1554_v63 = vmul.f32 1.442695, %v1551_v54 }
 0x35e   : > { %v1319_v3 = vsel %vm824_vm4, %v3963_v62, 0.0  ;;  %v1547_v13 = vpop.xlane.xlu0 %1546  ;;  %v1098_v20 = vpop.permute.xlu1 %1097 }
 0x35f   : > { %3339 = vpow2.f32 %v1554_v63  ;;  %1320 = vadd.xlane.f32.xlu0 %v1319_v3  ;;  %v1552_v14 = vsub.f32 %v3914_v8, %v1547_v13 }
 0x361   : > { %v3967_v59 = vpop.eup %3335  ;;  %v1556_v18 = vmul.f32 1.442695, %v1552_v14 }
 0x362   : > { %v1322_v4 = vsel %vm824_vm4, %v3967_v59, 0.0  ;;  %v3298_v21 = vpop.permute.xlu0 %3297 }
 0x363   : > { %1323 = vadd.xlane.f32.xlu1 %v1322_v4  ;;  %3341 = vpow2.f32 %v1556_v18  ;;  %v3300_v19 = vunpack.i.h.bf16 %v3298_v21  ;;  %v3299_v29 = vunpack.i.l.bf16 %v3298_v21 }
 0x365   : > { %v3971_v6 = vpop.eup %3337 }
 0x366   : > { %v1325_v2 = vsel %vm824_vm4, %v3971_v6, 0.0 }
 0x367   : > { %1326 = vadd.xlane.f32.xlu1 %v1325_v2 }
 0x369   : > { %v3975_v7 = vpop.eup %3339 }
 0x36a   : > { %v1560_v9 = vsel %vm824_vm4, %v3975_v7, 0.0 }
 0x36b   : > { %1561 = vadd.xlane.f32.xlu1 %v1560_v9 }
 0x36d   : > { %v3982_v23 = vpop.eup %3341 }
 0x36e   : > { %v1563_v30 = vsel %vm824_vm4, %v3982_v23, 0.0 }
 0x375   : > { %1338 = vrot.lane.b32.xlu0 %v3846_v11, %s3518_s20 }
 0x38f   : > { %v1550_v15 = vpop.xlane.xlu1 %1549 }
 0x390   : > { %v1553_v25 = vsub.f32 %v3925_v28, %v1550_v15  ;;  %v3063_v28 = vpack.c.bf16 %v3300_v19, %v3299_v29 }
 0x392   : > { %v1558_v26 = vmul.f32 1.442695, %v1553_v25 }
 0x393   : > { %v845_v27 = vpop.xlane.xlu0 %844 }
 0x394   : > { %3343 = vpow2.f32 %v1558_v26  ;;  %1564 = vadd.xlane.f32.xlu0 %v1563_v30 }
 0x395   : > { %3345 = vrcp.f32 %v845_v27 }
 0x397   : > { %v851_v37 = vpop.xlane.xlu0 %850 }
 0x39e   : > { %v3987_v8 = vpop.eup %3343 }
 0x39f   : > { %v3346_v12 = vpop.eup %3345  ;;  %v1566_v33 = vsel %vm824_vm4, %v3987_v8, 0.0 }
 0x3a0   : > { %v855_v36 = vmul.f32 %v3346_v12, %v3929_v31  ;;  %1567 = vadd.xlane.f32.xlu1 %v1566_v33  ;;  %v3303_v31 = vpop.permute.xlu1 %3302  ;;  %v1720_v33 = vld [vmem:[#allocation4] sm:$0xff] }
 0x3a1   : > { %v3305_v24 = vunpack.i.h.bf16 %v3303_v31 }
 0x3a2   : > { %2856 = vmatmul.mubr.msk.f32.vlgmr.msra.gmra.mrb[12].mxu1 %vm824_vm4, %v855_v36  ;;  %v1722_v36 = vld [vmem:[#allocation4 + $0x10] sm:$0xff] }
 0x3a3   : > { %3064 = vmatpush3.bf16.msra.mxu1 %v3063_v28  ;;  %2858 = vmatprep.mubr.msk.f32.mxu1 %vm3517_vm0, %v3515_v0 }
 0x3a4   : > { %2883 = vmatprep.subr.mxu1 %v3515_v0 }
 0x3a7   : > { %2884 = vmatpush3.msra.mxu1 %v1098_v20 }
 0x3a8   : > { %3069 = vmatprep.subr.bf16.mxu1 %v3516_v1 }
 0x3aa   : > { %1579 = vrot.lane.b32.xlu0 %v3846_v11, %s3520_s22 }
 0x3b1   : > { %3307 = vrot.lane.b32.xlu1 %v3844_v10, %s3520_s22 }
 0x3c4   : > { %v848_v38 = vpop.xlane.xlu1 %847 }
 0x3c5   : > { %3347 = vrcp.f32 %v848_v38 }
 0x3c6   : > { %3349 = vrcp.f32 %v851_v37 }
 0x3cf   : > { %v3348_v40 = vpop.eup %3347 }
 0x3d0   : > { %v856_v41 = vmul.f32 %v3348_v40, %v3940_v35  ;;  %v3350_v42 = vpop.eup %3349  ;;  %v3304_v35 = vunpack.i.l.bf16 %v3303_v31  ;;  %v1723_v31 = vld [vmem:[#allocation4 + $0x18] sm:$0xff] }
 0x3d1   : > { %v857_v43 = vmul.f32 %v3350_v42, %v3933_v32  ;;  %v3083_v40 = vpack.c.bf16 %v1723_v31, %v1722_v36  ;;  %v1725_v42 = vld [vmem:[#allocation4 + $0x28] sm:$0xff] }
 0x3d2   : > { %2859 = vmatmul.mubr.msk.f32.gmra.mrb[14].mxu1 %vm824_vm4, %v856_v41  ;;  %v3070_v51 = vpack.c.bf16 %v3305_v24, %v3304_v35  ;;  %v1724_v41 = vld [vmem:[#allocation4 + $0x20] sm:$0xff]  ;;  %v1727_v24 = vld [vmem:[#allocation4 + $0x38] sm:$0xff] }
 0x3d3   : > { %2861 = vmatprep.mubr.msk.f32.mxu1 %vm3517_vm0, %v3515_v0 }
 0x3d6   : > { %2862 = vmatmul.mubr.msk.f32.gmra.mrb[16].mxu1 %vm824_vm4, %v857_v43 }
 0x3d7   : > { %2885 = vmatprep.mubr.msk.f32.mxu1 %vm3517_vm0, %v3515_v0 }
 0x3e0   : > { %v1077_v10 = vpop.xlane.xlu1 %1076 }
 0x3e1   : > { %3351 = vrcp.f32 %v1077_v10 }
 0x3e4   : > { %v1080_v11 = vpop.xlane.xlu0 %1079 }
 0x3e5   : > { %3353 = vrcp.f32 %v1080_v11  ;;  %v3086_v11 = vpack.c.bf16 %v1725_v42, %v1724_v41  ;;  %v3406_v42 = vld [vmem:[%s3725_s23 + $0x8] sm:$0xff] }
 0x3e8   : > { %v1083_v45 = vpop.xlane.xlu1 %1082 }
 0x3e9   : > { %3355 = vrcp.f32 %v1083_v45  ;;  %v1726_v45 = vld [vmem:[#allocation4 + $0x30] sm:$0xff] }
 0x3eb   : > { %v3352_v46 = vpop.eup %3351 }
 0x3ec   : > { %v1087_v47 = vmul.f32 %v3352_v46, %v3948_v50  ;;  %v1321_v48 = vpop.xlane.xlu0 %1320 }
 0x3ed   : > { %3357 = vrcp.f32 %v1321_v48  ;;  %v3089_v48 = vpack.c.bf16 %v1727_v24, %v1726_v45  ;;  %v3407_v24 = vld [vmem:[%s3725_s23 + $0x10] sm:$0xff] }
 0x3ee   : > { %2886 = vmatmul.mubr.msk.f32.vlgmr.msra.gmra.mrb[18].mxu1 %vm824_vm4, %v1087_v47 }
 0x3ef   : > { %v3354_v32 = vpop.eup %3353  ;;  %3071 = vmatpush3.bf16.msra.mxu1 %v3070_v51  ;;  %2888 = vmatprep.mubr.msk.f32.mxu1 %vm3517_vm0, %v3515_v0  ;;  %v1728_v51 = vld [vmem:[#allocation4 + $0x40] sm:$0xff] }
 0x3f0   : > { %v1324_v52 = vpop.xlane.xlu1 %1323  ;;  %v1339_v34 = vpop.permute.xlu0 %1338  ;;  %2913 = vmatprep.subr.mxu1 %v3515_v0  ;;  %v1088_v39 = vmul.f32 %v3354_v32, %v3953_v53  ;;  %v1729_v32 = vld [vmem:[#allocation4 + $0x48] sm:$0xff] }
 0x3f1   : > { %3359 = vrcp.f32 %v1324_v52 }
 0x3f2   : > { %2889 = vmatmul.mubr.msk.f32.gmra.mrb[20].mxu1 %vm824_vm4, %v1088_v39  ;;  %v3092_v39 = vpack.c.bf16 %v1729_v32, %v1728_v51  ;;  %v1887_v32 = vld [vmem:[%s4364_s7 + $0x38] sm:$0xff] }
 0x3f3   : > { %v3356_v50 = vpop.eup %3355  ;;  %2914 = vmatpush3.msra.mxu1 %v1339_v34  ;;  %2891 = vmatprep.mubr.msk.f32.mxu1 %vm3517_vm0, %v3515_v0 }
 0x3f4   : > { %v1327_v55 = vpop.xlane.xlu1 %1326  ;;  %v1089_v44 = vmul.f32 %v3356_v50, %v3958_v57  ;;  %3076 = vmatprep.subr.bf16.mxu1 %v3516_v1  ;;  %v1730_v50 = vld [vmem:[#allocation4 + $0x50] sm:$0xff] }
 0x3f5   : > { %3361 = vrcp.f32 %v1327_v55  ;;  %v1731_v55 = vld [vmem:[#allocation4 + $0x58] sm:$0xff] }
 0x3f6   : > { %2892 = vmatmul.mubr.msk.f32.gmra.mrb[22].mxu1 %vm824_vm4, %v1089_v44  ;;  %v3095_v44 = vpack.c.bf16 %v1731_v55, %v1730_v50  ;;  %v1882_v55 = vld [vmem:[%s4364_s7 + $0x10] sm:$0xff] }
 0x3f7   : > { %v3358_v56 = vpop.eup %3357  ;;  %2915 = vmatprep.mubr.msk.f32.mxu1 %vm3517_vm0, %v3515_v0 }
 0x3f8   : > { %v1331_v53 = vmul.f32 %v3358_v56, %v3963_v62  ;;  %v1562_v61 = vpop.xlane.xlu1 %1561  ;;  %v1732_v56 = vld [vmem:[#allocation4 + $0x60] sm:$0xff] }
 0x3f9   : > { %3363 = vrcp.f32 %v1562_v61 }
 0x3fa   : > { %2916 = vmatmul.mubr.msk.f32.vlgmr.msra.gmra.mrb[24].mxu1 %vm824_vm4, %v1331_v53  ;;  %v1733_v53 = vld [vmem:[#allocation4 + $0x68] sm:$0xff] }
 0x3fb   : > { %v3360_v49 = vpop.eup %3359  ;;  %2918 = vmatprep.mubr.msk.f32.mxu1 %vm3517_vm0, %v3515_v0 }
 0x3fc   : > { %v1332_v58 = vmul.f32 %v3360_v49, %v3967_v59  ;;  %v3098_v49 = vpack.c.bf16 %v1733_v53, %v1732_v56  ;;  %v1889_v56 = vld [vmem:[%s4364_s7 + $0x48] sm:$0xff] }
 0x3fe   : > { %2919 = vmatmul.mubr.msk.f32.gmra.mrb[26].mxu1 %vm824_vm4, %v1332_v58  ;;  %v1734_v58 = vld [vmem:[#allocation4 + $0x70] sm:$0xff] }
 0x3ff   : > { %v3362_v57 = vpop.eup %3361  ;;  %2921 = vmatprep.mubr.msk.f32.mxu1 %vm3517_vm0, %v3515_v0 }
 0x400   : > { %v1333_v60 = vmul.f32 %v3362_v57, %v3971_v6  ;;  %v1735_v57 = vld [vmem:[#allocation4 + $0x78] sm:$0xff] }
 0x402   : > { %2922 = vmatmul.mubr.msk.f32.gmra.mrb[28].mxu1 %vm824_vm4, %v1333_v60  ;;  %v3101_v60 = vpack.c.bf16 %v1735_v57, %v1734_v58  ;;  %v1891_v58 = vld [vmem:[%s4364_s7 + $0x58] sm:$0xff] }
 0x403   : > { %2945 = vmatprep.mubr.msk.f32.mxu1 %vm3517_vm0, %v3515_v0  ;;  %v3364_v2 = vpop.eup %3363  ;;  %v1895_v57 = vld [vmem:[%s4364_s7 + $0x78] sm:$0xff] }
 0x404   : > { %v1572_v6 = vmul.f32 %v3364_v2, %v3975_v7 }
 0x421   : > { %v1565_v54 = vpop.xlane.xlu0 %1564 }
 0x422   : > { %3365 = vrcp.f32 %v1565_v54 }
 0x425   : > { %v1580_v9 = vpop.permute.xlu0 %1579 }
 0x42c   : > { %v3366_v13 = vpop.eup %3365 }
 0x42d   : > { %v1568_v62 = vpop.xlane.xlu1 %1567  ;;  %v1573_v14 = vmul.f32 %v3366_v13, %v3982_v23 }
 0x42e   : > { %3367 = vrcp.f32 %v1568_v62 }
 0x431   : > { %v3308_v63 = vpop.permute.xlu1 %3307 }
 0x432   : > { %v3310_v3 = vunpack.i.h.bf16 %v3308_v63  ;;  %v3309_v59 = vunpack.i.l.bf16 %v3308_v63 }
 0x434   : > { %v3077_v4 = vpack.c.bf16 %v3310_v3, %v3309_v59 }
 0x436   : > { %3078 = vmatpush3.bf16.msra.mxu1 %v3077_v4 }
 0x437   : > { %2943 = vmatprep.subr.mxu1 %v3515_v0 }
 0x438   : > { %v3368_v18 = vpop.eup %3367 }
 0x439   : > { %v1574_v20 = vmul.f32 %v3368_v18, %v3987_v8  ;;  %v1721_v8 = vld [vmem:[#allocation4 + $0x8] sm:$0xff] }
 0x43a   : > { %2944 = vmatpush3.msra.mxu1 %v1580_v9  ;;  %v3080_v28 = vpack.c.bf16 %v1721_v8, %v1720_v33  ;;  %v2617_v8 = vld [vmem:[%s4361_s4] ss:$0 sm:$0xff] }
 0x43b   : > { %2946 = vmatmul.mubr.msk.f32.vlgmr.msra.gmra.mrb[30].mxu1 %vm824_vm4, %v1572_v6 }
 0x43c   : > { %2948 = vmatprep.mubr.msk.f32.mxu1 %vm3517_vm0, %v3515_v0  ;;  %3081 = vmatpush3.bf16.msra.mxu0 %v3080_v28 }
 0x43d   : > { %3082 = vmatprep.subr.bf16.mxu0 %v3516_v1 }
 0x43f   : > { %2949 = vmatmul.mubr.msk.f32.gmra.mrb[32].mxu1 %vm824_vm4, %v1573_v14 }
 0x440   : > { %2951 = vmatprep.mubr.msk.f32.mxu1 %vm3517_vm0, %v3515_v0  ;;  %3084 = vmatpush3.bf16.msra.mxu0 %v3083_v40 }
 0x441   : > { %3085 = vmatprep.subr.bf16.mxu0 %v3516_v1 }
 0x443   : > { %2952 = vmatmul.mubr.msk.f32.gmra.mrb[34].mxu1 %vm824_vm4, %v1574_v20 }
 0x444   : > { %2030 = vmatprep.mubr.f32.mxu1 %v3515_v0  ;;  %3087 = vmatpush3.bf16.msra.mxu0 %v3086_v11 }
 0x445   : > { %3088 = vmatprep.subr.bf16.mxu0 %v3516_v1 }
 0x448   : > { %3090 = vmatpush3.bf16.msra.mxu0 %v3089_v48  ;;  %v1883_v48 = vld [vmem:[%s4364_s7 + $0x18] sm:$0xff] }
 0x449   : > { %3091 = vmatprep.subr.bf16.mxu0 %v3516_v1 }
 0x44c   : > { %3093 = vmatpush3.bf16.msra.mxu0 %v3092_v39  ;;  %v3135_v39 = vpack.c.bf16 %v1887_v32, %v1883_v48  ;;  %v1917_v48 = vld [vmem:[%s4364_s7 + $0x128] sm:$0xff] }
 0x44d   : > { %3094 = vmatprep.subr.bf16.mxu0 %v3516_v1 }
 0x450   : > { %3096 = vmatpush3.bf16.msra.mxu0 %v3095_v44  ;;  %v1886_v44 = vld [vmem:[%s4364_s7 + $0x30] sm:$0xff] }
 0x451   : > { %3097 = vmatprep.subr.bf16.mxu0 %v3516_v1  ;;  %v3137_v53 = vpack.c.bf16 %v1886_v44, %v1882_v55  ;;  %v1914_v44 = vld [vmem:[%s4364_s7 + $0x110] sm:$0xff] }
 0x454   : > { %3099 = vmatpush3.bf16.msra.mxu0 %v3098_v49  ;;  %v1893_v49 = vld [vmem:[%s4364_s7 + $0x68] sm:$0xff] }
 0x455   : > { %3100 = vmatprep.subr.bf16.mxu0 %v3516_v1 }
 0x458   : > { %3102 = vmatpush3.bf16.msra.mxu0 %v3101_v60  ;;  %v3107_v60 = vpack.c.bf16 %v1893_v49, %v1889_v56  ;;  %v1918_v56 = vld [vmem:[%s4364_s7 + $0x130] sm:$0xff]  ;;  %v1921_v49 = vld [vmem:[%s4364_s7 + $0x148] sm:$0xff] }
 0x459   : > { %3136 = vmatprep.subr.bf16.mxu0 %v3135_v39  ;;  %v1916_v39 = vld [vmem:[%s4364_s7 + $0x120] sm:$0xff] }
 0x475   : > { %v4047_v7 = vpop.f32.mrb[12].mxu1 }
 0x476   : > { %v2857_v21 = vpop.f32.mrb[13].mxu1 }
 0x4a5   : > { %v4049_v15 = vpop.f32.mrb[14].mxu1 }
 0x4a6   : > { %v2860_v25 = vpop.f32.mrb[15].mxu1 }
 0x4a9   : > { %v4051_v26 = vpop.f32.mrb[16].mxu1 }
 0x4aa   : > { %v2863_v23 = vpop.f32.mrb[17].mxu1 }
 0x4c1   : > { %v1177_v27 = vpop.f32.mrb[18].mxu1 }
 0x4c2   : > { %v2887_v30 = vpop.f32.mrb[19].mxu1 }
 0x4c5   : > { %v1182_v19 = vpop.f32.mrb[20].mxu1 }
 0x4c6   : > { %v3311_v29 = vpack.i.bf16 %v1182_v19, %v1177_v27  ;;  %v2890_v12 = vpop.f32.mrb[21].mxu1 }
 0x4c8   : > { %3312 = vrot.lane.b32.xlu0 %v3311_v29, %s3520_s22 }
 0x4c9   : > { %v1187_v37 = vpop.f32.mrb[22].mxu1 }
 0x4ca   : > { %v2893_v38 = vpop.f32.mrb[23].mxu1 }
 0x4cd   : > { %v1418_v43 = vpop.f32.mrb[24].mxu1 }
 0x4ce   : > { %v2917_v10 = vpop.f32.mrb[25].mxu1 }
 0x4d1   : > { %v1423_v35 = vpop.f32.mrb[26].mxu1 }
 0x4d2   : > { %v3316_v46 = vpack.i.bf16 %v1423_v35, %v1418_v43  ;;  %v2920_v47 = vpop.f32.mrb[27].mxu1 }
 0x4d3   : > { %v1885_v47 = vld [vmem:[%s4364_s7 + $0x28] sm:$0xff] }
 0x4d4   : > { %3317 = vrot.lane.b32.xlu0 %v3316_v46, %s3518_s20  ;;  %v1881_v46 = vld [vmem:[%s4364_s7 + $0x8] sm:$0xff] }
 0x4d5   : > { %v1428_v52 = vpop.f32.mrb[28].mxu1  ;;  %v3103_v51 = vpack.c.bf16 %v1885_v47, %v1881_v46  ;;  %v1913_v47 = vld [vmem:[%s4364_s7 + $0x108] sm:$0xff] }
 0x4d6   : > { %v2923_v34 = vpop.f32.mrb[29].mxu1  ;;  %v3119_v32 = vpack.c.bf16 %v1917_v48, %v1913_v47 }
 0x4d7   : > { %v1884_v34 = vld [vmem:[%s4364_s7 + $0x20] sm:$0xff]  ;;  %3104 = vmatprep.subr.bf16.mxu1 %v3103_v51  ;;  %v1915_v51 = vld [vmem:[%s4364_s7 + $0x118] sm:$0xff] }
 0x50e   : > { %v1659_v61 = vpop.f32.mrb[30].mxu1 }
 0x50f   : > { %1700 = vrot.lane.b32.xlu1 %v1659_v61, %s3519_s21  ;;  %v2947_v54 = vpop.f32.mrb[31].mxu1  ;;  %v3139_v61 = vpack.c.bf16 %v1895_v57, %v1891_v58  ;;  %v1925_v58 = vld [vmem:[%s4364_s7 + $0x168] sm:$0xff]  ;;  %v1923_v57 = vld [vmem:[%s4364_s7 + $0x158] sm:$0xff] }
 0x510   : > { %v1888_v54 = vld [vmem:[%s4364_s7 + $0x40] sm:$0xff] }
 0x512   : > { %v1664_v62 = vpop.f32.mrb[32].mxu1 }
 0x513   : > { %1680 = vrot.lane.b32.xlu1 %v1187_v37, %s3520_s22  ;;  %1702 = vrot.lane.b32.xlu0 %v1664_v62, %s3519_s21  ;;  %v2950_v63 = vpop.f32.mrb[33].mxu1  ;;  %v3405_v37 = vld [vmem:[%s3725_s23] sm:$0xff] }
 0x514   : > { %v1892_v62 = vld [vmem:[%s4364_s7 + $0x60] sm:$0xff]  ;;  %v1890_v63 = vld [vmem:[%s4364_s7 + $0x50] sm:$0xff] }
 0x516   : > { %v1669_v3 = vpop.f32.mrb[34].mxu1 }
 0x517   : > { %1692 = vrot.lane.b32.xlu0 %v1428_v52, %s3518_s20  ;;  %1704 = vrot.lane.b32.xlu1 %v1669_v3, %s3519_s21  ;;  %v2953_v59 = vpop.f32.mrb[35].mxu1  ;;  %v1880_v52 = vld [vmem:[%s4364_s7] sm:$0xff]  ;;  %v3109_v3 = vpack.c.bf16 %v1892_v62, %v1888_v54 }
 0x518   : > { %v3105_v50 = vpack.c.bf16 %v1884_v34, %v1880_v52  ;;  %v1894_v59 = vld [vmem:[%s4364_s7 + $0x70] sm:$0xff]  ;;  %v1919_v52 = vld [vmem:[%s4364_s7 + $0x138] sm:$0xff]  ;;  %v1912_v34 = vld [vmem:[%s4364_s7 + $0x100] sm:$0xff] }
 0x519   : > { %v3121_v55 = vpack.c.bf16 %v1916_v39, %v1912_v34  ;;  %v1920_v54 = vld [vmem:[%s4364_s7 + $0x140] sm:$0xff] }
 0x51a   : > { %3106 = vmatpush1.bf16.msra.mxu1 %v3105_v50  ;;  %v3151_v50 = vpack.c.bf16 %v1919_v52, %v1915_v51  ;;  %v1924_v62 = vld [vmem:[%s4364_s7 + $0x160] sm:$0xff] }
 0x51b   : > { %3108 = vmatprep.subr.bf16.mxu1 %v3107_v60  ;;  %v3123_v60 = vpack.c.bf16 %v1925_v58, %v1921_v49  ;;  %v2193_v49 = vld [vmem:[#allocation6 + $0x8] sm:$0xff]  ;;  %v2224_v58 = vld [vmem:[#allocation6 + $0x100] sm:$0xff] }
 0x51e   : > { %3110 = vmatpush1.bf16.msra.mxu1 %v3109_v3  ;;  %v3125_v3 = vpack.c.bf16 %v1924_v62, %v1920_v54  ;;  %v2211_v54 = vld [vmem:[#allocation6 + $0x98] sm:$0xff]  ;;  %v2242_v62 = vld [vmem:[#allocation6 + $0x190] sm:$0xff] }
 0x53a   : > { %v3313_v4 = vpop.permute.xlu0 %3312 }
 0x53b   : > { %v3314_v1 = vunpack.i.l.bf16 %v3313_v4  ;;  %v3315_v9 = vunpack.i.h.bf16 %v3313_v4  ;;  %v1897_v4 = vld [vmem:[%s4364_s7 + $0x88] sm:$0xff] }
 0x53d   : > { %v1709_v13 = vsel %vm719_vm1, %v4047_v7, %v3314_v1  ;;  %v1710_v25 = vsel %vm719_vm1, %v4049_v15, %v3315_v9  ;;  %v3141_v1 = vpack.c.bf16 %v1894_v59, %v1890_v63  ;;  %v1899_v9 = vld [vmem:[%s4364_s7 + $0x98] sm:$0xff]  ;;  %v1922_v59 = vld [vmem:[%s4364_s7 + $0x150] sm:$0xff] }
 0x546   : > { %v3318_v2 = vpop.permute.xlu0 %3317 }
 0x547   : > { %v3319_v6 = vunpack.i.l.bf16 %v3318_v2  ;;  %v3320_v14 = vunpack.i.h.bf16 %v3318_v2  ;;  %v1901_v2 = vld [vmem:[%s4364_s7 + $0xa8] sm:$0xff] }
 0x549   : > { %v1713_v18 = vsel %vm1712_vm5, %v1709_v13, %v3319_v6  ;;  %v1714_v30 = vsel %vm1712_vm5, %v1710_v25, %v3320_v14  ;;  %v3111_v6 = vpack.c.bf16 %v1901_v2, %v1897_v4  ;;  %v1903_v13 = vld [vmem:[%s4364_s7 + $0xb8] sm:$0xff]  ;;  %v1896_v14 = vld [vmem:[%s4364_s7 + $0x80] sm:$0xff]  ;;  %v1902_v25 = vld [vmem:[%s4364_s7 + $0xb0] sm:$0xff] }
 0x54a   : > { %v1926_v4 = vld [vmem:[%s4364_s7 + $0x170] sm:$0xff] }
 0x54b   : > { %3112 = vmatprep.subr.bf16.mxu1 %v3111_v6  ;;  %v3157_v2 = vpack.c.bf16 %v1926_v4, %v1922_v59  ;;  %v1933_v6 = vld [vmem:[%s4364_s7 + $0x1a8] sm:$0xff] }
 0x581   : > { %v1701_v20 = vpop.permute.xlu1 %1700 }
 0x582   : > { %v1717_v21 = vsel %vm1716_vm6, %v1713_v18, %v1701_v20  ;;  %v3143_v18 = vpack.c.bf16 %v1903_v13, %v1899_v9  ;;  %v1900_v20 = vld [vmem:[%s4364_s7 + $0xa0] sm:$0xff]  ;;  %v1931_v9 = vld [vmem:[%s4364_s7 + $0x198] sm:$0xff] }
 0x583   : > { %2987 = vmatmul.mubr.f32.vlgmr.msra.gmra.mrb[24].mxu0 %v1717_v21  ;;  %v1898_v21 = vld [vmem:[%s4364_s7 + $0x90] sm:$0xff] }
 0x584   : > { %2989 = vmatprep.mubr.msk.f32.mxu0 %vm3517_vm0, %v3515_v0  ;;  %3138 = vmatpush1.bf16.msra.mxu0 %v3137_v53  ;;  %v3153_v53 = vpack.c.bf16 %v1918_v56, %v1914_v44  ;;  %v2619_v56 = vld [vmem:[%s4363_s6] ss:$0 sm:$0xff] }
 0x585   : > { %v1681_v23 = vpop.permute.xlu1 %1680  ;;  %v1703_v27 = vpop.permute.xlu0 %1702  ;;  %3140 = vmatprep.subr.bf16.mxu0 %v3139_v61  ;;  %v1927_v61 = vld [vmem:[%s4364_s7 + $0x178] sm:$0xff] }
 0x586   : > { %v1718_v7 = vsel %vm1716_vm6, %v1714_v30, %v1703_v27  ;;  %v1711_v19 = vsel %vm719_vm1, %v4051_v26, %v1681_v23  ;;  %v3113_v23 = vpack.c.bf16 %v1900_v20, %v1896_v14  ;;  %v3145_v27 = vpack.c.bf16 %v1902_v25, %v1898_v21  ;;  %v1935_v14 = vld [vmem:[%s4364_s7 + $0x1b8] sm:$0xff]  ;;  %v1932_v20 = vld [vmem:[%s4364_s7 + $0x1a0] sm:$0xff] }
 0x587   : > { %2990 = vmatmul.mubr.f32.gmra.mrb[26].mxu0 %v1718_v7  ;;  %v3155_v63 = vpack.c.bf16 %v1927_v61, %v1923_v57  ;;  %v3159_v21 = vpack.c.bf16 %v1935_v14, %v1931_v9  ;;  %v2225_v57 = vld [vmem:[#allocation6 + $0x108] sm:$0xff]  ;;  %v2226_v14 = vld [vmem:[#allocation6 + $0x110] sm:$0xff] }
 0x588   : > { %2992 = vmatprep.mubr.msk.f32.mxu0 %vm3517_vm0, %v3515_v0  ;;  %3142 = vmatpush1.bf16.msra.mxu0 %v3141_v1  ;;  %v1929_v1 = vld [vmem:[%s4364_s7 + $0x188] sm:$0xff] }
 0x589   : > { %v1693_v29 = vpop.permute.xlu0 %1692  ;;  %v1705_v12 = vpop.permute.xlu1 %1704  ;;  %3144 = vmatprep.subr.bf16.mxu0 %v3143_v18  ;;  %3114 = vmatpush1.bf16.msra.mxu1 %v3113_v23  ;;  %v3127_v13 = vpack.c.bf16 %v1933_v6, %v1929_v1  ;;  %v1928_v18 = vld [vmem:[%s4364_s7 + $0x180] sm:$0xff]  ;;  %v1930_v23 = vld [vmem:[%s4364_s7 + $0x190] sm:$0xff]  ;;  %v2195_v6 = vld [vmem:[#allocation6 + $0x18] sm:$0xff] }
 0x58a   : > { %v1715_v33 = vsel %vm1712_vm5, %v1711_v19, %v1693_v29  ;;  %v3129_v25 = vpack.c.bf16 %v1932_v20, %v1928_v18  ;;  %v2194_v1 = vld [vmem:[#allocation6 + $0x10] sm:$0xff]  ;;  %v2227_v18 = vld [vmem:[#allocation6 + $0x118] sm:$0xff]  ;;  %v2212_v20 = vld [vmem:[#allocation6 + $0xa0] sm:$0xff] }
 0x58b   : > { %v1719_v15 = vsel %vm1716_vm6, %v1715_v33, %v1705_v12 }
 0x58c   : > { %2993 = vmatmul.mubr.f32.gmra.mrb[28].mxu0 %v1719_v15 }
 0x58d   : > { %2113 = vmatprep.mubr.f32.mxu0 %v3515_v0  ;;  %3146 = vmatpush1.bf16.msra.mxu0 %v3145_v27  ;;  %v1934_v27 = vld [vmem:[%s4364_s7 + $0x1b0] sm:$0xff] }
 0x656   : > { %v1809_v36 = vpop.f32.mrb[24].mxu0 }
 0x657   : > { %v1810_v28 = vadd.f32 %v2617_v8, %v1809_v36  ;;  %v2988_v31 = vpop.f32.mrb[25].mxu0 }
 0x659   : > { %v4088_v26 = vadd.f32 %v3405_v37, %v1810_v28 }
 0x65a   : > { %v1814_v38 = vpop.f32.mrb[26].mxu0 }
 0x65b   : > { %v1815_v40 = vadd.f32 %v2617_v8, %v1814_v38  ;;  %1828 = vadd.xlane.f32.xlu0 %v4088_v26  ;;  %v2991_v41 = vpop.f32.mrb[27].mxu0  ;;  %v1909_v38 = vld [vmem:[%s4364_s7 + $0xe8] sm:$0xff] }
 0x65d   : > { %v1824_v43 = vadd.f32 %v3406_v42, %v1815_v40  ;;  %v1907_v40 = vld [vmem:[%s4364_s7 + $0xd8] sm:$0xff] }
 0x65e   : > { %v1911_v42 = vld [vmem:[%s4364_s7 + $0xf8] sm:$0xff] }
 0x65f   : > { %1830 = vadd.xlane.f32.xlu1 %v1824_v43  ;;  %v1819_v10 = vpop.f32.mrb[28].mxu0 }
 0x660   : > { %v1820_v11 = vadd.f32 %v2617_v8, %v1819_v10  ;;  %v2994_v45 = vpop.f32.mrb[29].mxu0  ;;  %v1908_v10 = vld [vmem:[%s4364_s7 + $0xe0] sm:$0xff] }
 0x662   : > { %v1825_v35 = vadd.f32 %v3407_v24, %v1820_v11  ;;  %v3147_v11 = vpack.c.bf16 %v1911_v42, %v1907_v40  ;;  %v1906_v24 = vld [vmem:[%s4364_s7 + $0xd0] sm:$0xff]  ;;  %v2208_v42 = vld [vmem:[#allocation6 + $0x80] sm:$0xff] }
 0x663   : > { %v1942_v40 = vld [vmem:[%s4364_s7 + $0x1f0] sm:$0xff] }
 0x664   : > { %1832 = vadd.xlane.f32.xlu0 %v1825_v35  ;;  %3148 = vmatprep.subr.bf16.mxu0 %v3147_v11 }
 0x6e8   : > { %v1829_v30 = vpop.xlane.xlu0 %1828 }
 0x6e9   : > { %v1835_v7 = vmul.f32 0.0078125, %v1829_v30  ;;  %v3161_v30 = vpack.c.bf16 %v1934_v27, %v1930_v23  ;;  %v2244_v23 = vld [vmem:[#allocation6 + $0x1a0] sm:$0xff]  ;;  %v2245_v27 = vld [vmem:[#allocation6 + $0x1a8] sm:$0xff] }
 0x6eb   : > { %v4166_v19 = vsub.f32 %v4088_v26, %v1835_v7  ;;  %v1905_v26 = vld [vmem:[%s4364_s7 + $0xc8] sm:$0xff] }
 0x6ec   : > { %v1831_v29 = vpop.xlane.xlu1 %1830  ;;  %v3115_v41 = vpack.c.bf16 %v1909_v38, %v1905_v26  ;;  %v1937_v7 = vld [vmem:[%s4364_s7 + $0x1c8] sm:$0xff]  ;;  %v1938_v38 = vld [vmem:[%s4364_s7 + $0x1d0] sm:$0xff] }
 0x6ed   : > { %v1836_v12 = vmul.f32 0.0078125, %v1831_v29  ;;  %v1841_v33 = vmul.f32 %v4166_v19, %v4166_v19  ;;  %v1941_v29 = vld [vmem:[%s4364_s7 + $0x1e8] sm:$0xff] }
 0x6ee   : > { %3116 = vmatprep.subr.bf16.mxu1 %v3115_v41  ;;  %v3165_v41 = vpack.c.bf16 %v1942_v40, %v1938_v38 }
 0x6ef   : > { %v4170_v15 = vsub.f32 %v1824_v43, %v1836_v12  ;;  %1844 = vadd.xlane.f32.xlu0 %v1841_v33  ;;  %v1904_v43 = vld [vmem:[%s4364_s7 + $0xc0] sm:$0xff]  ;;  %v1939_v12 = vld [vmem:[%s4364_s7 + $0x1d8] sm:$0xff]  ;;  %v3131_v33 = vpack.c.bf16 %v1941_v29, %v1937_v7  ;;  %v3173_v7 = vpack.c.bf16 %v2195_v6, %v2194_v1  ;;  %v3205_v29 = vpack.c.bf16 %v2227_v18, %v2226_v14  ;;  %v2234_v1 = vld [vmem:[#allocation6 + $0x150] sm:$0xff] }
 0x6f0   : > { %v3117_v45 = vpack.c.bf16 %v1908_v10, %v1904_v43  ;;  %v2209_v43 = vld [vmem:[#allocation6 + $0x88] sm:$0xff]  ;;  %v2240_v10 = vld [vmem:[#allocation6 + $0x180] sm:$0xff]  ;;  %v2235_v6 = vld [vmem:[#allocation6 + $0x158] sm:$0xff] }
 0x6f1   : > { %v1833_v8 = vpop.xlane.xlu0 %1832  ;;  %v1842_v36 = vmul.f32 %v4170_v15, %v4170_v15  ;;  %v3167_v11 = vpack.c.bf16 %v2209_v43, %v2208_v42  ;;  %v2214_v42 = vld [vmem:[#allocation6 + $0xb0] sm:$0xff]  ;;  %v2215_v43 = vld [vmem:[#allocation6 + $0xb8] sm:$0xff]  ;;  %v2221_v14 = vld [vmem:[#allocation6 + $0xe8] sm:$0xff] }
 0x6f2   : > { %v1837_v28 = vmul.f32 0.0078125, %v1833_v8  ;;  %3118 = vmatpush1.bf16.msra.mxu1 %v3117_v45  ;;  %v1943_v8 = vld [vmem:[%s4364_s7 + $0x1f8] sm:$0xff]  ;;  %v2241_v45 = vld [vmem:[#allocation6 + $0x188] sm:$0xff]  ;;  %v2252_v18 = vld [vmem:[#allocation6 + $0x1e0] sm:$0xff] }
 0x6f3   : > { %1846 = vadd.xlane.f32.xlu1 %v1842_v36  ;;  %3120 = vmatprep.subr.bf16.mxu1 %v3119_v32  ;;  %v1936_v36 = vld [vmem:[%s4364_s7 + $0x1c0] sm:$0xff] }
 0x6f4   : > { %v4174_v31 = vsub.f32 %v1825_v35, %v1837_v28  ;;  %v1910_v35 = vld [vmem:[%s4364_s7 + $0xf0] sm:$0xff]  ;;  %v1940_v28 = vld [vmem:[%s4364_s7 + $0x1e0] sm:$0xff] }
 0x6f5   : > { %v3149_v46 = vpack.c.bf16 %v1910_v35, %v1906_v24  ;;  %v3133_v26 = vpack.c.bf16 %v1940_v28, %v1936_v36  ;;  %v3199_v24 = vpack.c.bf16 %v2241_v45, %v2240_v10  ;;  %v3207_v36 = vpack.c.bf16 %v2245_v27, %v2244_v23  ;;  %v2197_v28 = vld [vmem:[#allocation6 + $0x28] sm:$0xff]  ;;  %v2246_v10 = vld [vmem:[#allocation6 + $0x1b0] sm:$0xff] }
 0x6f6   : > { %v1843_v37 = vmul.f32 %v4174_v31, %v4174_v31  ;;  %3122 = vmatpush1.bf16.msra.mxu1 %v3121_v55  ;;  %v2618_v55 = vld [vmem:[%s4362_s5] ss:$0 sm:$0xff]  ;;  %v2198_v45 = vld [vmem:[#allocation6 + $0x30] sm:$0xff]  ;;  %v2205_v23 = vld [vmem:[#allocation6 + $0x68] sm:$0xff] }
 0x6f7   : > { %3150 = vmatpush1.bf16.msra.mxu0 %v3149_v46  ;;  %3124 = vmatprep.subr.bf16.mxu1 %v3123_v60  ;;  %v2210_v60 = vld [vmem:[#allocation6 + $0x90] sm:$0xff] }
 0x6f8   : > { %1848 = vadd.xlane.f32.xlu0 %v1843_v37  ;;  %3152 = vmatprep.subr.bf16.mxu0 %v3151_v50  ;;  %v3163_v37 = vpack.c.bf16 %v1943_v8, %v1939_v12  ;;  %v3171_v9 = vpack.c.bf16 %v2211_v54, %v2210_v60  ;;  %v2196_v12 = vld [vmem:[#allocation6 + $0x20] sm:$0xff]  ;;  %v2218_v60 = vld [vmem:[#allocation6 + $0xd0] sm:$0xff] }
 0x6f9   : > { %v3177_v40 = vpack.c.bf16 %v2197_v28, %v2196_v12  ;;  %v2250_v54 = vld [vmem:[#allocation6 + $0x1d0] sm:$0xff] }
 0x6fa   : > { %3126 = vmatpush1.bf16.msra.mxu1 %v3125_v3 }
 0x6fb   : > { %3154 = vmatpush1.bf16.msra.mxu0 %v3153_v53  ;;  %3128 = vmatprep.subr.bf16.mxu1 %v3127_v13  ;;  %v2192_v53 = vld [vmem:[#allocation6] sm:$0xff] }
 0x6fc   : > { %3156 = vmatprep.subr.bf16.mxu0 %v3155_v63  ;;  %v2243_v63 = vld [vmem:[#allocation6 + $0x198] sm:$0xff] }
 0x6fd   : > { %v3203_v13 = vpack.c.bf16 %v2243_v63, %v2242_v62  ;;  %v2251_v63 = vld [vmem:[#allocation6 + $0x1d8] sm:$0xff] }
 0x6fe   : > { %3130 = vmatpush1.bf16.msra.mxu1 %v3129_v25  ;;  %v2213_v25 = vld [vmem:[#allocation6 + $0xa8] sm:$0xff] }
 0x6ff   : > { %3158 = vmatpush1.bf16.msra.mxu0 %v3157_v2  ;;  %3132 = vmatprep.subr.bf16.mxu1 %v3131_v33  ;;  %v3169_v2 = vpack.c.bf16 %v2193_v49, %v2192_v53  ;;  %v3175_v8 = vpack.c.bf16 %v2213_v25, %v2212_v20  ;;  %v2232_v49 = vld [vmem:[#allocation6 + $0x140] sm:$0xff] }
 0x700   : > { %3160 = vmatprep.subr.bf16.mxu0 %v3159_v21  ;;  %v2204_v25 = vld [vmem:[#allocation6 + $0x60] sm:$0xff] }
 0x702   : > { %3134 = vmatpush1.bf16.msra.mxu1 %v3133_v26  ;;  %v2229_v26 = vld [vmem:[#allocation6 + $0x128] sm:$0xff] }
 0x703   : > { %3162 = vmatpush1.bf16.msra.mxu0 %v3161_v30  ;;  %3168 = vmatprep.subr.bf16.mxu1 %v3167_v11  ;;  %v3179_v11 = vpack.c.bf16 %v2215_v43, %v2214_v42  ;;  %v2238_v42 = vld [vmem:[#allocation6 + $0x170] sm:$0xff]  ;;  %v2239_v43 = vld [vmem:[#allocation6 + $0x178] sm:$0xff] }
 0x704   : > { %3164 = vmatprep.subr.bf16.mxu0 %v3163_v37  ;;  %v2228_v37 = vld [vmem:[#allocation6 + $0x120] sm:$0xff] }
 0x707   : > { %3166 = vmatpush1.bf16.msra.mxu0 %v3165_v41 }
 0x708   : > { %3200 = vmatprep.subr.bf16.mxu0 %v3199_v24  ;;  %v2199_v24 = vld [vmem:[#allocation6 + $0x38] sm:$0xff] }
 0x77c   : > { %v1845_v35 = vpop.xlane.xlu0 %1844 }
 0x77d   : > { %v1850_v46 = vmul.f32 0.0078125, %v1845_v35 }
 0x77f   : > { %v1853_v47 = vadd.f32 1e-05, %v1850_v46  ;;  %v3181_v46 = vpack.c.bf16 %v2199_v24, %v2198_v45 }
 0x780   : > { %v1847_v48 = vpop.xlane.xlu1 %1846 }
 0x781   : > { %3369 = vrsqrt.f32 %v1853_v47  ;;  %v1851_v51 = vmul.f32 0.0078125, %v1847_v48  ;;  %v2230_v47 = vld [vmem:[#allocation6 + $0x130] sm:$0xff]  ;;  %v2231_v48 = vld [vmem:[#allocation6 + $0x138] sm:$0xff] }
 0x783   : > { %v1854_v32 = vadd.f32 1e-05, %v1851_v51  ;;  %v3213_v51 = vpack.c.bf16 %v2231_v48, %v2230_v47 }
 0x785   : > { %3371 = vrsqrt.f32 %v1854_v32  ;;  %v1849_v52 = vpop.xlane.xlu0 %1848  ;;  %v2216_v32 = vld [vmem:[#allocation6 + $0xc0] sm:$0xff] }
 0x786   : > { %v1852_v34 = vmul.f32 0.0078125, %v1849_v52  ;;  %v2217_v52 = vld [vmem:[#allocation6 + $0xc8] sm:$0xff] }
 0x788   : > { %v1855_v39 = vadd.f32 1e-05, %v1852_v34  ;;  %v2248_v34 = vld [vmem:[#allocation6 + $0x1c0] sm:$0xff] }
 0x78a   : > { %3373 = vrsqrt.f32 %v1855_v39  ;;  %v3183_v39 = vpack.c.bf16 %v2217_v52, %v2216_v32 }
 0x78b   : > { %v3370_v50 = vpop.eup %3369 }
 0x78c   : > { %v1859_v44 = vmul.f32 %v3370_v50, %v4166_v19  ;;  %v3201_v19 = vpack.c.bf16 %v2225_v57, %v2224_v58  ;;  %v2249_v50 = vld [vmem:[#allocation6 + $0x1c8] sm:$0xff] }
 0x78d   : > { %v2233_v58 = vld [vmem:[#allocation6 + $0x148] sm:$0xff] }
 0x78e   : > { %v1868_v61 = vmul.f32 %v2618_v55, %v1859_v44  ;;  %v2201_v44 = vld [vmem:[#allocation6 + $0x48] sm:$0xff]  ;;  %v3217_v57 = vpack.c.bf16 %v2233_v58, %v2232_v49 }
 0x78f   : > { %v3372_v3 = vpop.eup %3371 }
 0x790   : > { %v4305_v59 = vadd.f32 %v2619_v56, %v1868_v61  ;;  %v1860_v4 = vmul.f32 %v3372_v3, %v4170_v15  ;;  %v2219_v61 = vld [vmem:[#allocation6 + $0xd8] sm:$0xff]  ;;  %v2202_v3 = vld [vmem:[#allocation6 + $0x50] sm:$0xff] }
 0x791   : > { %v3187_v62 = vpack.c.bf16 %v2219_v61, %v2218_v60 }
 0x792   : > { %2031 = vmatmul.mubr.f32.vlgmr.msra.gmra.mrb[36].mxu1 %v4305_v59  ;;  %2114 = vmatmul.mubr.f32.vlgmr.msra.gmra.mrb[30].mxu0 %v4305_v59  ;;  %v1869_v21 = vmul.f32 %v2618_v55, %v1860_v4  ;;  %v2203_v4 = vld [vmem:[#allocation6 + $0x58] sm:$0xff] }
 0x793   : > { %2036 = vmatprep.mubr.f32.mxu1 %v3515_v0  ;;  %2119 = vmatprep.mubr.f32.mxu0 %v3515_v0 }
 0x794   : > { %v3374_v15 = vpop.eup %3373  ;;  %v4312_v30 = vadd.f32 %v2619_v56, %v1869_v21  ;;  %3170 = vmatpush3.bf16.msra.mxu1 %v3169_v2  ;;  %3202 = vmatpush3.bf16.msra.mxu0 %v3201_v19  ;;  %v3219_v2 = vpack.c.bf16 %v2251_v63, %v2250_v54  ;;  %v3189_v19 = vpack.c.bf16 %v2203_v4, %v2202_v3  ;;  %v2253_v21 = vld [vmem:[#allocation6 + $0x1e8] sm:$0xff] }
 0x795   : > { %v1861_v33 = vmul.f32 %v3374_v15, %v4174_v31  ;;  %3172 = vmatprep.subr.bf16.mxu1 %v3171_v9  ;;  %3204 = vmatprep.subr.bf16.mxu0 %v3203_v13  ;;  %v3209_v31 = vpack.c.bf16 %v2229_v26, %v2228_v37  ;;  %v3221_v9 = vpack.c.bf16 %v2235_v6, %v2234_v1  ;;  %v2220_v13 = vld [vmem:[#allocation6 + $0xe0] sm:$0xff]  ;;  %v2255_v37 = vld [vmem:[#allocation6 + $0x1f8] sm:$0xff]  ;;  %v2206_v26 = vld [vmem:[#allocation6 + $0x70] sm:$0xff] }
 0x796   : > { %2037 = vmatmul.mubr.f32.gmra.mrb[38].mxu1 %v4312_v30  ;;  %2120 = vmatmul.mubr.f32.gmra.mrb[32].mxu0 %v4312_v30  ;;  %v3191_v20 = vpack.c.bf16 %v2221_v14, %v2220_v13  ;;  %v3223_v27 = vpack.c.bf16 %v2253_v21, %v2252_v18  ;;  %v3193_v15 = vpack.c.bf16 %v2205_v23, %v2204_v25 }
 0x797   : > { %2042 = vmatprep.mubr.f32.mxu1 %v3515_v0  ;;  %2125 = vmatprep.mubr.f32.mxu0 %v3515_v0  ;;  %v1870_v38 = vmul.f32 %v2618_v55, %v1861_v33  ;;  %v2247_v0 = vld [vmem:[#allocation6 + $0x1b8] sm:$0xff]  ;;  %v2200_v55 = vld [vmem:[#allocation6 + $0x40] sm:$0xff]  ;;  %v2222_v33 = vld [vmem:[#allocation6 + $0xf0] sm:$0xff] }
 0x798   : > { %3174 = vmatpush3.bf16.msra.mxu1 %v3173_v7  ;;  %3206 = vmatpush3.bf16.msra.mxu0 %v3205_v29  ;;  %v3211_v35 = vpack.c.bf16 %v2247_v0, %v2246_v10  ;;  %v3185_v53 = vpack.c.bf16 %v2201_v44, %v2200_v55  ;;  %v2236_v7 = vld [vmem:[#allocation6 + $0x160] sm:$0xff]  ;;  %v2237_v29 = vld [vmem:[#allocation6 + $0x168] sm:$0xff]  ;;  %v3229_v10 = vpack.c.bf16 %v2239_v43, %v2238_v42  ;;  %v1960_v0 = vsub.s32 3, %v3748_v16 }
 0x799   : > { %v4319_v41 = vadd.f32 %v2619_v56, %v1870_v38  ;;  %3176 = vmatprep.subr.bf16.mxu1 %v3175_v8  ;;  %3208 = vmatprep.subr.bf16.mxu0 %v3207_v36  ;;  %v3215_v56 = vpack.c.bf16 %v2249_v50, %v2248_v34  ;;  %v3225_v12 = vpack.c.bf16 %v2237_v29, %v2236_v7  ;;  %v2223_v8 = vld [vmem:[#allocation6 + $0xf8] sm:$0xff]  ;;  %v2254_v36 = vld [vmem:[#allocation6 + $0x1f0] sm:$0xff] }
 0x79a   : > { %v3195_v28 = vpack.c.bf16 %v2223_v8, %v2222_v33  ;;  %v2207_v38 = vld [vmem:[#allocation6 + $0x78] sm:$0xff] }
 0x79b   : > { %2043 = vmatmul.mubr.f32.gmra.mrb[40].mxu1 %v4319_v41  ;;  %2126 = vmatmul.mubr.f32.gmra.mrb[34].mxu0 %v4319_v41 }
 0x79c   : > { %3178 = vmatpush3.bf16.msra.mxu1 %v3177_v40  ;;  %3210 = vmatpush3.bf16.msra.mxu0 %v3209_v31  ;;  %v3227_v40 = vpack.c.bf16 %v2255_v37, %v2254_v36  ;;  %v3197_v31 = vpack.c.bf16 %v2207_v38, %v2206_v26 }
 0x79d   : > { %3180 = vmatprep.subr.bf16.mxu1 %v3179_v11  ;;  %3212 = vmatprep.subr.bf16.mxu0 %v3211_v35  ;;  %v1944_v11 = vld [vmem:[%s4365_s8] sm:$0xf] }
 0x79e   : > { %v1949_v45 = vrot.slane %v1944_v11, %v540_v22  ;;  %v1957_v24 = vrot.slane %v1944_v11, %v548_v5  ;;  %v1953_v35 = vrot.slane %v1944_v11, %v544_v17 }
 0x7a0   : > { %3182 = vmatpush3.bf16.msra.mxu1 %v3181_v46  ;;  %3214 = vmatpush3.bf16.msra.mxu0 %v3213_v51  ;;  %v1961_v46 = vrot.slane %v1944_v11, %v1960_v0 }
 0x7a1   : > { %3184 = vmatprep.subr.bf16.mxu1 %v3183_v39  ;;  %3216 = vmatprep.subr.bf16.mxu0 %v3215_v56 }
 0x7a4   : > { %3186 = vmatpush3.bf16.msra.mxu1 %v3185_v53  ;;  %3218 = vmatpush3.bf16.msra.mxu0 %v3217_v57 }
 0x7a5   : > { %3188 = vmatprep.subr.bf16.mxu1 %v3187_v62  ;;  %3220 = vmatprep.subr.bf16.mxu0 %v3219_v2 }
 0x7a8   : > { %3190 = vmatpush3.bf16.msra.mxu1 %v3189_v19  ;;  %3222 = vmatpush3.bf16.msra.mxu0 %v3221_v9 }
 0x7a9   : > { %3192 = vmatprep.subr.bf16.mxu1 %v3191_v20  ;;  %3224 = vmatprep.subr.bf16.mxu0 %v3223_v27 }
 0x7ac   : > { %3194 = vmatpush3.bf16.msra.mxu1 %v3193_v15  ;;  %3226 = vmatpush3.bf16.msra.mxu0 %v3225_v12 }
 0x7ad   : > { %3196 = vmatprep.subr.bf16.mxu1 %v3195_v28  ;;  %3228 = vmatprep.subr.bf16.mxu0 %v3227_v40 }
 0x7b0   : > { %3198 = vmatpush3.bf16.msra.mxu1 %v3197_v31  ;;  %3230 = vmatpush3.bf16.msra.mxu0 %v3229_v10 }
 0x865   : > { %v2032_v47 = vpop.f32.mrb[36].mxu1  ;;  %v2115_v48 = vpop.f32.mrb[30].mxu0 }
 0x866   : > { %v2033_v51 = vadd.f32 %v2032_v47, %v1949_v45  ;;  %v2116_v32 = vadd.f32 %v2115_v48, %v1957_v24  ;;  %v2034_v52 = vpop.f32.mrb[37].mxu1  ;;  %v2117_v34 = vpop.f32.mrb[31].mxu0 }
 0x867   : > { %v2035_v39 = vadd.f32 %v2034_v52, %v1953_v35  ;;  %v2118_v50 = vadd.f32 %v2117_v34, %v1961_v46 }
 0x868   : > { %v2144_v55 = vmul.f32 0.70710677, %v2033_v51  ;;  %v2146_v44 = vmul.f32 0.70710677, %v2116_v32  ;;  %v2132_v8 = vmul.f32 0.5, %v2033_v51  ;;  %v2134_v26 = vmul.f32 0.5, %v2116_v32 }
 0x869   : > { %v2145_v56 = vmul.f32 0.70710677, %v2035_v39  ;;  %v2147_v53 = vmul.f32 0.70710677, %v2118_v50  ;;  %v2038_v22 = vpop.f32.mrb[38].mxu1  ;;  %v2121_v49 = vpop.f32.mrb[32].mxu0 }
 0x86a   : > { %3375 = verf.f32 %v2144_v55  ;;  %v2039_v5 = vadd.f32 %v2038_v22, %v1949_v45  ;;  %v2122_v16 = vadd.f32 %v2121_v49, %v1957_v24  ;;  %v2040_v17 = vpop.f32.mrb[39].mxu1  ;;  %v2123_v58 = vpop.f32.mrb[33].mxu0  ;;  %v2133_v12 = vmul.f32 0.5, %v2035_v39 }
 0x86b   : > { %3377 = verf.f32 %v2146_v44  ;;  %v2041_v57 = vadd.f32 %v2040_v17, %v1953_v35  ;;  %v2124_v60 = vadd.f32 %v2123_v58, %v1961_v46  ;;  %v2135_v36 = vmul.f32 0.5, %v2118_v50 }
 0x86c   : > { %3379 = verf.f32 %v2145_v56  ;;  %v2148_v61 = vmul.f32 0.70710677, %v2039_v5  ;;  %v2150_v54 = vmul.f32 0.70710677, %v2122_v16  ;;  %v2138_v32 = vmul.f32 0.5, %v2122_v16 }
 0x86d   : > { %3381 = verf.f32 %v2147_v53  ;;  %v2149_v62 = vmul.f32 0.70710677, %v2041_v57  ;;  %v2151_v63 = vmul.f32 0.70710677, %v2124_v60  ;;  %v2139_v47 = vmul.f32 0.5, %v2124_v60 }
 0x86e   : > { %3383 = verf.f32 %v2148_v61  ;;  %v2044_v3 = vpop.f32.mrb[40].mxu1  ;;  %v2127_v4 = vpop.f32.mrb[34].mxu0 }
 0x86f   : > { %3385 = verf.f32 %v2150_v54  ;;  %v2045_v2 = vadd.f32 %v2044_v3, %v1949_v45  ;;  %v4333_v19 = vadd.f32 %v2127_v4, %v1957_v24  ;;  %v2046_v1 = vpop.f32.mrb[41].mxu1  ;;  %v2129_v6 = vpop.f32.mrb[35].mxu0  ;;  %v2137_v24 = vmul.f32 0.5, %v2041_v57  ;;  %v2620_v4 = vld [vmem:[%s4367_s10] ss:$0 sm:$0xff] }
 0x870   : > { %3387 = verf.f32 %v2149_v62  ;;  %v2047_v9 = vadd.f32 %v2046_v1, %v1953_v35  ;;  %v2130_v13 = vadd.f32 %v2129_v6, %v1961_v46  ;;  %v2136_v46 = vmul.f32 0.5, %v2039_v5 }
 0x871   : > { %3389 = verf.f32 %v2151_v63  ;;  %v2152_v14 = vmul.f32 0.70710677, %v2045_v2  ;;  %v2154_v18 = vmul.f32 0.70710677, %v4333_v19  ;;  %v2140_v5 = vmul.f32 0.5, %v2045_v2 }
 0x872   : > { %v2153_v20 = vmul.f32 0.70710677, %v2047_v9  ;;  %v2155_v25 = vmul.f32 0.70710677, %v2130_v13  ;;  %v2141_v49 = vmul.f32 0.5, %v2047_v9  ;;  %v2143_v58 = vmul.f32 0.5, %v2130_v13 }
 0x873   : > { %3391 = verf.f32 %v2152_v14  ;;  %v2142_v16 = vmul.f32 0.5, %v4333_v19 }
 0x874   : > { %v3376_v21 = vpop.eup %3375  ;;  %3393 = verf.f32 %v2154_v18 }
 0x875   : > { %v3378_v23 = vpop.eup %3377  ;;  %v2168_v15 = vadd.f32 1.0, %v3376_v21  ;;  %3395 = verf.f32 %v2153_v20 }
 0x876   : > { %v3380_v27 = vpop.eup %3379  ;;  %v2170_v29 = vadd.f32 1.0, %v3378_v23  ;;  %3397 = verf.f32 %v2155_v25 }
 0x877   : > { %v3382_v7 = vpop.eup %3381  ;;  %v2169_v33 = vadd.f32 1.0, %v3380_v27  ;;  %v2180_v31 = vmul.f32 %v2168_v15, %v2132_v8 }
 0x878   : > { %v2171_v28 = vadd.f32 1.0, %v3382_v7  ;;  %v3384_v37 = vpop.eup %3383  ;;  %v2182_v10 = vmul.f32 %v2170_v29, %v2134_v26 }
 0x879   : > { %v2181_v38 = vmul.f32 %v2169_v33, %v2133_v12  ;;  %v3386_v40 = vpop.eup %3385  ;;  %v2172_v11 = vadd.f32 1.0, %v3384_v37 }
 0x87a   : > { %v2183_v42 = vmul.f32 %v2171_v28, %v2135_v36  ;;  %v3388_v43 = vpop.eup %3387  ;;  %v2174_v45 = vadd.f32 1.0, %v3386_v40 }
 0x87b   : > { %2327 = vmatprep.mubr.f32.mxu1 %v2181_v38  ;;  %v3390_v0 = vpop.eup %3389  ;;  %v2173_v35 = vadd.f32 1.0, %v3388_v43  ;;  %v2184_v50 = vmul.f32 %v2172_v11, %v2136_v46 }
 0x87c   : > { %2407 = vmatprep.mubr.f32.mxu0 %v2183_v42  ;;  %2328 = vmatmul.mubr.f32.vlgmr.msra.gmra.mrb[42].mxu1 %v2180_v31  ;;  %v2175_v48 = vadd.f32 1.0, %v3390_v0  ;;  %v2186_v56 = vmul.f32 %v2174_v45, %v2138_v32 }
 0x87d   : > { %2408 = vmatmul.mubr.f32.vlgmr.msra.gmra.mrb[36].mxu0 %v2182_v10  ;;  %v3392_v51 = vpop.eup %3391  ;;  %v2185_v52 = vmul.f32 %v2173_v35, %v2137_v24 }
 0x87e   : > { %v3394_v34 = vpop.eup %3393  ;;  %v2187_v39 = vmul.f32 %v2175_v48, %v2139_v47  ;;  %v2176_v44 = vadd.f32 1.0, %v3392_v51 }
 0x87f   : > { %v3396_v55 = vpop.eup %3395  ;;  %2332 = vmatprep.mubr.f32.mxu1 %v2185_v52  ;;  %v2178_v22 = vadd.f32 1.0, %v3394_v34 }
 0x880   : > { %v3398_v53 = vpop.eup %3397  ;;  %v2177_v17 = vadd.f32 1.0, %v3396_v55  ;;  %2412 = vmatprep.mubr.f32.mxu0 %v2187_v39  ;;  %2333 = vmatmul.mubr.f32.gmra.mrb[44].mxu1 %v2184_v50  ;;  %v2188_v54 = vmul.f32 %v2176_v44, %v2140_v5  ;;  %v2621_v44 = vld [vmem:[%s4368_s11] ss:$0 sm:$0xff] }
 0x881   : > { %v2179_v57 = vadd.f32 1.0, %v3398_v53  ;;  %2413 = vmatmul.mubr.f32.gmra.mrb[38].mxu0 %v2186_v56  ;;  %v2190_v62 = vmul.f32 %v2178_v22, %v2142_v16  ;;  %v2622_v53 = vld [vmem:[%s4369_s12] ss:$0 sm:$0xff] }
 0x882   : > { %v2189_v60 = vmul.f32 %v2177_v17, %v2141_v49 }
 0x883   : > { %v2191_v61 = vmul.f32 %v2179_v57, %v2143_v58 }
 0x884   : > { %2337 = vmatprep.mubr.f32.mxu1 %v2189_v60 }
 0x885   : > { %2417 = vmatprep.mubr.f32.mxu0 %v2191_v61  ;;  %2338 = vmatmul.mubr.f32.gmra.mrb[46].mxu1 %v2188_v54 }
 0x886   : > { %2418 = vmatmul.mubr.f32.gmra.mrb[40].mxu0 %v2190_v62 }
 0x94f   : > { %v2743_v63 = vpop.f32.mrb[42].mxu1 }
 0x950   : > { %v2784_v3 = vpop.f32.mrb[36].mxu0  ;;  %v2744_v2 = vpop.f32.mrb[43].mxu1 }
 0x951   : > { %v2745_v1 = vadd.f32 %v2744_v2, %v2743_v63  ;;  %v2785_v6 = vpop.f32.mrb[37].mxu0 }
 0x952   : > { %v2786_v9 = vadd.f32 %v2785_v6, %v2784_v3 }
 0x953   : > { %v2330_v13 = vadd.f32 %v2745_v1, %v2620_v4  ;;  %v2746_v19 = vpop.f32.mrb[44].mxu1 }
 0x954   : > { %v2787_v18 = vpop.f32.mrb[38].mxu0  ;;  %v2747_v20 = vpop.f32.mrb[45].mxu1 }
 0x955   : > { %v2410_v14 = vadd.f32 %v2786_v9, %v2330_v13  ;;  %v2748_v21 = vadd.f32 %v2747_v20, %v2746_v19  ;;  %v2788_v25 = vpop.f32.mrb[39].mxu0 }
 0x956   : > { %v2789_v23 = vadd.f32 %v2788_v25, %v2787_v18 }
 0x957   : > { %v2423_v27 = vadd.f32 %v2410_v14, %v4305_v59  ;;  %v2335_v15 = vadd.f32 %v2748_v21, %v2620_v4 }
 0x958   : > { %v2749_v7 = vpop.f32.mrb[46].mxu1 }
 0x959   : > { %2428 = vadd.xlane.f32.xlu1 %v2423_v27  ;;  %v2415_v29 = vadd.f32 %v2789_v23, %v2335_v15  ;;  %v2790_v12 = vpop.f32.mrb[40].mxu0  ;;  %v2750_v33 = vpop.f32.mrb[47].mxu1 }
 0x95a   : > { %v2751_v8 = vadd.f32 %v2750_v33, %v2749_v7  ;;  %v2791_v36 = vpop.f32.mrb[41].mxu0 }
 0x95b   : > { %v2792_v28 = vadd.f32 %v2791_v36, %v2790_v12  ;;  %v2424_v37 = vadd.f32 %v2415_v29, %v4312_v30 }
 0x95c   : > { %v2340_v26 = vadd.f32 %v2751_v8, %v2620_v4 }
 0x95d   : > { %2430 = vadd.xlane.f32.xlu0 %v2424_v37 }
 0x95e   : > { %v2420_v38 = vadd.f32 %v2792_v28, %v2340_v26 }
 0x960   : > { %v2425_v40 = vadd.f32 %v2420_v38, %v4319_v41 }
 0x962   : > { %2432 = vadd.xlane.f32.xlu1 %v2425_v40 }
 0x9e6   : > { %v2429_v31 = vpop.xlane.xlu1 %2428 }
 0x9e7   : > { %v2434_v42 = vmul.f32 0.0078125, %v2429_v31 }
 0x9e9   : > { %v2437_v59 = vsub.f32 %v2423_v27, %v2434_v42 }
 0x9ea   : > { %v2431_v43 = vpop.xlane.xlu0 %2430 }
 0x9eb   : > { %v2440_v10 = vmul.f32 %v2437_v59, %v2437_v59  ;;  %v2435_v11 = vmul.f32 0.0078125, %v2431_v43 }
 0x9ed   : > { %2443 = vadd.xlane.f32.xlu0 %v2440_v10  ;;  %v2438_v0 = vsub.f32 %v2424_v37, %v2435_v11 }
 0x9ef   : > { %v2433_v45 = vpop.xlane.xlu1 %2432  ;;  %v2441_v24 = vmul.f32 %v2438_v0, %v2438_v0 }
 0x9f0   : > { %v2436_v35 = vmul.f32 0.0078125, %v2433_v45 }
 0x9f1   : > { %2445 = vadd.xlane.f32.xlu1 %v2441_v24 }
 0x9f2   : > { %v2439_v46 = vsub.f32 %v2425_v40, %v2436_v35 }
 0x9f4   : > { %v2442_v30 = vmul.f32 %v2439_v46, %v2439_v46 }
 0x9f6   : > { %2447 = vadd.xlane.f32.xlu0 %v2442_v30 }
 0xa7a   : > { %v2444_v47 = vpop.xlane.xlu0 %2443 }
 0xa7b   : > { %v2449_v48 = vmul.f32 0.0078125, %v2444_v47 }
 0xa7d   : > { %v2452_v41 = vadd.f32 1e-05, %v2449_v48 }
 0xa7e   : > { %v2446_v51 = vpop.xlane.xlu1 %2445 }
 0xa7f   : > { %3399 = vrsqrt.f32 %v2452_v41  ;;  %v2450_v32 = vmul.f32 0.0078125, %v2446_v51 }
 0xa81   : > { %v2453_v52 = vadd.f32 1e-05, %v2450_v32 }
 0xa83   : > { %3401 = vrsqrt.f32 %v2453_v52  ;;  %v2448_v34 = vpop.xlane.xlu0 %2447 }
 0xa84   : > { %v2451_v39 = vmul.f32 0.0078125, %v2448_v34 }
 0xa86   : > { %v2454_v50 = vadd.f32 1e-05, %v2451_v39 }
 0xa88   : > { %3403 = vrsqrt.f32 %v2454_v50 }
 0xa89   : > { %v3400_v55 = vpop.eup %3399 }
 0xa8a   : > { %v2458_v56 = vmul.f32 %v3400_v55, %v2437_v59 }
 0xa8c   : > { %v2467_v22 = vmul.f32 %v2621_v44, %v2458_v56 }
 0xa8d   : > { %v3402_v49 = vpop.eup %3401 }
 0xa8e   : > { %v2476_v17 = vadd.f32 %v2622_v53, %v2467_v22  ;;  %v2459_v5 = vmul.f32 %v3402_v49, %v2438_v0 }
 0xa90   : > { %2479 = vst [vmem:[%s484_s26] sm:$0xff] %v2476_v17  ;;  %v2468_v58 = vmul.f32 %v2621_v44, %v2459_v5 }
 0xa92   : > { %v3404_v57 = vpop.eup %3403  ;;  %v2477_v16 = vadd.f32 %v2622_v53, %v2468_v58 }
 0xa93   : > { %v2460_v60 = vmul.f32 %v3404_v57, %v2439_v46 }
 0xa94   : > { %2480 = vst [vmem:[%s484_s26 + $0x8] sm:$0xff] %v2477_v16 }
 0xa95   : > { %v2469_v61 = vmul.f32 %v2621_v44, %v2460_v60 }
 0xa97   : > { %v2478_v54 = vadd.f32 %v2622_v53, %v2469_v61 }
 0xa99   : > { %2481 = vst [vmem:[%s484_s26 + $0x10] sm:$0xff] %v2478_v54 }
 0xa9a PF: > { %s4389_s30 = sld [smem:[#allocation9_spill]] }
 0xaa0   : > { %s25_s25 = sadd.s32 1, %s4389_s30  }
 0xaa1   : > { %p22_p13 = scmp.ge.s32.totalorder %s25_s25, 4  }
 0xaa3   :  { %24 = sbr.rel (!%p22_p13) target bundleno = 4 (0x4), region = 115 }
 0xaaa   :  { %2503 = vsyncpa [#allocation3], 1 }
 0xaab   :  { %2505 = vsyncpa [#allocation3 + $0x1], 1 }
 0xaac   :  { %2506 = vsyncpa [#allocation5], 1 }

// kernel: forward.6
= control target key start
LH: loop header
LB: loop body
LE: loop exit
PB: predicated region body
PF: predicated region fallthrough
CT: control target
= control target key end

     0   :  { %s3376_s25 = smov 0   ;;  %s4424_s0 = inlined_call_operand.vmem [shape: f32[2,24,128], index: 0, kind: input, shape index: {}]   ;;  %s4425_s1 = inlined_call_operand.vmem [shape: f32[128,384], index: 1, kind: input, shape index: {}]   ;;  %s4426_s2 = inlined_call_operand.vmem [shape: f32[1,384], index: 2, kind: input, shape index: {}]   ;;  %s4427_s3 = inlined_call_operand.vmem [shape: f32[128,128], index: 3, kind: input, shape index: {}]   ;;  %s4428_s4 = inlined_call_operand.vmem [shape: f32[1,128], index: 4, kind: input, shape index: {}]   ;;  %s4429_s5 = inlined_call_operand.vmem [shape: f32[1,128], index: 5, kind: input, shape index: {}]   ;;  %s4430_s6 = inlined_call_operand.vmem [shape: f32[1,128], index: 6, kind: input, shape index: {}]   ;;  %s4431_s7 = inlined_call_operand.vmem [shape: f32[128,512], index: 7, kind: input, shape index: {}]   ;;  %s4432_s8 = inlined_call_operand.vmem [shape: f32[1,512], index: 8, kind: input, shape index: {}]   ;;  %s4433_s9 = inlined_call_operand.vmem [shape: f32[512,128], index: 9, kind: input, shape index: {}]   ;;  %s4434_s10 = inlined_call_operand.vmem [shape: f32[1,128], index: 10, kind: input, shape index: {}]   ;;  %s4435_s11 = inlined_call_operand.vmem [shape: f32[1,128], index: 11, kind: input, shape index: {}]   ;;  %s4436_s12 = inlined_call_operand.vmem [shape: f32[1,128], index: 12, kind: input, shape index: {}]   ;;  %s4437_s13 = inlined_call_operand.vmem [shape: f32[2,24,128], index: 13, kind: output, shape index: {}]  }
   0x1 LB: > { %s2493_s26 = sadd.s32 4294967295, %s3298_s25   ;;  %p2497_p0 = scmp.ge.s32.totalorder %s3298_s25, 1  ;;  %s3298_s25 = sphi %s3376_s25, %s23_s25  }
   0x2   : > { %p387_p1 = scmp.lt.s32.totalorder %s3298_s25, 3 }
   0x4   : > { %p388_p2 = pnand %p2497_p0, %p387_p1 }
   0x5   : > { %v445_v0 = vld [vmem:[%s4425_s1 + $0x8] sm:$0xff] (!%p388_p2)  ;;  %v448_v1 = vld [vmem:[%s4425_s1 + $0x20] sm:$0xff] (!%p388_p2)  ;;  %v447_v4 = vld [vmem:[%s4425_s1 + $0x18] sm:$0xff] (!%p388_p2)  ;;  %v3300_v7 = vmov (!%p388_p2), 0.0   ;;  %v3301_v8 = vmov (!%p388_p2), 0.0|0.0   ;;  %p3479_p3 = scmp.lt.s32.totalorder (!%p388_p2), %s2493_s26, 1 }
   0x6   : > { %391 = sbr.rel (%p388_p2) target bundleno = 2628 (0xa44), region = 72  ;;  %v444_v2 = vld [vmem:[%s4425_s1] sm:$0xff] (!%p388_p2)  ;;  %v2914_v3 = vpack.c.bf16 (!%p388_p2), %v448_v1, %v445_v0  ;;  %v451_v5 = vld [vmem:[%s4425_s1 + $0x38] sm:$0xff] (!%p388_p2)  ;;  %v454_v6 = vld [vmem:[%s4425_s1 + $0x50] sm:$0xff] (!%p388_p2)  ;;  %573 = vmatprep.mubr.f32.mxu0 (!%p388_p2), %v3300_v7  ;;  %2946 = vmatprep.subr.bf16.mxu1 (!%p388_p2), %v3301_v8  ;;  %vm3302_vm0 = vmmov (!%p388_p2), 0   ;;  %vm675_vm1 = vcmask (!%p388_p2), 261120  }
   0x7   : > { %v2916_v9 = vpack.c.bf16 (!%p388_p2), %v447_v4, %v444_v2  ;;  %v2918_v10 = vpack.c.bf16 (!%p388_p2), %v454_v6, %v451_v5  ;;  %v450_v11 = vld [vmem:[%s4425_s1 + $0x30] sm:$0xff] (!%p388_p2)  ;;  %v453_v12 = vld [vmem:[%s4425_s1 + $0x48] sm:$0xff] (!%p388_p2)  ;;  %v460_v14 = vld [vmem:[%s4425_s1 + $0x80] sm:$0xff] (!%p388_p2)  ;;  %2744 = vmatprep.mubr.msk.f32.mxu1 (!%p388_p2), %vm3302_vm0, %v3300_v7  ;;  %s3303_s24 = smov (!%p388_p2), 64   ;;  %s3304_s28 = smov (!%p388_p2), 96   ;;  %vm780_vm4 = vcmask (!%p388_p2), 195584  }
   0x8   : > { %v457_v13 = vld [vmem:[%s4425_s1 + $0x68] sm:$0xff] (!%p388_p2)  ;;  %2915 = vmatprep.subr.bf16.mxu0 (!%p388_p2), %v2914_v3  ;;  %v2920_v15 = vpack.c.bf16 (!%p388_p2), %v453_v12, %v450_v11  ;;  %v456_v17 = vld [vmem:[%s4425_s1 + $0x60] sm:$0xff] (!%p388_p2)  ;;  %v459_v18 = vld [vmem:[%s4425_s1 + $0x78] sm:$0xff] (!%p388_p2)  ;;  %s3305_s29 = smov (!%p388_p2), 32   ;;  %vm1668_vm5 = vcmask (!%p388_p2), 523264   ;;  %vm1672_vm6 = vcmask (!%p388_p2), 785408  }
   0x9   : > { %2917 = vmatpush1.bf16.msra.mxu0 (!%p388_p2), %v2916_v9  ;;  %v2922_v16 = vpack.c.bf16 (!%p388_p2), %v460_v14, %v457_v13  ;;  %v463_v19 = vld [vmem:[%s4425_s1 + $0x98] sm:$0xff] (!%p388_p2)  ;;  %v466_v20 = vld [vmem:[%s4425_s1 + $0xb0] sm:$0xff] (!%p388_p2)  ;;  %v2924_v21 = vpack.c.bf16 (!%p388_p2), %v459_v18, %v456_v17  ;;  %v465_v24 = vld [vmem:[%s4425_s1 + $0xa8] sm:$0xff] (!%p388_p2) }
   0xa   : > { %2919 = vmatprep.subr.bf16.mxu0 (!%p388_p2), %v2918_v10  ;;  %v2926_v22 = vpack.c.bf16 (!%p388_p2), %v466_v20, %v463_v19  ;;  %v462_v23 = vld [vmem:[%s4425_s1 + $0x90] sm:$0xff] (!%p388_p2)  ;;  %v469_v25 = vld [vmem:[%s4425_s1 + $0xc8] sm:$0xff] (!%p388_p2)  ;;  %v472_v26 = vld [vmem:[%s4425_s1 + $0xe0] sm:$0xff] (!%p388_p2) }
   0xb   : > { %v446_v27 = vld [vmem:[%s4425_s1 + $0x10] sm:$0xff] (!%p388_p2)  ;;  %v2928_v28 = vpack.c.bf16 (!%p388_p2), %v465_v24, %v462_v23  ;;  %v449_v29 = vld [vmem:[%s4425_s1 + $0x28] sm:$0xff] (!%p388_p2)  ;;  %v452_v30 = vld [vmem:[%s4425_s1 + $0x40] sm:$0xff] (!%p388_p2)  ;;  %v2930_v32 = vpack.c.bf16 (!%p388_p2), %v472_v26, %v469_v25 }
   0xc   : > { %v455_v31 = vld [vmem:[%s4425_s1 + $0x58] sm:$0xff] (!%p388_p2)  ;;  %v468_v33 = vld [vmem:[%s4425_s1 + $0xc0] sm:$0xff] (!%p388_p2)  ;;  %v2947_v35 = vpack.c.bf16 (!%p388_p2), %v449_v29, %v446_v27  ;;  %v478_v37 = vld [vmem:[%s4425_s1 + $0x110] sm:$0xff] (!%p388_p2) }
   0xd   : > { %2921 = vmatpush1.bf16.msra.mxu0 %v2920_v15  ;;  %v471_v34 = vld [vmem:[%s4425_s1 + $0xd8] sm:$0xff]  ;;  %v2950_v38 = vpack.c.bf16 %v455_v31, %v452_v30  ;;  %v458_v40 = vld [vmem:[%s4425_s1 + $0x70] sm:$0xff]  ;;  %v461_v41 = vld [vmem:[%s4425_s1 + $0x88] sm:$0xff]  ;;  %s4442_s26 = smov (!%p3479_p3, %s2493_s26), 1  ;;  %v494_v15 = vlaneseq }
   0xe   : > { %2923 = vmatprep.subr.bf16.mxu0 %v2922_v16  ;;  %v475_v36 = vld [vmem:[%s4425_s1 + $0xf8] sm:$0xff]  ;;  %2948 = vmatpush3.bf16.msra.mxu1 %v2947_v35  ;;  %v2932_v39 = vpack.c.bf16 %v471_v34, %v468_v33  ;;  %v474_v43 = vld [vmem:[%s4425_s1 + $0xf0] sm:$0xff]  ;;  %v477_v44 = vld [vmem:[%s4425_s1 + $0x108] sm:$0xff]  ;;  %v2953_v47 = vpack.c.bf16 %v461_v41, %v458_v40  ;;  %s3150_s20 = smul.u32 24, %s4442_s26 }
   0xf   : > { %2949 = vmatprep.subr.bf16.mxu1 %v3301_v8  ;;  %v2934_v42 = vpack.c.bf16 %v478_v37, %v475_v36  ;;  %v481_v45 = vld [vmem:[%s4425_s1 + $0x128] sm:$0xff]  ;;  %v484_v46 = vld [vmem:[%s4425_s1 + $0x140] sm:$0xff]  ;;  %v2936_v48 = vpack.c.bf16 %v477_v44, %v474_v43  ;;  %v467_v50 = vld [vmem:[%s4425_s1 + $0xb8] sm:$0xff]  ;;  %v3575_v16 = vshrl.u32 %v494_v15, 7 }
  0x10   : > { %v464_v49 = vld [vmem:[%s4425_s1 + $0xa0] sm:$0xff]  ;;  %v2938_v51 = vpack.c.bf16 %v484_v46, %v481_v45  ;;  %v483_v53 = vld [vmem:[%s4425_s1 + $0x138] sm:$0xff]  ;;  %v490_v55 = vld [vmem:[%s4425_s1 + $0x170] sm:$0xff]  ;;  %s3540_s30 = scalar_lea.vmem %s4424_s0, %s3150_s20  ;;  %s440_s18 = scalar_lea.vmem %s4437_s13, %s3150_s20 }
  0x11   : > { %2925 = vmatpush1.bf16.msra.mxu0 %v2924_v21  ;;  %v480_v52 = vld [vmem:[%s4425_s1 + $0x120] sm:$0xff]  ;;  %v487_v54 = vld [vmem:[%s4425_s1 + $0x158] sm:$0xff]  ;;  %v2956_v56 = vpack.c.bf16 %v467_v50, %v464_v49  ;;  %v470_v58 = vld [vmem:[%s4425_s1 + $0xd0] sm:$0xff]  ;;  %v500_v17 = vsub.s32 1, %v3575_v16 }
  0x12   : > { %2927 = vmatprep.subr.bf16.mxu0 %v2926_v22  ;;  %2951 = vmatpush3.bf16.msra.mxu1 %v2950_v38  ;;  %v2940_v57 = vpack.c.bf16 %v483_v53, %v480_v52  ;;  %v473_v59 = vld [vmem:[%s4425_s1 + $0xe8] sm:$0xff]  ;;  %v2942_v60 = vpack.c.bf16 %v490_v55, %v487_v54  ;;  %v486_v61 = vld [vmem:[%s4425_s1 + $0x150] sm:$0xff]  ;;  %v476_v1 = vld [vmem:[%s4425_s1 + $0x100] sm:$0xff]  ;;  %v496_v22 = vsub.s32 0, %v3575_v16 }
  0x13   : > { %2952 = vmatprep.subr.bf16.mxu1 %v3301_v8  ;;  %v489_v62 = vld [vmem:[%s4425_s1 + $0x168] sm:$0xff]  ;;  %v2959_v63 = vpack.c.bf16 %v473_v59, %v470_v58  ;;  %v479_v2 = vld [vmem:[%s4425_s1 + $0x118] sm:$0xff]  ;;  %v441_v4 = vld [vmem:[%s3540_s30] sm:$0xff] }
  0x14   : > { %v2944_v0 = vpack.c.bf16 %v489_v62, %v486_v61  ;;  %v2962_v3 = vpack.c.bf16 %v479_v2, %v476_v1  ;;  %v482_v5 = vld [vmem:[%s4425_s1 + $0x130] sm:$0xff]  ;;  %v485_v6 = vld [vmem:[%s4425_s1 + $0x148] sm:$0xff]  ;;  %v488_v12 = vld [vmem:[%s4425_s1 + $0x160] sm:$0xff] }
  0x15   : > { %2929 = vmatpush1.bf16.msra.mxu0 %v2928_v28  ;;  %v2965_v9 = vpack.c.bf16 %v485_v6, %v482_v5  ;;  %v442_v10 = vld [vmem:[%s3540_s30 + $0x8] sm:$0xff]  ;;  %v443_v11 = vld [vmem:[%s3540_s30 + $0x10] sm:$0xff]  ;;  %v491_v13 = vld [vmem:[%s4425_s1 + $0x178] sm:$0xff] }
  0x16   : > { %2931 = vmatprep.subr.bf16.mxu0 %v2930_v32  ;;  %2954 = vmatpush3.bf16.msra.mxu1 %v2953_v47  ;;  %v2968_v14 = vpack.c.bf16 %v491_v13, %v488_v12  ;;  %v3581_v18 = vld [vmem:[%s4426_s2] sm:$0x7]  ;;  %vm3592_vm2 = vmpackc.low %vm675_vm1, %vm675_vm1  ;;  %v3677_v12 = vand.u32 127, %v494_v15 }
  0x17   : > { %2955 = vmatprep.subr.bf16.mxu1 %v3301_v8  ;;  %v501_v21 = vrot.slane %v3581_v18, %v500_v17  ;;  %v497_v27 = vrot.slane %v3581_v18, %v496_v22 }
  0x18   : > { %vm674_vm3 = vcmp.lt.s32.totalorder %v3677_v12, 17 }
  0x19   : > { %2933 = vmatpush1.bf16.msra.mxu0 %v2932_v39 }
  0x1a   : > { %2935 = vmatprep.subr.bf16.mxu0 %v2934_v42  ;;  %2957 = vmatpush3.bf16.msra.mxu1 %v2956_v56 }
  0x1b   : > { %2958 = vmatprep.subr.bf16.mxu1 %v3301_v8 }
  0x1d   : > { %2937 = vmatpush1.bf16.msra.mxu0 %v2936_v48 }
  0x1e   : > { %2939 = vmatprep.subr.bf16.mxu0 %v2938_v51  ;;  %2960 = vmatpush3.bf16.msra.mxu1 %v2959_v63 }
  0x1f   : > { %2961 = vmatprep.subr.bf16.mxu1 %v3301_v8 }
  0x21   : > { %2941 = vmatpush1.bf16.msra.mxu0 %v2940_v57 }
  0x22   : > { %2943 = vmatprep.subr.bf16.mxu0 %v2942_v60  ;;  %2963 = vmatpush3.bf16.msra.mxu1 %v2962_v3  ;;  %v504_v3 = vsub.s32 2, %v3575_v16 }
  0x23   : > { %2964 = vmatprep.subr.bf16.mxu1 %v3301_v8 }
  0x25   : > { %2945 = vmatpush1.bf16.msra.mxu0 %v2944_v0 }
  0x26   : > { %2977 = vmatprep.subr.bf16.mxu0 %v3301_v8  ;;  %2966 = vmatpush3.bf16.msra.mxu1 %v2965_v9 }
  0x27   : > { %2967 = vmatprep.subr.bf16.mxu1 %v3301_v8 }
  0x28   : > { %574 = vmatmul.mubr.f32.vlgmr.msra.gmra.mrb[0].mxu0 %v441_v4 }
  0x29   : > { %579 = vmatprep.mubr.f32.mxu0 %v3300_v7 }
  0x2a   : > { %2969 = vmatpush3.bf16.msra.mxu1 %v2968_v14 }
  0x2b   : > { %2970 = vmatprep.subr.bf16.mxu1 %v3301_v8 }
  0x2c   : > { %580 = vmatmul.mubr.f32.gmra.mrb[2].mxu0 %v442_v10 }
  0x2d   : > { %585 = vmatprep.mubr.f32.mxu0 %v3300_v7  ;;  %2745 = vmatmul.mubr.f32.vlgmr.msra.gmra.mrb[0].mxu1 %v441_v4  ;;  %v505_v4 = vrot.slane %v3581_v18, %v504_v3 }
  0x2e   : > { %2747 = vmatprep.mubr.msk.f32.mxu1 %vm3302_vm0, %v3300_v7 }
  0x30   : > { %586 = vmatmul.mubr.f32.gmra.mrb[4].mxu0 %v443_v11 }
  0x31   : > { %2789 = vmatprep.mubr.msk.f32.mxu0 %vm3302_vm0, %v3300_v7  ;;  %2748 = vmatmul.mubr.f32.gmra.mrb[2].mxu1 %v442_v10 }
  0x32   : > { %2750 = vmatprep.mubr.msk.f32.mxu1 %vm3302_vm0, %v3300_v7 }
  0x35   : > { %2751 = vmatmul.mubr.f32.gmra.mrb[4].mxu1 %v443_v11 }
  0x36   : > { %2759 = vmatprep.mubr.msk.f32.mxu1 %vm3302_vm0, %v3300_v7 }
  0xfb   : > { %v575_v19 = vpop.f32.mrb[0].mxu0 }
  0xfc   : > { %v577_v20 = vpop.f32.mrb[1].mxu0  ;;  %v576_v34 = vadd.f32 %v575_v19, %v497_v27 }
  0xfd   : > { %v578_v25 = vadd.f32 %v577_v20, %v501_v21 }
  0xff   : > { %v581_v23 = vpop.f32.mrb[2].mxu0 }
 0x100   : > { %v583_v24 = vpop.f32.mrb[3].mxu0  ;;  %v582_v36 = vadd.f32 %v581_v23, %v497_v27  ;;  %v658_v37 = vpop.f32.mrb[0].mxu1 }
 0x101   : > { %v584_v26 = vadd.f32 %v583_v24, %v501_v21  ;;  %v2746_v38 = vpop.f32.mrb[1].mxu1  ;;  %v659_v5 = vadd.f32 %v658_v37, %v505_v4 }
 0x103   : > { %v2971_v28 = vpack.c.bf16 %v584_v26, %v578_v25  ;;  %v587_v29 = vpop.f32.mrb[4].mxu0  ;;  %v3170_v30 = vpack.i.bf16 %v584_v26, %v578_v25 }
 0x104   : > { %v589_v32 = vpop.f32.mrb[5].mxu0  ;;  %v588_v35 = vadd.f32 %v587_v29, %v497_v27  ;;  %v663_v39 = vpop.f32.mrb[2].mxu1 }
 0x105   : > { %3171 = vrot.lane.b32.xlu1 %v3170_v30, %s3303_s24  ;;  %3166 = vrot.lane.b32.xlu0 %v3170_v30, %s3304_s28  ;;  %v590_v33 = vadd.f32 %v589_v32, %v501_v21  ;;  %v2749_v40 = vpop.f32.mrb[3].mxu1  ;;  %v664_v6 = vadd.f32 %v663_v39, %v505_v4 }
 0x106   : > { %2973 = vmatpush3.bf16.xpose.msk.msra.mxu1 %vm3592_vm2, %v2971_v28 }
 0x107   : > { %2757 = vmatprep.subr.mxu1 %v3300_v7  ;;  %v2975_v9 = vpack.c.bf16 %v664_v6, %v659_v5  ;;  %v3671_v10 = vpack.i.bf16 %v664_v6, %v659_v5 }
 0x108   : > { %v668_v41 = vpop.f32.mrb[4].mxu1 }
 0x109   : > { %913 = vrot.lane.b32.xlu0 %v590_v33, %s3304_s28  ;;  %903 = vrot.lane.b32.xlu1 %v576_v34, %s3304_s28  ;;  %v2752_v42 = vpop.f32.mrb[5].mxu1  ;;  %v3673_v11 = vadd.f32 %v668_v41, %v505_v4 }
 0x10d   : > { %905 = vrot.lane.b32.xlu0 %v582_v36, %s3304_s28  ;;  %907 = vrot.lane.b32.xlu1 %v588_v35, %s3304_s28 }
 0x10e   : > { %2758 = vmatpush3.xpose.msk.msra.mxu1 %vm675_vm1, %v590_v33 }
 0x10f   : > { %2974 = vmatprep.subr.bf16.mxu1 %v3301_v8 }
 0x111   : > { %2760 = vmatmul.mubr.msk.f32.vlgmr.msra.gmra.mrb[6].mxu1 %vm675_vm1, %v576_v34  ;;  %1157 = vrot.lane.b32.xlu0 %v590_v33, %s3303_s24 }
 0x112   : > { %3176 = vrot.lane.b32.xlu1 %v3170_v30, %s3305_s29  ;;  %2762 = vmatprep.mubr.msk.f32.mxu1 %vm3302_vm0, %v3300_v7 }
 0x113   : > { %2976 = vmatpush3.bf16.msra.mxu1 %v2975_v9 }
 0x114   : > { %2772 = vmatprep.subr.mxu1 %v3300_v7 }
 0x115   : > { %2763 = vmatmul.mubr.msk.f32.gmra.mrb[8].mxu1 %vm675_vm1, %v582_v36  ;;  %1147 = vrot.lane.b32.xlu0 %v576_v34, %s3303_s24 }
 0x116   : > { %1149 = vrot.lane.b32.xlu1 %v582_v36, %s3303_s24  ;;  %2765 = vmatprep.mubr.msk.f32.mxu1 %vm3302_vm0, %v3300_v7 }
 0x117   : > { %2773 = vmatpush3.msra.mxu1 %v3673_v11 }
 0x118   : > { %2981 = vmatprep.subr.bf16.mxu1 %v3301_v8 }
 0x119   : > { %2766 = vmatmul.mubr.msk.f32.gmra.mrb[10].mxu1 %vm675_vm1, %v588_v35  ;;  %1151 = vrot.lane.b32.xlu0 %v588_v35, %s3303_s24 }
 0x11a   : > { %1398 = vrot.lane.b32.xlu1 %v590_v33, %s3305_s29  ;;  %2774 = vmatprep.mubr.msk.f32.mxu1 %vm3302_vm0, %v3300_v7 }
 0x11d   : > { %1388 = vrot.lane.b32.xlu0 %v576_v34, %s3305_s29 }
 0x11e   : > { %1390 = vrot.lane.b32.xlu1 %v582_v36, %s3305_s29 }
 0x121   : > { %1392 = vrot.lane.b32.xlu0 %v588_v35, %s3305_s29 }
 0x177   : > { %v3167_v43 = vpop.permute.xlu0 %3166  ;;  %v3172_v46 = vpop.permute.xlu1 %3171 }
 0x178   : > { %v3169_v44 = vunpack.i.h.bf16 %v3167_v43  ;;  %v3168_v45 = vunpack.i.l.bf16 %v3167_v43  ;;  %v3174_v50 = vunpack.i.h.bf16 %v3172_v46  ;;  %v3173_v51 = vunpack.i.l.bf16 %v3172_v46 }
 0x17a   : > { %v2978_v47 = vpack.c.bf16 %v3169_v44, %v3168_v45  ;;  %v2985_v53 = vpack.c.bf16 %v3174_v50, %v3173_v51 }
 0x17b   : > { %v904_v48 = vpop.permute.xlu1 %903  ;;  %v914_v49 = vpop.permute.xlu0 %913 }
 0x17c   : > { %2980 = vmatpush3.bf16.xpose.msk.msra.mxu0 %vm3592_vm2, %v2978_v47 }
 0x17d   : > { %2787 = vmatprep.subr.mxu0 %v3300_v7 }
 0x17f   : > { %v908_v52 = vpop.permute.xlu1 %907  ;;  %v906_v54 = vpop.permute.xlu0 %905 }
 0x183   : > { %v1158_v56 = vpop.permute.xlu0 %1157 }
 0x184   : > { %2788 = vmatpush3.xpose.msk.msra.mxu0 %vm675_vm1, %v914_v49  ;;  %v3177_v55 = vpop.permute.xlu1 %3176 }
 0x185   : > { %2984 = vmatprep.subr.bf16.mxu0 %v3301_v8  ;;  %v3179_v57 = vunpack.i.h.bf16 %v3177_v55  ;;  %v3178_v58 = vunpack.i.l.bf16 %v3177_v55 }
 0x187   : > { %2790 = vmatmul.mubr.msk.f32.vlgmr.msra.gmra.mrb[6].mxu0 %vm675_vm1, %v904_v48  ;;  %v2992_v59 = vpack.c.bf16 %v3179_v57, %v3178_v58  ;;  %v1148_v60 = vpop.permute.xlu0 %1147 }
 0x188   : > { %2987 = vmatpush3.bf16.xpose.msk.msra.mxu0 %vm3592_vm2, %v2985_v53  ;;  %2792 = vmatprep.mubr.msk.f32.mxu0 %vm3302_vm0, %v3300_v7  ;;  %v1150_v61 = vpop.permute.xlu1 %1149 }
 0x189   : > { %2817 = vmatprep.subr.mxu0 %v3300_v7 }
 0x18b   : > { %2793 = vmatmul.mubr.msk.f32.gmra.mrb[8].mxu0 %vm675_vm1, %v906_v54  ;;  %v1152_v62 = vpop.permute.xlu0 %1151 }
 0x18c   : > { %2795 = vmatprep.mubr.msk.f32.mxu0 %vm3302_vm0, %v3300_v7  ;;  %v1399_v63 = vpop.permute.xlu1 %1398 }
 0x18f   : > { %2796 = vmatmul.mubr.msk.f32.gmra.mrb[10].mxu0 %vm675_vm1, %v908_v52  ;;  %v1389_v0 = vpop.permute.xlu0 %1388 }
 0x190   : > { %2818 = vmatpush3.xpose.msk.msra.mxu0 %vm675_vm1, %v1158_v56  ;;  %2819 = vmatprep.mubr.msk.f32.mxu0 %vm3302_vm0, %v3300_v7  ;;  %v1391_v1 = vpop.permute.xlu1 %1390 }
 0x191   : > { %2991 = vmatprep.subr.bf16.mxu0 %v3301_v8 }
 0x193   : > { %2820 = vmatmul.mubr.msk.f32.vlgmr.msra.gmra.mrb[12].mxu0 %vm675_vm1, %v1148_v60  ;;  %v1393_v2 = vpop.permute.xlu0 %1392 }
 0x194   : > { %2994 = vmatpush3.bf16.xpose.msk.msra.mxu0 %vm3592_vm2, %v2992_v59  ;;  %2822 = vmatprep.mubr.msk.f32.mxu0 %vm3302_vm0, %v3300_v7 }
 0x195   : > { %2847 = vmatprep.subr.mxu0 %v3300_v7 }
 0x197   : > { %2823 = vmatmul.mubr.msk.f32.gmra.mrb[14].mxu0 %vm675_vm1, %v1150_v61 }
 0x198   : > { %2825 = vmatprep.mubr.msk.f32.mxu0 %vm3302_vm0, %v3300_v7 }
 0x19b   : > { %2826 = vmatmul.mubr.msk.f32.gmra.mrb[16].mxu0 %vm675_vm1, %v1152_v62 }
 0x19c   : > { %2848 = vmatpush3.xpose.msk.msra.mxu0 %vm675_vm1, %v1399_v63  ;;  %2849 = vmatprep.mubr.msk.f32.mxu0 %vm3302_vm0, %v3300_v7 }
 0x19d   : > { %2998 = vmatprep.subr.bf16.mxu0 %v3301_v8 }
 0x19f   : > { %2850 = vmatmul.mubr.msk.f32.vlgmr.msra.gmra.mrb[18].mxu0 %vm675_vm1, %v1389_v0 }
 0x1a0   : > { %2852 = vmatprep.mubr.msk.f32.mxu0 %vm3302_vm0, %v3300_v7 }
 0x1a3   : > { %2853 = vmatmul.mubr.msk.f32.gmra.mrb[20].mxu0 %vm675_vm1, %v1391_v1 }
 0x1a4   : > { %2855 = vmatprep.mubr.msk.f32.mxu0 %vm3302_vm0, %v3300_v7 }
 0x1a7   : > { %2856 = vmatmul.mubr.msk.f32.gmra.mrb[22].mxu0 %vm675_vm1, %v1393_v2 }
 0x1a8   : > { %2905 = vmatprep.mubr.msk.f32.mxu0 %vm3302_vm0, %v3300_v7 }
 0x1e4   : > { %v760_v13 = vpop.f32.mrb[6].mxu1 }
 0x1e5   : > { %v774_v14 = vmul.f32 0.17677669, %v760_v13  ;;  %v2761_v18 = vpop.f32.mrb[7].mxu1 }
 0x1e7   : > { %v3684_v19 = vsel %vm674_vm3, %v774_v14, -1e+30 }
 0x1e8   : > { %v765_v20 = vpop.f32.mrb[8].mxu1  ;;  %v781_v21 = vsel %vm780_vm4, %v3684_v19, -inf }
 0x1e9   : > { %v775_v15 = vmul.f32 0.17677669, %v765_v20  ;;  %782 = vmax.xlane.f32.xlu1 %v781_v21  ;;  %v2764_v23 = vpop.f32.mrb[9].mxu1 }
 0x1eb   : > { %v3690_v24 = vsel %vm674_vm3, %v775_v15, -1e+30 }
 0x1ec   : > { %v770_v25 = vpop.f32.mrb[10].mxu1  ;;  %v784_v26 = vsel %vm780_vm4, %v3690_v24, -inf }
 0x1ed   : > { %v776_v27 = vmul.f32 0.17677669, %v770_v25  ;;  %785 = vmax.xlane.f32.xlu0 %v784_v26  ;;  %v2767_v28 = vpop.f32.mrb[11].mxu1 }
 0x1ef   : > { %v779_v29 = vsel %vm674_vm3, %v776_v27, -1e+30 }
 0x1f0   : > { %v787_v30 = vsel %vm780_vm4, %v779_v29, -inf }
 0x1f1   : > { %788 = vmax.xlane.f32.xlu0 %v787_v30 }
 0x25a   : > { %v993_v31 = vpop.f32.mrb[6].mxu0 }
 0x25b   : > { %v1007_v32 = vmul.f32 0.17677669, %v993_v31  ;;  %v2791_v33 = vpop.f32.mrb[7].mxu0 }
 0x25d   : > { %v3699_v34 = vsel %vm674_vm3, %v1007_v32, -1e+30 }
 0x25e   : > { %v998_v35 = vpop.f32.mrb[8].mxu0  ;;  %v1013_v36 = vsel %vm780_vm4, %v3699_v34, -inf }
 0x25f   : > { %v1008_v37 = vmul.f32 0.17677669, %v998_v35  ;;  %v2794_v38 = vpop.f32.mrb[9].mxu0  ;;  %1014 = vmax.xlane.f32.xlu1 %v1013_v36 }
 0x261   : > { %v3705_v39 = vsel %vm674_vm3, %v1008_v37, -1e+30 }
 0x262   : > { %v1003_v40 = vpop.f32.mrb[10].mxu0  ;;  %v1016_v41 = vsel %vm780_vm4, %v3705_v39, -inf }
 0x263   : > { %v1009_v42 = vmul.f32 0.17677669, %v1003_v40  ;;  %v2797_v43 = vpop.f32.mrb[11].mxu0  ;;  %1017 = vmax.xlane.f32.xlu0 %v1016_v41 }
 0x265   : > { %v3711_v44 = vsel %vm674_vm3, %v1009_v42, -1e+30 }
 0x266   : > { %v1237_v45 = vpop.f32.mrb[12].mxu0  ;;  %v1019_v46 = vsel %vm780_vm4, %v3711_v44, -inf }
 0x267   : > { %v1251_v47 = vmul.f32 0.17677669, %v1237_v45  ;;  %v2821_v48 = vpop.f32.mrb[13].mxu0  ;;  %1020 = vmax.xlane.f32.xlu1 %v1019_v46 }
 0x269   : > { %v3717_v49 = vsel %vm674_vm3, %v1251_v47, -1e+30 }
 0x26a   : > { %v1242_v50 = vpop.f32.mrb[14].mxu0  ;;  %v1257_v51 = vsel %vm780_vm4, %v3717_v49, -inf }
 0x26b   : > { %v1252_v52 = vmul.f32 0.17677669, %v1242_v50  ;;  %v2824_v53 = vpop.f32.mrb[15].mxu0  ;;  %1258 = vmax.xlane.f32.xlu0 %v1257_v51 }
 0x26d   : > { %v3723_v54 = vsel %vm674_vm3, %v1252_v52, -1e+30 }
 0x26e   : > { %v1247_v55 = vpop.f32.mrb[16].mxu0  ;;  %v1260_v56 = vsel %vm780_vm4, %v3723_v54, -inf }
 0x26f   : > { %v1253_v57 = vmul.f32 0.17677669, %v1247_v55  ;;  %v2827_v58 = vpop.f32.mrb[17].mxu0  ;;  %1261 = vmax.xlane.f32.xlu1 %v1260_v56 }
 0x271   : > { %v3729_v59 = vsel %vm674_vm3, %v1253_v57, -1e+30 }
 0x272   : > { %v1478_v60 = vpop.f32.mrb[18].mxu0  ;;  %v1263_v61 = vsel %vm780_vm4, %v3729_v59, -inf }
 0x273   : > { %v1492_v62 = vmul.f32 0.17677669, %v1478_v60  ;;  %v2851_v63 = vpop.f32.mrb[19].mxu0  ;;  %1264 = vmax.xlane.f32.xlu0 %v1263_v61 }
 0x275   : > { %v3735_v0 = vsel %vm674_vm3, %v1492_v62, -1e+30 }
 0x276   : > { %v1483_v1 = vpop.f32.mrb[20].mxu0  ;;  %v1498_v2 = vsel %vm780_vm4, %v3735_v0, -inf  ;;  %v783_v20 = vpop.xlane.xlu1 %782 }
 0x277   : > { %v1493_v4 = vmul.f32 0.17677669, %v1483_v1  ;;  %v2854_v5 = vpop.f32.mrb[21].mxu0  ;;  %1499 = vmax.xlane.f32.xlu1 %v1498_v2  ;;  %v790_v21 = vsub.f32 %v3684_v19, %v783_v20 }
 0x279   : > { %v3741_v6 = vsel %vm674_vm3, %v1493_v4, -1e+30  ;;  %v793_v23 = vmul.f32 1.442695, %v790_v21 }
 0x27a   : > { %v1488_v9 = vpop.f32.mrb[22].mxu0  ;;  %v1501_v13 = vsel %vm780_vm4, %v3741_v6, -inf  ;;  %v786_v18 = vpop.xlane.xlu0 %785 }
 0x27b   : > { %v2857_v14 = vpop.f32.mrb[23].mxu0  ;;  %1502 = vmax.xlane.f32.xlu0 %v1501_v13  ;;  %3205 = vpow2.f32 %v793_v23  ;;  %v1494_v27 = vmul.f32 0.17677669, %v1488_v9  ;;  %v791_v12 = vsub.f32 %v3690_v24, %v786_v18 }
 0x27d   : > { %v3752_v28 = vsel %vm674_vm3, %v1494_v27, -1e+30  ;;  %v795_v33 = vmul.f32 1.442695, %v791_v12 }
 0x27e   : > { %v789_v15 = vpop.xlane.xlu0 %788  ;;  %v1504_v30 = vsel %vm780_vm4, %v3752_v28, -inf }
 0x27f   : > { %v792_v25 = vsub.f32 %v779_v29, %v789_v15 }
 0x281   : > { %v797_v26 = vmul.f32 1.442695, %v792_v25 }
 0x283   : > { %3207 = vpow2.f32 %v797_v26 }
 0x284   : > { %3209 = vpow2.f32 %v795_v33 }
 0x285   : > { %v3756_v31 = vpop.eup %3205 }
 0x286   : > { %v799_v19 = vsel %vm780_vm4, %v3756_v31, 0.0 }
 0x288   : > { %1053 = vrot.lane.b32.xlu1 %v3673_v11, %s3304_s28 }
 0x28d   : > { %v3760_v32 = vpop.eup %3207 }
 0x28e   : > { %v805_v29 = vsel %vm780_vm4, %v3760_v32, 0.0  ;;  %v3767_v35 = vpop.eup %3209 }
 0x28f   : > { %v802_v36 = vsel %vm780_vm4, %v3767_v35, 0.0 }
 0x291   : > { %3181 = vrot.lane.b32.xlu0 %v3671_v10, %s3304_s28 }
 0x2ac   : > { %1505 = vmax.xlane.f32.xlu1 %v1504_v30 }
 0x2b0   : > { %800 = vadd.xlane.f32.xlu0 %v799_v19 }
 0x2b4   : > { %806 = vadd.xlane.f32.xlu0 %v805_v29 }
 0x2bd   : > { %3186 = vrot.lane.b32.xlu1 %v3671_v10, %s3303_s24 }
 0x2e1   : > { %803 = vadd.xlane.f32.xlu1 %v802_v36 }
 0x2ec   : > { %v1015_v37 = vpop.xlane.xlu1 %1014 }
 0x2ed   : > { %v1022_v38 = vsub.f32 %v3699_v34, %v1015_v37 }
 0x2ef   : > { %v1025_v40 = vmul.f32 1.442695, %v1022_v38 }
 0x2f0   : > { %v1018_v41 = vpop.xlane.xlu0 %1017 }
 0x2f1   : > { %3211 = vpow2.f32 %v1025_v40  ;;  %v1023_v42 = vsub.f32 %v3705_v39, %v1018_v41 }
 0x2f3   : > { %v1027_v43 = vmul.f32 1.442695, %v1023_v42 }
 0x2f4   : > { %v1021_v45 = vpop.xlane.xlu1 %1020 }
 0x2f5   : > { %3213 = vpow2.f32 %v1027_v43  ;;  %v1024_v24 = vsub.f32 %v3711_v44, %v1021_v45 }
 0x2f7   : > { %v1029_v46 = vmul.f32 1.442695, %v1024_v24 }
 0x2f8   : > { %v1259_v47 = vpop.xlane.xlu0 %1258 }
 0x2f9   : > { %3215 = vpow2.f32 %v1029_v46  ;;  %v1266_v48 = vsub.f32 %v3717_v49, %v1259_v47 }
 0x2fb   : > { %v3775_v50 = vpop.eup %3211  ;;  %v1269_v51 = vmul.f32 1.442695, %v1266_v48 }
 0x2fc   : > { %v1262_v52 = vpop.xlane.xlu1 %1261  ;;  %v1031_v34 = vsel %vm780_vm4, %v3775_v50, 0.0 }
 0x2fd   : > { %3217 = vpow2.f32 %v1269_v51  ;;  %v1267_v39 = vsub.f32 %v3723_v54, %v1262_v52  ;;  %1032 = vadd.xlane.f32.xlu1 %v1031_v34 }
 0x2ff   : > { %v3780_v53 = vpop.eup %3213  ;;  %v1271_v55 = vmul.f32 1.442695, %v1267_v39 }
 0x300   : > { %v1265_v44 = vpop.xlane.xlu0 %1264  ;;  %v1034_v56 = vsel %vm780_vm4, %v3780_v53, 0.0 }
 0x301   : > { %3219 = vpow2.f32 %v1271_v55  ;;  %v1268_v49 = vsub.f32 %v3729_v59, %v1265_v44  ;;  %1035 = vadd.xlane.f32.xlu0 %v1034_v56 }
 0x303   : > { %v3785_v57 = vpop.eup %3215  ;;  %v1273_v58 = vmul.f32 1.442695, %v1268_v49 }
 0x304   : > { %v1500_v60 = vpop.xlane.xlu1 %1499  ;;  %v1037_v61 = vsel %vm780_vm4, %v3785_v57, 0.0 }
 0x305   : > { %3221 = vpow2.f32 %v1273_v58  ;;  %v1507_v54 = vsub.f32 %v3735_v0, %v1500_v60  ;;  %1038 = vadd.xlane.f32.xlu1 %v1037_v61 }
 0x307   : > { %v3790_v62 = vpop.eup %3217  ;;  %v1510_v63 = vmul.f32 1.442695, %v1507_v54 }
 0x308   : > { %v1275_v1 = vsel %vm780_vm4, %v3790_v62, 0.0  ;;  %v1503_v13 = vpop.xlane.xlu0 %1502  ;;  %v1054_v20 = vpop.permute.xlu1 %1053 }
 0x309   : > { %3223 = vpow2.f32 %v1510_v63  ;;  %1276 = vadd.xlane.f32.xlu0 %v1275_v1  ;;  %v1508_v14 = vsub.f32 %v3741_v6, %v1503_v13 }
 0x30b   : > { %v3794_v59 = vpop.eup %3219  ;;  %v1512_v18 = vmul.f32 1.442695, %v1508_v14 }
 0x30c   : > { %v1278_v2 = vsel %vm780_vm4, %v3794_v59, 0.0  ;;  %v3182_v21 = vpop.permute.xlu0 %3181 }
 0x30d   : > { %1279 = vadd.xlane.f32.xlu1 %v1278_v2  ;;  %3225 = vpow2.f32 %v1512_v18  ;;  %v3184_v19 = vunpack.i.h.bf16 %v3182_v21  ;;  %v3183_v29 = vunpack.i.l.bf16 %v3182_v21 }
 0x30f   : > { %v3798_v4 = vpop.eup %3221 }
 0x310   : > { %v1281_v0 = vsel %vm780_vm4, %v3798_v4, 0.0 }
 0x311   : > { %1282 = vadd.xlane.f32.xlu1 %v1281_v0 }
 0x313   : > { %v3802_v5 = vpop.eup %3223 }
 0x314   : > { %v1516_v9 = vsel %vm780_vm4, %v3802_v5, 0.0 }
 0x315   : > { %1517 = vadd.xlane.f32.xlu1 %v1516_v9 }
 0x317   : > { %v3809_v23 = vpop.eup %3225 }
 0x318   : > { %v1519_v30 = vsel %vm780_vm4, %v3809_v23, 0.0 }
 0x31f   : > { %1294 = vrot.lane.b32.xlu0 %v3673_v11, %s3303_s24 }
 0x339   : > { %v1506_v15 = vpop.xlane.xlu1 %1505 }
 0x33a   : > { %v1509_v25 = vsub.f32 %v3752_v28, %v1506_v15  ;;  %v2982_v28 = vpack.c.bf16 %v3184_v19, %v3183_v29 }
 0x33c   : > { %v1514_v26 = vmul.f32 1.442695, %v1509_v25 }
 0x33d   : > { %v801_v27 = vpop.xlane.xlu0 %800 }
 0x33e   : > { %3227 = vpow2.f32 %v1514_v26  ;;  %1520 = vadd.xlane.f32.xlu0 %v1519_v30 }
 0x33f   : > { %3229 = vrcp.f32 %v801_v27 }
 0x341   : > { %v807_v37 = vpop.xlane.xlu0 %806 }
 0x348   : > { %v3814_v6 = vpop.eup %3227 }
 0x349   : > { %v3230_v12 = vpop.eup %3229  ;;  %v1522_v33 = vsel %vm780_vm4, %v3814_v6, 0.0 }
 0x34a   : > { %v811_v36 = vmul.f32 %v3230_v12, %v3756_v31  ;;  %1523 = vadd.xlane.f32.xlu1 %v1522_v33  ;;  %v3187_v31 = vpop.permute.xlu1 %3186  ;;  %v1677_v33 = vld [vmem:[%s4427_s3 + $0x8] sm:$0xff] }
 0x34b   : > { %v3189_v24 = vunpack.i.h.bf16 %v3187_v31 }
 0x34c   : > { %2775 = vmatmul.mubr.msk.f32.vlgmr.msra.gmra.mrb[12].mxu1 %vm780_vm4, %v811_v36  ;;  %v1678_v36 = vld [vmem:[%s4427_s3 + $0x10] sm:$0xff] }
 0x34d   : > { %2983 = vmatpush3.bf16.msra.mxu1 %v2982_v28  ;;  %2777 = vmatprep.mubr.msk.f32.mxu1 %vm3302_vm0, %v3300_v7 }
 0x34e   : > { %2802 = vmatprep.subr.mxu1 %v3300_v7 }
 0x351   : > { %2803 = vmatpush3.msra.mxu1 %v1054_v20 }
 0x352   : > { %2988 = vmatprep.subr.bf16.mxu1 %v3301_v8 }
 0x354   : > { %1535 = vrot.lane.b32.xlu0 %v3673_v11, %s3305_s29 }
 0x35b   : > { %3191 = vrot.lane.b32.xlu1 %v3671_v10, %s3305_s29 }
 0x36e   : > { %v804_v38 = vpop.xlane.xlu1 %803 }
 0x36f   : > { %3231 = vrcp.f32 %v804_v38 }
 0x370   : > { %3233 = vrcp.f32 %v807_v37 }
 0x379   : > { %v3232_v40 = vpop.eup %3231 }
 0x37a   : > { %v812_v41 = vmul.f32 %v3232_v40, %v3767_v35  ;;  %v3234_v42 = vpop.eup %3233  ;;  %v3188_v35 = vunpack.i.l.bf16 %v3187_v31  ;;  %v1679_v31 = vld [vmem:[%s4427_s3 + $0x18] sm:$0xff] }
 0x37b   : > { %v813_v43 = vmul.f32 %v3234_v42, %v3760_v32  ;;  %v3002_v40 = vpack.c.bf16 %v1679_v31, %v1678_v36  ;;  %v1681_v42 = vld [vmem:[%s4427_s3 + $0x28] sm:$0xff] }
 0x37c   : > { %2778 = vmatmul.mubr.msk.f32.gmra.mrb[14].mxu1 %vm780_vm4, %v812_v41  ;;  %v2989_v51 = vpack.c.bf16 %v3189_v24, %v3188_v35  ;;  %v1680_v41 = vld [vmem:[%s4427_s3 + $0x20] sm:$0xff]  ;;  %v1683_v24 = vld [vmem:[%s4427_s3 + $0x38] sm:$0xff] }
 0x37d   : > { %2780 = vmatprep.mubr.msk.f32.mxu1 %vm3302_vm0, %v3300_v7 }
 0x380   : > { %2781 = vmatmul.mubr.msk.f32.gmra.mrb[16].mxu1 %vm780_vm4, %v813_v43 }
 0x381   : > { %2804 = vmatprep.mubr.msk.f32.mxu1 %vm3302_vm0, %v3300_v7 }
 0x38a   : > { %v1033_v10 = vpop.xlane.xlu1 %1032 }
 0x38b   : > { %3235 = vrcp.f32 %v1033_v10 }
 0x38e   : > { %v1036_v11 = vpop.xlane.xlu0 %1035 }
 0x38f   : > { %3237 = vrcp.f32 %v1036_v11  ;;  %v3005_v11 = vpack.c.bf16 %v1681_v42, %v1680_v41  ;;  %v3290_v42 = vld [vmem:[%s3540_s30 + $0x8] sm:$0xff] }
 0x392   : > { %v1039_v45 = vpop.xlane.xlu1 %1038 }
 0x393   : > { %3239 = vrcp.f32 %v1039_v45  ;;  %v1682_v45 = vld [vmem:[%s4427_s3 + $0x30] sm:$0xff] }
 0x395   : > { %v3236_v46 = vpop.eup %3235 }
 0x396   : > { %v1043_v47 = vmul.f32 %v3236_v46, %v3775_v50  ;;  %v1277_v48 = vpop.xlane.xlu0 %1276 }
 0x397   : > { %3241 = vrcp.f32 %v1277_v48  ;;  %v3008_v48 = vpack.c.bf16 %v1683_v24, %v1682_v45  ;;  %v3291_v24 = vld [vmem:[%s3540_s30 + $0x10] sm:$0xff] }
 0x398   : > { %2805 = vmatmul.mubr.msk.f32.vlgmr.msra.gmra.mrb[18].mxu1 %vm780_vm4, %v1043_v47 }
 0x399   : > { %v3238_v32 = vpop.eup %3237  ;;  %2990 = vmatpush3.bf16.msra.mxu1 %v2989_v51  ;;  %2807 = vmatprep.mubr.msk.f32.mxu1 %vm3302_vm0, %v3300_v7  ;;  %v1684_v51 = vld [vmem:[%s4427_s3 + $0x40] sm:$0xff] }
 0x39a   : > { %v1280_v52 = vpop.xlane.xlu1 %1279  ;;  %v1295_v34 = vpop.permute.xlu0 %1294  ;;  %2832 = vmatprep.subr.mxu1 %v3300_v7  ;;  %v1044_v39 = vmul.f32 %v3238_v32, %v3780_v53  ;;  %v1685_v32 = vld [vmem:[%s4427_s3 + $0x48] sm:$0xff] }
 0x39b   : > { %3243 = vrcp.f32 %v1280_v52 }
 0x39c   : > { %2808 = vmatmul.mubr.msk.f32.gmra.mrb[20].mxu1 %vm780_vm4, %v1044_v39  ;;  %v3011_v39 = vpack.c.bf16 %v1685_v32, %v1684_v51  ;;  %v1843_v32 = vld [vmem:[%s4431_s7 + $0x38] sm:$0xff] }
 0x39d   : > { %v3240_v50 = vpop.eup %3239  ;;  %2833 = vmatpush3.msra.mxu1 %v1295_v34  ;;  %2810 = vmatprep.mubr.msk.f32.mxu1 %vm3302_vm0, %v3300_v7 }
 0x39e   : > { %v1283_v55 = vpop.xlane.xlu1 %1282  ;;  %v1045_v44 = vmul.f32 %v3240_v50, %v3785_v57  ;;  %2995 = vmatprep.subr.bf16.mxu1 %v3301_v8  ;;  %v1686_v50 = vld [vmem:[%s4427_s3 + $0x50] sm:$0xff] }
 0x39f   : > { %3245 = vrcp.f32 %v1283_v55  ;;  %v1687_v55 = vld [vmem:[%s4427_s3 + $0x58] sm:$0xff] }
 0x3a0   : > { %2811 = vmatmul.mubr.msk.f32.gmra.mrb[22].mxu1 %vm780_vm4, %v1045_v44  ;;  %v3014_v44 = vpack.c.bf16 %v1687_v55, %v1686_v50  ;;  %v1838_v55 = vld [vmem:[%s4431_s7 + $0x10] sm:$0xff] }
 0x3a1   : > { %v3242_v56 = vpop.eup %3241  ;;  %2834 = vmatprep.mubr.msk.f32.mxu1 %vm3302_vm0, %v3300_v7 }
 0x3a2   : > { %v1287_v53 = vmul.f32 %v3242_v56, %v3790_v62  ;;  %v1518_v61 = vpop.xlane.xlu1 %1517  ;;  %v1688_v56 = vld [vmem:[%s4427_s3 + $0x60] sm:$0xff] }
 0x3a3   : > { %3247 = vrcp.f32 %v1518_v61 }
 0x3a4   : > { %2835 = vmatmul.mubr.msk.f32.vlgmr.msra.gmra.mrb[24].mxu1 %vm780_vm4, %v1287_v53  ;;  %v1689_v53 = vld [vmem:[%s4427_s3 + $0x68] sm:$0xff] }
 0x3a5   : > { %v3244_v49 = vpop.eup %3243  ;;  %2837 = vmatprep.mubr.msk.f32.mxu1 %vm3302_vm0, %v3300_v7 }
 0x3a6   : > { %v1288_v58 = vmul.f32 %v3244_v49, %v3794_v59  ;;  %v3017_v49 = vpack.c.bf16 %v1689_v53, %v1688_v56  ;;  %v1845_v56 = vld [vmem:[%s4431_s7 + $0x48] sm:$0xff] }
 0x3a8   : > { %2838 = vmatmul.mubr.msk.f32.gmra.mrb[26].mxu1 %vm780_vm4, %v1288_v58  ;;  %v1690_v58 = vld [vmem:[%s4427_s3 + $0x70] sm:$0xff] }
 0x3a9   : > { %v3246_v57 = vpop.eup %3245  ;;  %2840 = vmatprep.mubr.msk.f32.mxu1 %vm3302_vm0, %v3300_v7 }
 0x3aa   : > { %v1289_v60 = vmul.f32 %v3246_v57, %v3798_v4  ;;  %v1691_v57 = vld [vmem:[%s4427_s3 + $0x78] sm:$0xff] }
 0x3ac   : > { %2841 = vmatmul.mubr.msk.f32.gmra.mrb[28].mxu1 %vm780_vm4, %v1289_v60  ;;  %v3020_v60 = vpack.c.bf16 %v1691_v57, %v1690_v58  ;;  %v1847_v58 = vld [vmem:[%s4431_s7 + $0x58] sm:$0xff] }
 0x3ad   : > { %2864 = vmatprep.mubr.msk.f32.mxu1 %vm3302_vm0, %v3300_v7  ;;  %v3248_v0 = vpop.eup %3247  ;;  %v1851_v57 = vld [vmem:[%s4431_s7 + $0x78] sm:$0xff] }
 0x3ae   : > { %v1528_v4 = vmul.f32 %v3248_v0, %v3802_v5 }
 0x3cb   : > { %v1521_v54 = vpop.xlane.xlu0 %1520 }
 0x3cc   : > { %3249 = vrcp.f32 %v1521_v54 }
 0x3cf   : > { %v1536_v9 = vpop.permute.xlu0 %1535 }
 0x3d6   : > { %v3250_v13 = vpop.eup %3249 }
 0x3d7   : > { %v1524_v62 = vpop.xlane.xlu1 %1523  ;;  %v1529_v14 = vmul.f32 %v3250_v13, %v3809_v23 }
 0x3d8   : > { %3251 = vrcp.f32 %v1524_v62 }
 0x3db   : > { %v3192_v63 = vpop.permute.xlu1 %3191 }
 0x3dc   : > { %v3194_v1 = vunpack.i.h.bf16 %v3192_v63  ;;  %v3193_v59 = vunpack.i.l.bf16 %v3192_v63 }
 0x3de   : > { %v2996_v2 = vpack.c.bf16 %v3194_v1, %v3193_v59 }
 0x3e0   : > { %2997 = vmatpush3.bf16.msra.mxu1 %v2996_v2 }
 0x3e1   : > { %2862 = vmatprep.subr.mxu1 %v3300_v7 }
 0x3e2   : > { %v3252_v18 = vpop.eup %3251 }
 0x3e3   : > { %v1530_v20 = vmul.f32 %v3252_v18, %v3814_v6  ;;  %v1676_v6 = vld [vmem:[%s4427_s3] sm:$0xff] }
 0x3e4   : > { %2863 = vmatpush3.msra.mxu1 %v1536_v9  ;;  %v2999_v28 = vpack.c.bf16 %v1677_v33, %v1676_v6  ;;  %v2536_v33 = vld [vmem:[%s4428_s4] ss:$0 sm:$0xff] }
 0x3e5   : > { %2865 = vmatmul.mubr.msk.f32.vlgmr.msra.gmra.mrb[30].mxu1 %vm780_vm4, %v1528_v4 }
 0x3e6   : > { %2867 = vmatprep.mubr.msk.f32.mxu1 %vm3302_vm0, %v3300_v7  ;;  %3000 = vmatpush3.bf16.msra.mxu0 %v2999_v28 }
 0x3e7   : > { %3001 = vmatprep.subr.bf16.mxu0 %v3301_v8 }
 0x3e9   : > { %2868 = vmatmul.mubr.msk.f32.gmra.mrb[32].mxu1 %vm780_vm4, %v1529_v14 }
 0x3ea   : > { %2870 = vmatprep.mubr.msk.f32.mxu1 %vm3302_vm0, %v3300_v7  ;;  %3003 = vmatpush3.bf16.msra.mxu0 %v3002_v40 }
 0x3eb   : > { %3004 = vmatprep.subr.bf16.mxu0 %v3301_v8 }
 0x3ed   : > { %2871 = vmatmul.mubr.msk.f32.gmra.mrb[34].mxu1 %vm780_vm4, %v1530_v20 }
 0x3ee   : > { %1986 = vmatprep.mubr.f32.mxu1 %v3300_v7  ;;  %3006 = vmatpush3.bf16.msra.mxu0 %v3005_v11 }
 0x3ef   : > { %3007 = vmatprep.subr.bf16.mxu0 %v3301_v8 }
 0x3f2   : > { %3009 = vmatpush3.bf16.msra.mxu0 %v3008_v48  ;;  %v1839_v48 = vld [vmem:[%s4431_s7 + $0x18] sm:$0xff] }
 0x3f3   : > { %3010 = vmatprep.subr.bf16.mxu0 %v3301_v8 }
 0x3f6   : > { %3012 = vmatpush3.bf16.msra.mxu0 %v3011_v39  ;;  %v3054_v39 = vpack.c.bf16 %v1843_v32, %v1839_v48  ;;  %v1873_v48 = vld [vmem:[%s4431_s7 + $0x128] sm:$0xff] }
 0x3f7   : > { %3013 = vmatprep.subr.bf16.mxu0 %v3301_v8 }
 0x3fa   : > { %3015 = vmatpush3.bf16.msra.mxu0 %v3014_v44  ;;  %v1842_v44 = vld [vmem:[%s4431_s7 + $0x30] sm:$0xff] }
 0x3fb   : > { %3016 = vmatprep.subr.bf16.mxu0 %v3301_v8  ;;  %v3056_v53 = vpack.c.bf16 %v1842_v44, %v1838_v55  ;;  %v1870_v44 = vld [vmem:[%s4431_s7 + $0x110] sm:$0xff] }
 0x3fe   : > { %3018 = vmatpush3.bf16.msra.mxu0 %v3017_v49  ;;  %v1849_v49 = vld [vmem:[%s4431_s7 + $0x68] sm:$0xff] }
 0x3ff   : > { %3019 = vmatprep.subr.bf16.mxu0 %v3301_v8 }
 0x402   : > { %3021 = vmatpush3.bf16.msra.mxu0 %v3020_v60  ;;  %v3026_v60 = vpack.c.bf16 %v1849_v49, %v1845_v56  ;;  %v1874_v56 = vld [vmem:[%s4431_s7 + $0x130] sm:$0xff]  ;;  %v1877_v49 = vld [vmem:[%s4431_s7 + $0x148] sm:$0xff] }
 0x403   : > { %3055 = vmatprep.subr.bf16.mxu0 %v3054_v39  ;;  %v1872_v39 = vld [vmem:[%s4431_s7 + $0x120] sm:$0xff] }
 0x41f   : > { %v3874_v5 = vpop.f32.mrb[12].mxu1 }
 0x420   : > { %v2776_v21 = vpop.f32.mrb[13].mxu1 }
 0x44f   : > { %v3876_v15 = vpop.f32.mrb[14].mxu1 }
 0x450   : > { %v2779_v25 = vpop.f32.mrb[15].mxu1 }
 0x453   : > { %v3878_v26 = vpop.f32.mrb[16].mxu1 }
 0x454   : > { %v2782_v23 = vpop.f32.mrb[17].mxu1 }
 0x46b   : > { %v1133_v27 = vpop.f32.mrb[18].mxu1 }
 0x46c   : > { %v2806_v30 = vpop.f32.mrb[19].mxu1 }
 0x46f   : > { %v1138_v19 = vpop.f32.mrb[20].mxu1 }
 0x470   : > { %v3195_v29 = vpack.i.bf16 %v1138_v19, %v1133_v27  ;;  %v2809_v12 = vpop.f32.mrb[21].mxu1 }
 0x472   : > { %3196 = vrot.lane.b32.xlu0 %v3195_v29, %s3305_s29 }
 0x473   : > { %v1143_v37 = vpop.f32.mrb[22].mxu1 }
 0x474   : > { %v2812_v38 = vpop.f32.mrb[23].mxu1 }
 0x477   : > { %v1374_v43 = vpop.f32.mrb[24].mxu1 }
 0x478   : > { %v2836_v10 = vpop.f32.mrb[25].mxu1 }
 0x47b   : > { %v1379_v35 = vpop.f32.mrb[26].mxu1 }
 0x47c   : > { %v3200_v46 = vpack.i.bf16 %v1379_v35, %v1374_v43  ;;  %v2839_v47 = vpop.f32.mrb[27].mxu1 }
 0x47d   : > { %v1841_v47 = vld [vmem:[%s4431_s7 + $0x28] sm:$0xff] }
 0x47e   : > { %3201 = vrot.lane.b32.xlu0 %v3200_v46, %s3303_s24  ;;  %v1837_v46 = vld [vmem:[%s4431_s7 + $0x8] sm:$0xff] }
 0x47f   : > { %v1384_v52 = vpop.f32.mrb[28].mxu1  ;;  %v3022_v51 = vpack.c.bf16 %v1841_v47, %v1837_v46  ;;  %v1869_v47 = vld [vmem:[%s4431_s7 + $0x108] sm:$0xff] }
 0x480   : > { %v2842_v34 = vpop.f32.mrb[29].mxu1  ;;  %v3038_v32 = vpack.c.bf16 %v1873_v48, %v1869_v47 }
 0x481   : > { %v1840_v34 = vld [vmem:[%s4431_s7 + $0x20] sm:$0xff]  ;;  %3023 = vmatprep.subr.bf16.mxu1 %v3022_v51  ;;  %v1871_v51 = vld [vmem:[%s4431_s7 + $0x118] sm:$0xff] }
 0x4b8   : > { %v1615_v61 = vpop.f32.mrb[30].mxu1 }
 0x4b9   : > { %1656 = vrot.lane.b32.xlu1 %v1615_v61, %s3304_s28  ;;  %v2866_v54 = vpop.f32.mrb[31].mxu1  ;;  %v3058_v61 = vpack.c.bf16 %v1851_v57, %v1847_v58  ;;  %v1881_v58 = vld [vmem:[%s4431_s7 + $0x168] sm:$0xff]  ;;  %v1879_v57 = vld [vmem:[%s4431_s7 + $0x158] sm:$0xff] }
 0x4ba   : > { %v1844_v54 = vld [vmem:[%s4431_s7 + $0x40] sm:$0xff] }
 0x4bc   : > { %v1620_v62 = vpop.f32.mrb[32].mxu1 }
 0x4bd   : > { %1636 = vrot.lane.b32.xlu1 %v1143_v37, %s3305_s29  ;;  %1658 = vrot.lane.b32.xlu0 %v1620_v62, %s3304_s28  ;;  %v2869_v63 = vpop.f32.mrb[33].mxu1  ;;  %v3289_v37 = vld [vmem:[%s3540_s30] sm:$0xff] }
 0x4be   : > { %v1848_v62 = vld [vmem:[%s4431_s7 + $0x60] sm:$0xff]  ;;  %v1846_v63 = vld [vmem:[%s4431_s7 + $0x50] sm:$0xff] }
 0x4c0   : > { %v1625_v1 = vpop.f32.mrb[34].mxu1 }
 0x4c1   : > { %1648 = vrot.lane.b32.xlu0 %v1384_v52, %s3303_s24  ;;  %1660 = vrot.lane.b32.xlu1 %v1625_v1, %s3304_s28  ;;  %v2872_v59 = vpop.f32.mrb[35].mxu1  ;;  %v1836_v52 = vld [vmem:[%s4431_s7] sm:$0xff]  ;;  %v3028_v1 = vpack.c.bf16 %v1848_v62, %v1844_v54 }
 0x4c2   : > { %v3024_v50 = vpack.c.bf16 %v1840_v34, %v1836_v52  ;;  %v1850_v59 = vld [vmem:[%s4431_s7 + $0x70] sm:$0xff]  ;;  %v1875_v52 = vld [vmem:[%s4431_s7 + $0x138] sm:$0xff]  ;;  %v1868_v34 = vld [vmem:[%s4431_s7 + $0x100] sm:$0xff] }
 0x4c3   : > { %v3040_v55 = vpack.c.bf16 %v1872_v39, %v1868_v34  ;;  %v1876_v54 = vld [vmem:[%s4431_s7 + $0x140] sm:$0xff] }
 0x4c4   : > { %3025 = vmatpush1.bf16.msra.mxu1 %v3024_v50  ;;  %v3070_v50 = vpack.c.bf16 %v1875_v52, %v1871_v51  ;;  %v1880_v62 = vld [vmem:[%s4431_s7 + $0x160] sm:$0xff] }
 0x4c5   : > { %3027 = vmatprep.subr.bf16.mxu1 %v3026_v60  ;;  %v3042_v60 = vpack.c.bf16 %v1881_v58, %v1877_v49  ;;  %v2149_v49 = vld [vmem:[%s4433_s9 + $0x8] sm:$0xff]  ;;  %v2180_v58 = vld [vmem:[%s4433_s9 + $0x100] sm:$0xff] }
 0x4c8   : > { %3029 = vmatpush1.bf16.msra.mxu1 %v3028_v1  ;;  %v3044_v1 = vpack.c.bf16 %v1880_v62, %v1876_v54  ;;  %v2198_v54 = vld [vmem:[%s4433_s9 + $0x190] sm:$0xff]  ;;  %v2199_v62 = vld [vmem:[%s4433_s9 + $0x198] sm:$0xff] }
 0x4e4   : > { %v3197_v2 = vpop.permute.xlu0 %3196 }
 0x4e5   : > { %v3198_v8 = vunpack.i.l.bf16 %v3197_v2  ;;  %v3199_v9 = vunpack.i.h.bf16 %v3197_v2  ;;  %v1853_v2 = vld [vmem:[%s4431_s7 + $0x88] sm:$0xff] }
 0x4e7   : > { %v1665_v13 = vsel %vm675_vm1, %v3874_v5, %v3198_v8  ;;  %v1666_v25 = vsel %vm675_vm1, %v3876_v15, %v3199_v9  ;;  %v3060_v8 = vpack.c.bf16 %v1850_v59, %v1846_v63  ;;  %v1855_v9 = vld [vmem:[%s4431_s7 + $0x98] sm:$0xff]  ;;  %v1878_v59 = vld [vmem:[%s4431_s7 + $0x150] sm:$0xff] }
 0x4f0   : > { %v3202_v0 = vpop.permute.xlu0 %3201 }
 0x4f1   : > { %v3203_v4 = vunpack.i.l.bf16 %v3202_v0  ;;  %v3204_v14 = vunpack.i.h.bf16 %v3202_v0  ;;  %v1857_v0 = vld [vmem:[%s4431_s7 + $0xa8] sm:$0xff] }
 0x4f3   : > { %v1669_v18 = vsel %vm1668_vm5, %v1665_v13, %v3203_v4  ;;  %v1670_v30 = vsel %vm1668_vm5, %v1666_v25, %v3204_v14  ;;  %v3030_v4 = vpack.c.bf16 %v1857_v0, %v1853_v2  ;;  %v1859_v13 = vld [vmem:[%s4431_s7 + $0xb8] sm:$0xff]  ;;  %v1852_v14 = vld [vmem:[%s4431_s7 + $0x80] sm:$0xff]  ;;  %v1858_v25 = vld [vmem:[%s4431_s7 + $0xb0] sm:$0xff] }
 0x4f4   : > { %v1882_v2 = vld [vmem:[%s4431_s7 + $0x170] sm:$0xff] }
 0x4f5   : > { %3031 = vmatprep.subr.bf16.mxu1 %v3030_v4  ;;  %v3076_v0 = vpack.c.bf16 %v1882_v2, %v1878_v59  ;;  %v1889_v4 = vld [vmem:[%s4431_s7 + $0x1a8] sm:$0xff] }
 0x52b   : > { %v1657_v20 = vpop.permute.xlu1 %1656 }
 0x52c   : > { %v1673_v21 = vsel %vm1672_vm6, %v1669_v18, %v1657_v20  ;;  %v3062_v18 = vpack.c.bf16 %v1859_v13, %v1855_v9  ;;  %v1856_v20 = vld [vmem:[%s4431_s7 + $0xa0] sm:$0xff]  ;;  %v1887_v9 = vld [vmem:[%s4431_s7 + $0x198] sm:$0xff] }
 0x52d   : > { %2906 = vmatmul.mubr.f32.vlgmr.msra.gmra.mrb[24].mxu0 %v1673_v21  ;;  %v1854_v21 = vld [vmem:[%s4431_s7 + $0x90] sm:$0xff] }
 0x52e   : > { %2908 = vmatprep.mubr.msk.f32.mxu0 %vm3302_vm0, %v3300_v7  ;;  %3057 = vmatpush1.bf16.msra.mxu0 %v3056_v53  ;;  %v3072_v53 = vpack.c.bf16 %v1874_v56, %v1870_v44  ;;  %v2538_v56 = vld [vmem:[%s4430_s6] ss:$0 sm:$0xff] }
 0x52f   : > { %v1637_v23 = vpop.permute.xlu1 %1636  ;;  %v1659_v27 = vpop.permute.xlu0 %1658  ;;  %3059 = vmatprep.subr.bf16.mxu0 %v3058_v61  ;;  %v1883_v61 = vld [vmem:[%s4431_s7 + $0x178] sm:$0xff] }
 0x530   : > { %v1674_v5 = vsel %vm1672_vm6, %v1670_v30, %v1659_v27  ;;  %v1667_v19 = vsel %vm675_vm1, %v3878_v26, %v1637_v23  ;;  %v3032_v23 = vpack.c.bf16 %v1856_v20, %v1852_v14  ;;  %v3064_v27 = vpack.c.bf16 %v1858_v25, %v1854_v21  ;;  %v1891_v14 = vld [vmem:[%s4431_s7 + $0x1b8] sm:$0xff]  ;;  %v1888_v20 = vld [vmem:[%s4431_s7 + $0x1a0] sm:$0xff] }
 0x531   : > { %2909 = vmatmul.mubr.f32.gmra.mrb[26].mxu0 %v1674_v5  ;;  %v3074_v63 = vpack.c.bf16 %v1883_v61, %v1879_v57  ;;  %v3078_v21 = vpack.c.bf16 %v1891_v14, %v1887_v9  ;;  %v2166_v57 = vld [vmem:[%s4433_s9 + $0x90] sm:$0xff]  ;;  %v2167_v61 = vld [vmem:[%s4433_s9 + $0x98] sm:$0xff] }
 0x532   : > { %2911 = vmatprep.mubr.msk.f32.mxu0 %vm3302_vm0, %v3300_v7  ;;  %3061 = vmatpush1.bf16.msra.mxu0 %v3060_v8  ;;  %v1885_v8 = vld [vmem:[%s4431_s7 + $0x188] sm:$0xff]  ;;  %v3090_v9 = vpack.c.bf16 %v2167_v61, %v2166_v57  ;;  %v2182_v14 = vld [vmem:[%s4433_s9 + $0x110] sm:$0xff] }
 0x533   : > { %v1649_v29 = vpop.permute.xlu0 %1648  ;;  %v1661_v12 = vpop.permute.xlu1 %1660  ;;  %3063 = vmatprep.subr.bf16.mxu0 %v3062_v18  ;;  %3033 = vmatpush1.bf16.msra.mxu1 %v3032_v23  ;;  %v3046_v13 = vpack.c.bf16 %v1889_v4, %v1885_v8  ;;  %v1884_v18 = vld [vmem:[%s4431_s7 + $0x180] sm:$0xff]  ;;  %v1886_v23 = vld [vmem:[%s4431_s7 + $0x190] sm:$0xff]  ;;  %v2151_v4 = vld [vmem:[%s4433_s9 + $0x18] sm:$0xff] }
 0x534   : > { %v1671_v6 = vsel %vm1668_vm5, %v1667_v19, %v1649_v29  ;;  %v3048_v25 = vpack.c.bf16 %v1888_v20, %v1884_v18  ;;  %v2150_v8 = vld [vmem:[%s4433_s9 + $0x10] sm:$0xff]  ;;  %v2168_v18 = vld [vmem:[%s4433_s9 + $0xa0] sm:$0xff] }
 0x535   : > { %v1675_v15 = vsel %vm1672_vm6, %v1671_v6, %v1661_v12  ;;  %v2174_v57 = vld [vmem:[%s4433_s9 + $0xd0] sm:$0xff] }
 0x536   : > { %2912 = vmatmul.mubr.f32.gmra.mrb[28].mxu0 %v1675_v15  ;;  %v2206_v61 = vld [vmem:[%s4433_s9 + $0x1d0] sm:$0xff] }
 0x537   : > { %2069 = vmatprep.mubr.f32.mxu0 %v3300_v7  ;;  %3065 = vmatpush1.bf16.msra.mxu0 %v3064_v27  ;;  %v1890_v27 = vld [vmem:[%s4431_s7 + $0x1b0] sm:$0xff] }
 0x600   : > { %v1765_v36 = vpop.f32.mrb[24].mxu0 }
 0x601   : > { %v1766_v28 = vadd.f32 %v2536_v33, %v1765_v36  ;;  %v2907_v31 = vpop.f32.mrb[25].mxu0 }
 0x603   : > { %v3963_v26 = vadd.f32 %v3289_v37, %v1766_v28 }
 0x604   : > { %v1770_v38 = vpop.f32.mrb[26].mxu0 }
 0x605   : > { %v1771_v40 = vadd.f32 %v2536_v33, %v1770_v38  ;;  %1784 = vadd.xlane.f32.xlu0 %v3963_v26  ;;  %v2910_v41 = vpop.f32.mrb[27].mxu0  ;;  %v1865_v38 = vld [vmem:[%s4431_s7 + $0xe8] sm:$0xff] }
 0x607   : > { %v1780_v43 = vadd.f32 %v3290_v42, %v1771_v40  ;;  %v1863_v40 = vld [vmem:[%s4431_s7 + $0xd8] sm:$0xff] }
 0x608   : > { %v1867_v42 = vld [vmem:[%s4431_s7 + $0xf8] sm:$0xff] }
 0x609   : > { %1786 = vadd.xlane.f32.xlu1 %v1780_v43  ;;  %v1775_v10 = vpop.f32.mrb[28].mxu0 }
 0x60a   : > { %v1776_v11 = vadd.f32 %v2536_v33, %v1775_v10  ;;  %v2913_v45 = vpop.f32.mrb[29].mxu0  ;;  %v1864_v10 = vld [vmem:[%s4431_s7 + $0xe0] sm:$0xff] }
 0x60c   : > { %v1781_v35 = vadd.f32 %v3291_v24, %v1776_v11  ;;  %v3066_v11 = vpack.c.bf16 %v1867_v42, %v1863_v40  ;;  %v1862_v24 = vld [vmem:[%s4431_s7 + $0xd0] sm:$0xff]  ;;  %v2164_v42 = vld [vmem:[%s4433_s9 + $0x80] sm:$0xff] }
 0x60d   : > { %v1898_v40 = vld [vmem:[%s4431_s7 + $0x1f0] sm:$0xff] }
 0x60e   : > { %1788 = vadd.xlane.f32.xlu0 %v1781_v35  ;;  %3067 = vmatprep.subr.bf16.mxu0 %v3066_v11 }
 0x692   : > { %v1785_v30 = vpop.xlane.xlu0 %1784 }
 0x693   : > { %v1791_v5 = vmul.f32 0.0078125, %v1785_v30  ;;  %v3080_v30 = vpack.c.bf16 %v1890_v27, %v1886_v23  ;;  %v2201_v23 = vld [vmem:[%s4433_s9 + $0x1a8] sm:$0xff] }
 0x695   : > { %v4041_v19 = vsub.f32 %v3963_v26, %v1791_v5  ;;  %v1861_v26 = vld [vmem:[%s4431_s7 + $0xc8] sm:$0xff] }
 0x696   : > { %v1787_v29 = vpop.xlane.xlu1 %1786  ;;  %v3034_v41 = vpack.c.bf16 %v1865_v38, %v1861_v26  ;;  %v1893_v5 = vld [vmem:[%s4431_s7 + $0x1c8] sm:$0xff]  ;;  %v1894_v38 = vld [vmem:[%s4431_s7 + $0x1d0] sm:$0xff] }
 0x697   : > { %v1792_v12 = vmul.f32 0.0078125, %v1787_v29  ;;  %v1797_v6 = vmul.f32 %v4041_v19, %v4041_v19  ;;  %v1897_v29 = vld [vmem:[%s4431_s7 + $0x1e8] sm:$0xff] }
 0x698   : > { %3035 = vmatprep.subr.bf16.mxu1 %v3034_v41  ;;  %v3084_v41 = vpack.c.bf16 %v1898_v40, %v1894_v38 }
 0x699   : > { %v4045_v15 = vsub.f32 %v1780_v43, %v1792_v12  ;;  %1800 = vadd.xlane.f32.xlu0 %v1797_v6  ;;  %v1860_v43 = vld [vmem:[%s4431_s7 + $0xc0] sm:$0xff]  ;;  %v1895_v12 = vld [vmem:[%s4431_s7 + $0x1d8] sm:$0xff]  ;;  %v3050_v6 = vpack.c.bf16 %v1897_v29, %v1893_v5  ;;  %v3092_v5 = vpack.c.bf16 %v2151_v4, %v2150_v8  ;;  %v2190_v8 = vld [vmem:[%s4433_s9 + $0x150] sm:$0xff] }
 0x69a   : > { %v3036_v45 = vpack.c.bf16 %v1864_v10, %v1860_v43  ;;  %v2165_v43 = vld [vmem:[%s4433_s9 + $0x88] sm:$0xff]  ;;  %v2196_v10 = vld [vmem:[%s4433_s9 + $0x180] sm:$0xff]  ;;  %v2191_v4 = vld [vmem:[%s4433_s9 + $0x158] sm:$0xff] }
 0x69b   : > { %v1789_v33 = vpop.xlane.xlu0 %1788  ;;  %v1798_v36 = vmul.f32 %v4045_v15, %v4045_v15  ;;  %v3086_v11 = vpack.c.bf16 %v2165_v43, %v2164_v42  ;;  %v2170_v42 = vld [vmem:[%s4433_s9 + $0xb0] sm:$0xff] }
 0x69c   : > { %v1793_v28 = vmul.f32 0.0078125, %v1789_v33  ;;  %3037 = vmatpush1.bf16.msra.mxu1 %v3036_v45  ;;  %v1899_v33 = vld [vmem:[%s4431_s7 + $0x1f8] sm:$0xff]  ;;  %v2197_v45 = vld [vmem:[%s4433_s9 + $0x188] sm:$0xff]  ;;  %v2202_v43 = vld [vmem:[%s4433_s9 + $0x1b0] sm:$0xff] }
 0x69d   : > { %1802 = vadd.xlane.f32.xlu1 %v1798_v36  ;;  %3039 = vmatprep.subr.bf16.mxu1 %v3038_v32  ;;  %v1892_v36 = vld [vmem:[%s4431_s7 + $0x1c0] sm:$0xff] }
 0x69e   : > { %v4049_v31 = vsub.f32 %v1781_v35, %v1793_v28  ;;  %v1866_v35 = vld [vmem:[%s4431_s7 + $0xf0] sm:$0xff]  ;;  %v1896_v28 = vld [vmem:[%s4431_s7 + $0x1e0] sm:$0xff] }
 0x69f   : > { %v3068_v46 = vpack.c.bf16 %v1866_v35, %v1862_v24  ;;  %v3052_v26 = vpack.c.bf16 %v1896_v28, %v1892_v36  ;;  %v3118_v24 = vpack.c.bf16 %v2197_v45, %v2196_v10  ;;  %v2153_v28 = vld [vmem:[%s4433_s9 + $0x28] sm:$0xff]  ;;  %v2154_v45 = vld [vmem:[%s4433_s9 + $0x30] sm:$0xff] }
 0x6a0   : > { %v1799_v37 = vmul.f32 %v4049_v31, %v4049_v31  ;;  %3041 = vmatpush1.bf16.msra.mxu1 %v3040_v55  ;;  %v2537_v55 = vld [vmem:[%s4429_s5] ss:$0 sm:$0xff] }
 0x6a1   : > { %3069 = vmatpush1.bf16.msra.mxu0 %v3068_v46  ;;  %3043 = vmatprep.subr.bf16.mxu1 %v3042_v60 }
 0x6a2   : > { %1804 = vadd.xlane.f32.xlu0 %v1799_v37  ;;  %3071 = vmatprep.subr.bf16.mxu0 %v3070_v50  ;;  %v3082_v37 = vpack.c.bf16 %v1899_v33, %v1895_v12  ;;  %v2152_v12 = vld [vmem:[%s4433_s9 + $0x20] sm:$0xff] }
 0x6a3   : > { %v3096_v38 = vpack.c.bf16 %v2153_v28, %v2152_v12 }
 0x6a4   : > { %3045 = vmatpush1.bf16.msra.mxu1 %v3044_v1 }
 0x6a5   : > { %3073 = vmatpush1.bf16.msra.mxu0 %v3072_v53  ;;  %3047 = vmatprep.subr.bf16.mxu1 %v3046_v13  ;;  %v2148_v53 = vld [vmem:[%s4433_s9] sm:$0xff]  ;;  %v3122_v13 = vpack.c.bf16 %v2199_v62, %v2198_v54  ;;  %v2207_v62 = vld [vmem:[%s4433_s9 + $0x1d8] sm:$0xff] }
 0x6a6   : > { %3075 = vmatprep.subr.bf16.mxu0 %v3074_v63  ;;  %v3088_v2 = vpack.c.bf16 %v2149_v49, %v2148_v53  ;;  %v2188_v49 = vld [vmem:[%s4433_s9 + $0x140] sm:$0xff] }
 0x6a8   : > { %3049 = vmatpush1.bf16.msra.mxu1 %v3048_v25  ;;  %v2200_v25 = vld [vmem:[%s4433_s9 + $0x1a0] sm:$0xff] }
 0x6a9   : > { %3077 = vmatpush1.bf16.msra.mxu0 %v3076_v0  ;;  %3051 = vmatprep.subr.bf16.mxu1 %v3050_v6  ;;  %v3126_v36 = vpack.c.bf16 %v2201_v23, %v2200_v25  ;;  %v2161_v25 = vld [vmem:[%s4433_s9 + $0x68] sm:$0xff] }
 0x6aa   : > { %3079 = vmatprep.subr.bf16.mxu0 %v3078_v21  ;;  %v2169_v21 = vld [vmem:[%s4433_s9 + $0xa8] sm:$0xff] }
 0x6ab   : > { %v3094_v33 = vpack.c.bf16 %v2169_v21, %v2168_v18  ;;  %v2160_v21 = vld [vmem:[%s4433_s9 + $0x60] sm:$0xff] }
 0x6ac   : > { %3053 = vmatpush1.bf16.msra.mxu1 %v3052_v26  ;;  %v2185_v26 = vld [vmem:[%s4433_s9 + $0x128] sm:$0xff] }
 0x6ad   : > { %3081 = vmatpush1.bf16.msra.mxu0 %v3080_v30  ;;  %3087 = vmatprep.subr.bf16.mxu1 %v3086_v11  ;;  %v2203_v11 = vld [vmem:[%s4433_s9 + $0x1b8] sm:$0xff] }
 0x6ae   : > { %3083 = vmatprep.subr.bf16.mxu0 %v3082_v37  ;;  %v2184_v37 = vld [vmem:[%s4433_s9 + $0x120] sm:$0xff] }
 0x6af   : > { %v3128_v40 = vpack.c.bf16 %v2185_v26, %v2184_v37  ;;  %v2211_v37 = vld [vmem:[%s4433_s9 + $0x1f8] sm:$0xff]  ;;  %v2162_v26 = vld [vmem:[%s4433_s9 + $0x70] sm:$0xff] }
 0x6b1   : > { %3085 = vmatpush1.bf16.msra.mxu0 %v3084_v41 }
 0x6b2   : > { %3119 = vmatprep.subr.bf16.mxu0 %v3118_v24  ;;  %v2155_v24 = vld [vmem:[%s4433_s9 + $0x38] sm:$0xff] }
 0x726   : > { %v1801_v35 = vpop.xlane.xlu0 %1800 }
 0x727   : > { %v1806_v46 = vmul.f32 0.0078125, %v1801_v35  ;;  %v3130_v35 = vpack.c.bf16 %v2203_v11, %v2202_v43  ;;  %v1916_v11 = vsub.s32 3, %v3575_v16 }
 0x729   : > { %v1809_v47 = vadd.f32 1e-05, %v1806_v46  ;;  %v3100_v46 = vpack.c.bf16 %v2155_v24, %v2154_v45 }
 0x72a   : > { %v1803_v48 = vpop.xlane.xlu1 %1802 }
 0x72b   : > { %3253 = vrsqrt.f32 %v1809_v47  ;;  %v1807_v51 = vmul.f32 0.0078125, %v1803_v48  ;;  %v2186_v47 = vld [vmem:[%s4433_s9 + $0x130] sm:$0xff]  ;;  %v2187_v48 = vld [vmem:[%s4433_s9 + $0x138] sm:$0xff] }
 0x72d   : > { %v1810_v32 = vadd.f32 1e-05, %v1807_v51  ;;  %v3132_v51 = vpack.c.bf16 %v2187_v48, %v2186_v47 }
 0x72f   : > { %3255 = vrsqrt.f32 %v1810_v32  ;;  %v1805_v52 = vpop.xlane.xlu0 %1804  ;;  %v2172_v32 = vld [vmem:[%s4433_s9 + $0xc0] sm:$0xff] }
 0x730   : > { %v1808_v34 = vmul.f32 0.0078125, %v1805_v52  ;;  %v2173_v52 = vld [vmem:[%s4433_s9 + $0xc8] sm:$0xff] }
 0x732   : > { %v1811_v39 = vadd.f32 1e-05, %v1808_v34  ;;  %v2204_v34 = vld [vmem:[%s4433_s9 + $0x1c0] sm:$0xff] }
 0x734   : > { %3257 = vrsqrt.f32 %v1811_v39  ;;  %v3102_v39 = vpack.c.bf16 %v2173_v52, %v2172_v32 }
 0x735   : > { %v3254_v50 = vpop.eup %3253 }
 0x736   : > { %v1815_v44 = vmul.f32 %v3254_v50, %v4041_v19  ;;  %v2181_v19 = vld [vmem:[%s4433_s9 + $0x108] sm:$0xff] }
 0x737   : > { %v3120_v0 = vpack.c.bf16 %v2181_v19, %v2180_v58  ;;  %v2205_v50 = vld [vmem:[%s4433_s9 + $0x1c8] sm:$0xff] }
 0x738   : > { %v1824_v60 = vmul.f32 %v2537_v55, %v1815_v44  ;;  %v2157_v44 = vld [vmem:[%s4433_s9 + $0x48] sm:$0xff] }
 0x739   : > { %v3256_v63 = vpop.eup %3255  ;;  %v2189_v58 = vld [vmem:[%s4433_s9 + $0x148] sm:$0xff] }
 0x73a   : > { %v4216_v1 = vadd.f32 %v2538_v56, %v1824_v60  ;;  %v1816_v59 = vmul.f32 %v3256_v63, %v4045_v15  ;;  %v2183_v15 = vld [vmem:[%s4433_s9 + $0x118] sm:$0xff]  ;;  %v3136_v19 = vpack.c.bf16 %v2189_v58, %v2188_v49  ;;  %v2158_v63 = vld [vmem:[%s4433_s9 + $0x50] sm:$0xff] }
 0x73b   : > { %v3124_v29 = vpack.c.bf16 %v2183_v15, %v2182_v14  ;;  %v2175_v60 = vld [vmem:[%s4433_s9 + $0xd8] sm:$0xff]  ;;  %v2177_v14 = vld [vmem:[%s4433_s9 + $0xe8] sm:$0xff]  ;;  %v2208_v15 = vld [vmem:[%s4433_s9 + $0x1e0] sm:$0xff] }
 0x73c   : > { %1987 = vmatmul.mubr.f32.vlgmr.msra.gmra.mrb[36].mxu1 %v4216_v1  ;;  %2070 = vmatmul.mubr.f32.vlgmr.msra.gmra.mrb[30].mxu0 %v4216_v1  ;;  %v1825_v20 = vmul.f32 %v2537_v55, %v1816_v59  ;;  %v3106_v54 = vpack.c.bf16 %v2175_v60, %v2174_v57  ;;  %v2159_v59 = vld [vmem:[%s4433_s9 + $0x58] sm:$0xff] }
 0x73d   : > { %1992 = vmatprep.mubr.f32.mxu1 %v3300_v7  ;;  %2075 = vmatprep.mubr.f32.mxu0 %v3300_v7 }
 0x73e   : > { %v3258_v27 = vpop.eup %3257  ;;  %v4247_v30 = vadd.f32 %v2538_v56, %v1825_v20  ;;  %3089 = vmatpush3.bf16.msra.mxu1 %v3088_v2  ;;  %3121 = vmatpush3.bf16.msra.mxu0 %v3120_v0  ;;  %v3138_v2 = vpack.c.bf16 %v2207_v62, %v2206_v61  ;;  %v3108_v0 = vpack.c.bf16 %v2159_v59, %v2158_v63  ;;  %v2209_v20 = vld [vmem:[%s4433_s9 + $0x1e8] sm:$0xff] }
 0x73f   : > { %v1817_v6 = vmul.f32 %v3258_v27, %v4049_v31  ;;  %3091 = vmatprep.subr.bf16.mxu1 %v3090_v9  ;;  %3123 = vmatprep.subr.bf16.mxu0 %v3122_v13  ;;  %v3140_v9 = vpack.c.bf16 %v2191_v4, %v2190_v8  ;;  %v2176_v13 = vld [vmem:[%s4433_s9 + $0xe0] sm:$0xff]  ;;  %v3142_v23 = vpack.c.bf16 %v2209_v20, %v2208_v15 }
 0x740   : > { %1993 = vmatmul.mubr.f32.gmra.mrb[38].mxu1 %v4247_v30  ;;  %2076 = vmatmul.mubr.f32.gmra.mrb[32].mxu0 %v4247_v30  ;;  %v3110_v18 = vpack.c.bf16 %v2177_v14, %v2176_v13  ;;  %v3112_v27 = vpack.c.bf16 %v2161_v25, %v2160_v21 }
 0x741   : > { %1998 = vmatprep.mubr.f32.mxu1 %v3300_v7  ;;  %2081 = vmatprep.mubr.f32.mxu0 %v3300_v7  ;;  %v1826_v31 = vmul.f32 %v2537_v55, %v1817_v6  ;;  %v2171_v7 = vld [vmem:[%s4433_s9 + $0xb8] sm:$0xff]  ;;  %v2156_v55 = vld [vmem:[%s4433_s9 + $0x40] sm:$0xff]  ;;  %v2178_v6 = vld [vmem:[%s4433_s9 + $0xf0] sm:$0xff] }
 0x742   : > { %3093 = vmatpush3.bf16.msra.mxu1 %v3092_v5  ;;  %3125 = vmatpush3.bf16.msra.mxu0 %v3124_v29  ;;  %v3098_v10 = vpack.c.bf16 %v2171_v7, %v2170_v42  ;;  %v3104_v53 = vpack.c.bf16 %v2157_v44, %v2156_v55  ;;  %v2192_v5 = vld [vmem:[%s4433_s9 + $0x160] sm:$0xff]  ;;  %v2193_v29 = vld [vmem:[%s4433_s9 + $0x168] sm:$0xff]  ;;  %v2194_v42 = vld [vmem:[%s4433_s9 + $0x170] sm:$0xff] }
 0x743   : > { %v4266_v41 = vadd.f32 %v2538_v56, %v1826_v31  ;;  %3095 = vmatprep.subr.bf16.mxu1 %v3094_v33  ;;  %3127 = vmatprep.subr.bf16.mxu0 %v3126_v36  ;;  %v3134_v56 = vpack.c.bf16 %v2205_v50, %v2204_v34  ;;  %v3144_v12 = vpack.c.bf16 %v2193_v29, %v2192_v5  ;;  %v2179_v33 = vld [vmem:[%s4433_s9 + $0xf8] sm:$0xff]  ;;  %v2210_v36 = vld [vmem:[%s4433_s9 + $0x1f0] sm:$0xff] }
 0x744   : > { %v3114_v28 = vpack.c.bf16 %v2179_v33, %v2178_v6  ;;  %v2163_v31 = vld [vmem:[%s4433_s9 + $0x78] sm:$0xff] }
 0x745   : > { %1999 = vmatmul.mubr.f32.gmra.mrb[40].mxu1 %v4266_v41  ;;  %2082 = vmatmul.mubr.f32.gmra.mrb[34].mxu0 %v4266_v41  ;;  %v2195_v7 = vld [vmem:[%s4433_s9 + $0x178] sm:$0xff] }
 0x746   : > { %3097 = vmatpush3.bf16.msra.mxu1 %v3096_v38  ;;  %3129 = vmatpush3.bf16.msra.mxu0 %v3128_v40  ;;  %v3146_v38 = vpack.c.bf16 %v2211_v37, %v2210_v36  ;;  %v3116_v40 = vpack.c.bf16 %v2163_v31, %v2162_v26  ;;  %v3148_v43 = vpack.c.bf16 %v2195_v7, %v2194_v42 }
 0x747   : > { %3099 = vmatprep.subr.bf16.mxu1 %v3098_v10  ;;  %3131 = vmatprep.subr.bf16.mxu0 %v3130_v35  ;;  %v1900_v10 = vld [vmem:[%s4432_s8] sm:$0xf] }
 0x748   : > { %v1905_v45 = vrot.slane %v1900_v10, %v496_v22  ;;  %v1913_v24 = vrot.slane %v1900_v10, %v504_v3  ;;  %v1909_v35 = vrot.slane %v1900_v10, %v500_v17 }
 0x74a   : > { %3101 = vmatpush3.bf16.msra.mxu1 %v3100_v46  ;;  %3133 = vmatpush3.bf16.msra.mxu0 %v3132_v51  ;;  %v1917_v46 = vrot.slane %v1900_v10, %v1916_v11 }
 0x74b   : > { %3103 = vmatprep.subr.bf16.mxu1 %v3102_v39  ;;  %3135 = vmatprep.subr.bf16.mxu0 %v3134_v56 }
 0x74e   : > { %3105 = vmatpush3.bf16.msra.mxu1 %v3104_v53  ;;  %3137 = vmatpush3.bf16.msra.mxu0 %v3136_v19 }
 0x74f   : > { %3107 = vmatprep.subr.bf16.mxu1 %v3106_v54  ;;  %3139 = vmatprep.subr.bf16.mxu0 %v3138_v2 }
 0x752   : > { %3109 = vmatpush3.bf16.msra.mxu1 %v3108_v0  ;;  %3141 = vmatpush3.bf16.msra.mxu0 %v3140_v9 }
 0x753   : > { %3111 = vmatprep.subr.bf16.mxu1 %v3110_v18  ;;  %3143 = vmatprep.subr.bf16.mxu0 %v3142_v23 }
 0x756   : > { %3113 = vmatpush3.bf16.msra.mxu1 %v3112_v27  ;;  %3145 = vmatpush3.bf16.msra.mxu0 %v3144_v12 }
 0x757   : > { %3115 = vmatprep.subr.bf16.mxu1 %v3114_v28  ;;  %3147 = vmatprep.subr.bf16.mxu0 %v3146_v38 }
 0x75a   : > { %3117 = vmatpush3.bf16.msra.mxu1 %v3116_v40  ;;  %3149 = vmatpush3.bf16.msra.mxu0 %v3148_v43 }
 0x80f   : > { %v1988_v47 = vpop.f32.mrb[36].mxu1  ;;  %v2071_v48 = vpop.f32.mrb[30].mxu0 }
 0x810   : > { %v1989_v51 = vadd.f32 %v1988_v47, %v1905_v45  ;;  %v2072_v32 = vadd.f32 %v2071_v48, %v1913_v24  ;;  %v1990_v52 = vpop.f32.mrb[37].mxu1  ;;  %v2073_v34 = vpop.f32.mrb[31].mxu0 }
 0x811   : > { %v1991_v39 = vadd.f32 %v1990_v52, %v1909_v35  ;;  %v2074_v50 = vadd.f32 %v2073_v34, %v1917_v46 }
 0x812   : > { %v2100_v55 = vmul.f32 0.70710677, %v1989_v51  ;;  %v2102_v44 = vmul.f32 0.70710677, %v2072_v32  ;;  %v2088_v33 = vmul.f32 0.5, %v1989_v51  ;;  %v2090_v26 = vmul.f32 0.5, %v2072_v32 }
 0x813   : > { %v2101_v56 = vmul.f32 0.70710677, %v1991_v39  ;;  %v2103_v53 = vmul.f32 0.70710677, %v2074_v50  ;;  %v1994_v22 = vpop.f32.mrb[38].mxu1  ;;  %v2077_v49 = vpop.f32.mrb[32].mxu0 }
 0x814   : > { %3259 = verf.f32 %v2100_v55  ;;  %v1995_v3 = vadd.f32 %v1994_v22, %v1905_v45  ;;  %v2078_v16 = vadd.f32 %v2077_v49, %v1913_v24  ;;  %v1996_v17 = vpop.f32.mrb[39].mxu1  ;;  %v2079_v58 = vpop.f32.mrb[33].mxu0  ;;  %v2089_v12 = vmul.f32 0.5, %v1991_v39 }
 0x815   : > { %3261 = verf.f32 %v2102_v44  ;;  %v1997_v19 = vadd.f32 %v1996_v17, %v1909_v35  ;;  %v2080_v57 = vadd.f32 %v2079_v58, %v1917_v46  ;;  %v2091_v36 = vmul.f32 0.5, %v2074_v50 }
 0x816   : > { %3263 = verf.f32 %v2101_v56  ;;  %v2104_v60 = vmul.f32 0.70710677, %v1995_v3  ;;  %v2106_v61 = vmul.f32 0.70710677, %v2078_v16  ;;  %v2094_v32 = vmul.f32 0.5, %v2078_v16 }
 0x817   : > { %3265 = verf.f32 %v2103_v53  ;;  %v2105_v54 = vmul.f32 0.70710677, %v1997_v19  ;;  %v2107_v62 = vmul.f32 0.70710677, %v2080_v57  ;;  %v2095_v47 = vmul.f32 0.5, %v2080_v57 }
 0x818   : > { %3267 = verf.f32 %v2104_v60  ;;  %v2000_v63 = vpop.f32.mrb[40].mxu1  ;;  %v2083_v59 = vpop.f32.mrb[34].mxu0 }
 0x819   : > { %3269 = verf.f32 %v2106_v61  ;;  %v2001_v2 = vadd.f32 %v2000_v63, %v1905_v45  ;;  %v4400_v0 = vadd.f32 %v2083_v59, %v1913_v24  ;;  %v2002_v8 = vpop.f32.mrb[41].mxu1  ;;  %v2085_v4 = vpop.f32.mrb[35].mxu0  ;;  %v2093_v24 = vmul.f32 0.5, %v1997_v19  ;;  %v2539_v59 = vld [vmem:[%s4434_s10] ss:$0 sm:$0xff] }
 0x81a   : > { %3271 = verf.f32 %v2105_v54  ;;  %v2003_v9 = vadd.f32 %v2002_v8, %v1909_v35  ;;  %v2086_v13 = vadd.f32 %v2085_v4, %v1917_v46  ;;  %v2092_v46 = vmul.f32 0.5, %v1995_v3 }
 0x81b   : > { %3273 = verf.f32 %v2107_v62  ;;  %v2108_v14 = vmul.f32 0.70710677, %v2001_v2  ;;  %v2110_v15 = vmul.f32 0.70710677, %v4400_v0  ;;  %v2096_v3 = vmul.f32 0.5, %v2001_v2 }
 0x81c   : > { %v2109_v18 = vmul.f32 0.70710677, %v2003_v9  ;;  %v2111_v21 = vmul.f32 0.70710677, %v2086_v13  ;;  %v2097_v49 = vmul.f32 0.5, %v2003_v9  ;;  %v2099_v58 = vmul.f32 0.5, %v2086_v13 }
 0x81d   : > { %3275 = verf.f32 %v2108_v14  ;;  %v2098_v16 = vmul.f32 0.5, %v4400_v0 }
 0x81e   : > { %v3260_v20 = vpop.eup %3259  ;;  %3277 = verf.f32 %v2110_v15 }
 0x81f   : > { %v3262_v25 = vpop.eup %3261  ;;  %v2124_v27 = vadd.f32 1.0, %v3260_v20  ;;  %3279 = verf.f32 %v2109_v18 }
 0x820   : > { %v3264_v23 = vpop.eup %3263  ;;  %v2126_v29 = vadd.f32 1.0, %v3262_v25  ;;  %3281 = verf.f32 %v2111_v21 }
 0x821   : > { %v3266_v5 = vpop.eup %3265  ;;  %v2125_v6 = vadd.f32 1.0, %v3264_v23  ;;  %v2136_v40 = vmul.f32 %v2124_v27, %v2088_v33 }
 0x822   : > { %v2127_v28 = vadd.f32 1.0, %v3266_v5  ;;  %v3268_v37 = vpop.eup %3267  ;;  %v2138_v43 = vmul.f32 %v2126_v29, %v2090_v26 }
 0x823   : > { %v2137_v31 = vmul.f32 %v2125_v6, %v2089_v12  ;;  %v3270_v38 = vpop.eup %3269  ;;  %v2128_v10 = vadd.f32 1.0, %v3268_v37 }
 0x824   : > { %v2139_v42 = vmul.f32 %v2127_v28, %v2091_v36  ;;  %v3272_v7 = vpop.eup %3271  ;;  %v2130_v45 = vadd.f32 1.0, %v3270_v38 }
 0x825   : > { %2283 = vmatprep.mubr.f32.mxu1 %v2137_v31  ;;  %v3274_v11 = vpop.eup %3273  ;;  %v2129_v35 = vadd.f32 1.0, %v3272_v7  ;;  %v2140_v50 = vmul.f32 %v2128_v10, %v2092_v46 }
 0x826   : > { %2363 = vmatprep.mubr.f32.mxu0 %v2139_v42  ;;  %2284 = vmatmul.mubr.f32.vlgmr.msra.gmra.mrb[42].mxu1 %v2136_v40  ;;  %v2131_v48 = vadd.f32 1.0, %v3274_v11  ;;  %v2142_v56 = vmul.f32 %v2130_v45, %v2094_v32 }
 0x827   : > { %2364 = vmatmul.mubr.f32.vlgmr.msra.gmra.mrb[36].mxu0 %v2138_v43  ;;  %v3276_v51 = vpop.eup %3275  ;;  %v2141_v52 = vmul.f32 %v2129_v35, %v2093_v24 }
 0x828   : > { %v3278_v34 = vpop.eup %3277  ;;  %v2143_v39 = vmul.f32 %v2131_v48, %v2095_v47  ;;  %v2132_v44 = vadd.f32 1.0, %v3276_v51 }
 0x829   : > { %v3280_v55 = vpop.eup %3279  ;;  %2288 = vmatprep.mubr.f32.mxu1 %v2141_v52  ;;  %v2134_v22 = vadd.f32 1.0, %v3278_v34 }
 0x82a   : > { %v3282_v53 = vpop.eup %3281  ;;  %v2133_v17 = vadd.f32 1.0, %v3280_v55  ;;  %2368 = vmatprep.mubr.f32.mxu0 %v2143_v39  ;;  %2289 = vmatmul.mubr.f32.gmra.mrb[44].mxu1 %v2140_v50  ;;  %v2144_v61 = vmul.f32 %v2132_v44, %v2096_v3  ;;  %v2540_v44 = vld [vmem:[%s4435_s11] ss:$0 sm:$0xff] }
 0x82b   : > { %v2135_v19 = vadd.f32 1.0, %v3282_v53  ;;  %2369 = vmatmul.mubr.f32.gmra.mrb[38].mxu0 %v2142_v56  ;;  %v2146_v54 = vmul.f32 %v2134_v22, %v2098_v16  ;;  %v2541_v53 = vld [vmem:[%s4436_s12] ss:$0 sm:$0xff] }
 0x82c   : > { %v2145_v57 = vmul.f32 %v2133_v17, %v2097_v49 }
 0x82d   : > { %v2147_v60 = vmul.f32 %v2135_v19, %v2099_v58 }
 0x82e   : > { %2293 = vmatprep.mubr.f32.mxu1 %v2145_v57 }
 0x82f   : > { %2373 = vmatprep.mubr.f32.mxu0 %v2147_v60  ;;  %2294 = vmatmul.mubr.f32.gmra.mrb[46].mxu1 %v2144_v61 }
 0x830   : > { %2374 = vmatmul.mubr.f32.gmra.mrb[40].mxu0 %v2146_v54 }
 0x8f9   : > { %v2662_v62 = vpop.f32.mrb[42].mxu1 }
 0x8fa   : > { %v2703_v63 = vpop.f32.mrb[36].mxu0  ;;  %v2663_v2 = vpop.f32.mrb[43].mxu1 }
 0x8fb   : > { %v2664_v8 = vadd.f32 %v2663_v2, %v2662_v62  ;;  %v2704_v4 = vpop.f32.mrb[37].mxu0 }
 0x8fc   : > { %v2705_v9 = vadd.f32 %v2704_v4, %v2703_v63 }
 0x8fd   : > { %v2286_v13 = vadd.f32 %v2664_v8, %v2539_v59  ;;  %v2665_v0 = vpop.f32.mrb[44].mxu1 }
 0x8fe   : > { %v2706_v15 = vpop.f32.mrb[38].mxu0  ;;  %v2666_v18 = vpop.f32.mrb[45].mxu1 }
 0x8ff   : > { %v2366_v14 = vadd.f32 %v2705_v9, %v2286_v13  ;;  %v2667_v20 = vadd.f32 %v2666_v18, %v2665_v0  ;;  %v2707_v21 = vpop.f32.mrb[39].mxu0 }
 0x900   : > { %v2708_v25 = vadd.f32 %v2707_v21, %v2706_v15 }
 0x901   : > { %v2379_v23 = vadd.f32 %v2366_v14, %v4216_v1  ;;  %v2291_v27 = vadd.f32 %v2667_v20, %v2539_v59 }
 0x902   : > { %v2668_v5 = vpop.f32.mrb[46].mxu1 }
 0x903   : > { %2384 = vadd.xlane.f32.xlu1 %v2379_v23  ;;  %v2371_v29 = vadd.f32 %v2708_v25, %v2291_v27  ;;  %v2709_v12 = vpop.f32.mrb[40].mxu0  ;;  %v2669_v6 = vpop.f32.mrb[47].mxu1 }
 0x904   : > { %v2670_v33 = vadd.f32 %v2669_v6, %v2668_v5  ;;  %v2710_v36 = vpop.f32.mrb[41].mxu0 }
 0x905   : > { %v2711_v28 = vadd.f32 %v2710_v36, %v2709_v12  ;;  %v2380_v37 = vadd.f32 %v2371_v29, %v4247_v30 }
 0x906   : > { %v2296_v26 = vadd.f32 %v2670_v33, %v2539_v59 }
 0x907   : > { %2386 = vadd.xlane.f32.xlu0 %v2380_v37 }
 0x908   : > { %v2376_v31 = vadd.f32 %v2711_v28, %v2296_v26 }
 0x90a   : > { %v2381_v38 = vadd.f32 %v2376_v31, %v4266_v41 }
 0x90c   : > { %2388 = vadd.xlane.f32.xlu1 %v2381_v38 }
 0x990   : > { %v2385_v40 = vpop.xlane.xlu1 %2384 }
 0x991   : > { %v2390_v42 = vmul.f32 0.0078125, %v2385_v40 }
 0x993   : > { %v2393_v1 = vsub.f32 %v2379_v23, %v2390_v42 }
 0x994   : > { %v2387_v7 = vpop.xlane.xlu0 %2386 }
 0x995   : > { %v2396_v43 = vmul.f32 %v2393_v1, %v2393_v1  ;;  %v2391_v10 = vmul.f32 0.0078125, %v2387_v7 }
 0x997   : > { %2399 = vadd.xlane.f32.xlu0 %v2396_v43  ;;  %v2394_v11 = vsub.f32 %v2380_v37, %v2391_v10 }
 0x999   : > { %v2389_v45 = vpop.xlane.xlu1 %2388  ;;  %v2397_v24 = vmul.f32 %v2394_v11, %v2394_v11 }
 0x99a   : > { %v2392_v35 = vmul.f32 0.0078125, %v2389_v45 }
 0x99b   : > { %2401 = vadd.xlane.f32.xlu1 %v2397_v24 }
 0x99c   : > { %v2395_v46 = vsub.f32 %v2381_v38, %v2392_v35 }
 0x99e   : > { %v2398_v30 = vmul.f32 %v2395_v46, %v2395_v46 }
 0x9a0   : > { %2403 = vadd.xlane.f32.xlu0 %v2398_v30 }
 0xa24   : > { %v2400_v47 = vpop.xlane.xlu0 %2399 }
 0xa25   : > { %v2405_v48 = vmul.f32 0.0078125, %v2400_v47 }
 0xa27   : > { %v2408_v41 = vadd.f32 1e-05, %v2405_v48 }
 0xa28   : > { %v2402_v51 = vpop.xlane.xlu1 %2401 }
 0xa29   : > { %3283 = vrsqrt.f32 %v2408_v41  ;;  %v2406_v32 = vmul.f32 0.0078125, %v2402_v51 }
 0xa2b   : > { %v2409_v52 = vadd.f32 1e-05, %v2406_v32 }
 0xa2d   : > { %3285 = vrsqrt.f32 %v2409_v52  ;;  %v2404_v34 = vpop.xlane.xlu0 %2403 }
 0xa2e   : > { %v2407_v39 = vmul.f32 0.0078125, %v2404_v34 }
 0xa30   : > { %v2410_v50 = vadd.f32 1e-05, %v2407_v39 }
 0xa32   : > { %3287 = vrsqrt.f32 %v2410_v50 }
 0xa33   : > { %v3284_v55 = vpop.eup %3283 }
 0xa34   : > { %v2414_v56 = vmul.f32 %v3284_v55, %v2393_v1 }
 0xa36   : > { %v2423_v22 = vmul.f32 %v2540_v44, %v2414_v56 }
 0xa37   : > { %v3286_v49 = vpop.eup %3285 }
 0xa38   : > { %v2432_v17 = vadd.f32 %v2541_v53, %v2423_v22  ;;  %v2415_v3 = vmul.f32 %v3286_v49, %v2394_v11 }
 0xa3a   : > { %2435 = vst [vmem:[%s440_s18] sm:$0xff] %v2432_v17  ;;  %v2424_v58 = vmul.f32 %v2540_v44, %v2415_v3 }
 0xa3c   : > { %v3288_v19 = vpop.eup %3287  ;;  %v2433_v16 = vadd.f32 %v2541_v53, %v2424_v58 }
 0xa3d   : > { %v2416_v57 = vmul.f32 %v3288_v19, %v2395_v46 }
 0xa3e   : > { %2436 = vst [vmem:[%s440_s18 + $0x8] sm:$0xff] %v2433_v16 }
 0xa3f   : > { %v2425_v60 = vmul.f32 %v2540_v44, %v2416_v57 }
 0xa41   : > { %v2434_v61 = vadd.f32 %v2541_v53, %v2425_v60 }
 0xa43   : > { %2437 = vst [vmem:[%s440_s18 + $0x10] sm:$0xff] %v2434_v61 }
 0xa44 PF: > { %s23_s25 = sadd.s32 1, %s3298_s25  }
 0xa45   : > { %p20_p4 = scmp.ge.s32.totalorder %s23_s25, 4  }
 0xa47   :  { %22 = sbr.rel (!%p20_p4) target bundleno = 1 (0x1), region = 102 }

</bundles_post_ra>
